<compile_context>
chip_gen: v6e
topology: v6e:2x2x1
jax: 0.10.0
libtpu: 0.0.40
codegen_flags: <defaults>
</compile_context>

<pallas_src>
import functools

import jax
import jax.numpy as jnp
from jax.experimental import pallas as pl
from jax.experimental.pallas import tpu as pltpu


# ----------------------------------------------------------------------------
# Fused kernel builder (whole network in one pallas_call, no grid: everything
# is small enough to live in VMEM for the entire forward pass).
# ----------------------------------------------------------------------------
@functools.lru_cache(maxsize=None)
def _build_fused_forward(T, B, H, Cp):
    TB = T * B

    def lstm_cell(gx_t, h, c, whh):
        # gx_t already contains x_t @ W_ih + b.  One lane-dense (B,H)@(H,4H) MXU op,
        # one 128-lane add, then per-gate lane slices + EUP nonlinearities.
        gates = gx_t + jnp.dot(h, whh, preferred_element_type=jnp.float32)   # (B, 4H)
        i_g = jax.nn.sigmoid(gates[:, 0 * H:1 * H])
        f_g = jax.nn.sigmoid(gates[:, 1 * H:2 * H])
        g_g = jnp.tanh(gates[:, 2 * H:3 * H])
        o_g = jax.nn.sigmoid(gates[:, 3 * H:4 * H])
        c = f_g * c + i_g * g_g
        h = o_g * jnp.tanh(c)
        return h, c

    def run_layer(gx, whh_f, whh_b, hf_ref, hb_ref):
        # Both directions interleaved in the same fully-unrolled loop so their
        # independent dependency chains overlap on MXU/EUP/VPU.
        gxf = gx[:, :4 * H]          # (TB, 4H) forward-direction input gates
        gxb = gx[:, 4 * H:]          # (TB, 4H) backward-direction input gates
        hf = jnp.zeros((B, H), jnp.float32)
        cf = jnp.zeros((B, H), jnp.float32)
        hb = jnp.zeros((B, H), jnp.float32)
        cb = jnp.zeros((B, H), jnp.float32)
        for s in range(T):                                  # static T, fully unrolled
            tf, tb = s, T - 1 - s
            hf, cf = lstm_cell(gxf[tf * B:(tf + 1) * B], hf, cf, whh_f)
            hb, cb = lstm_cell(gxb[tb * B:(tb + 1) * B], hb, cb, whh_b)
            hf_ref[tf * B:(tf + 1) * B, :] = hf
            hb_ref[tb * B:(tb + 1) * B, :] = hb

    def kernel(x0_ref, wih0_ref, b0_ref, whh0f_ref, whh0b_ref,
               wih1t_ref, wih1b_ref, b1_ref, whh1f_ref, whh1b_ref,
               cwt_ref, cwb_ref, cb_ref,
               out_ref,
               h0f_ref, h0b_ref, h1f_ref, h1b_ref):

        # ---- layer 0: one big input-projection matmul for BOTH directions ----
        gx0 = (jnp.dot(x0_ref[...], wih0_ref[...],
                       preferred_element_type=jnp.float32) + b0_ref[...])        # (TB, 8H)
        run_layer(gx0, whh0f_ref[...], whh0b_ref[...], h0f_ref, h0b_ref)

        # ---- layer 1 input projection from layer-0 outputs (split weights, no concat) ----
        gx1 = (jnp.dot(h0f_ref[...], wih1t_ref[...], preferred_element_type=jnp.float32)
               + jnp.dot(h0b_ref[...], wih1b_ref[...], preferred_element_type=jnp.float32)
               + b1_ref[...])                                                     # (TB, 8H)
        run_layer(gx1, whh1f_ref[...], whh1b_ref[...], h1f_ref, h1b_ref)

        # ---- classifier epilogue: lane-dense padded output (TB, Cp) ----
        out_ref[...] = (jnp.dot(h1f_ref[...], cwt_ref[...], preferred_element_type=jnp.float32)
                        + jnp.dot(h1b_ref[...], cwb_ref[...], preferred_element_type=jnp.float32)
                        + cb_ref[...])

    return pl.pallas_call(
        kernel,
        out_shape=jax.ShapeDtypeStruct((TB, Cp), jnp.float32),
        in_specs=[pl.BlockSpec(memory_space=pltpu.MemorySpace.VMEM)] * 13,
        out_specs=pl.BlockSpec(memory_space=pltpu.MemorySpace.VMEM),
        scratch_shapes=[pltpu.VMEM((TB, H), jnp.float32)] * 4,   # h0f, h0b, h1f, h1b
    )


# ----------------------------------------------------------------------------
# Parameter construction (deterministic, PyTorch-like init ranges), packed into
# the fused-kernel layout.  Anyone loading real nn.LSTM weights must transpose
# (4H, D) -> (D, 4H) and sum the two biases.
# ----------------------------------------------------------------------------
def init_params(key, *, embedding_size, hidden_size, vocab_size, target_size):
    E, H, C = embedding_size, hidden_size, target_size
    Cp = max(128, ((C + 127) // 128) * 128)   # lane-dense classifier output width
    keys = jax.random.split(key, 40)
    ki = iter(keys)

    def unif(k, shape, bound):
        return jax.random.uniform(k, shape, jnp.float32, -bound, bound)

    params = {"hidden_size": H, "target_size": C}
    params["embedding"] = jax.random.normal(next(ki), (vocab_size, E), jnp.float32)

    kH = 1.0 / jnp.sqrt(H)
    raw = {}
    for layer, D in ((0, E), (1, 2 * H)):
        for d in ("f", "b"):
            raw[f"wih{layer}{d}"] = unif(next(ki), (D, 4 * H), kH)
            raw[f"whh{layer}{d}"] = unif(next(ki), (H, 4 * H), kH)
            raw[f"bias{layer}{d}"] = (unif(next(ki), (1, 4 * H), kH)
                                      + unif(next(ki), (1, 4 * H), kH))   # b_ih + b_hh

    # Layer 0: fuse both directions along lanes.
    params["wih0"] = jnp.concatenate([raw["wih0f"], raw["wih0b"]], axis=1)   # (E, 8H)
    params["b0"] = jnp.concatenate([raw["bias0f"], raw["bias0b"]], axis=1)   # (1, 8H)
    params["whh0f"] = raw["whh0f"]
    params["whh0b"] = raw["whh0b"]

    # Layer 1: fuse directions along lanes, split rows into the h_fwd / h_bwd halves.
    wih1 = jnp.concatenate([raw["wih1f"], raw["wih1b"]], axis=1)             # (2H, 8H)
    params["wih1_top"] = wih1[:H]
    params["wih1_bot"] = wih1[H:]
    params["b1"] = jnp.concatenate([raw["bias1f"], raw["bias1b"]], axis=1)   # (1, 8H)
    params["whh1f"] = raw["whh1f"]
    params["whh1b"] = raw["whh1b"]

    # Classifier, padded to Cp lanes and split into h_fwd / h_bwd halves.
    kC = 1.0 / jnp.sqrt(2 * H)
    cls_w = unif(next(ki), (2 * H, C), kC)
    cls_b = unif(next(ki), (C,), kC)
    cls_w_p = jnp.zeros((2 * H, Cp), jnp.float32).at[:, :C].set(cls_w)
    params["cls_w_top"] = cls_w_p[:H]
    params["cls_w_bot"] = cls_w_p[H:]
    params["cls_b"] = jnp.zeros((1, Cp), jnp.float32).at[0, :C].set(cls_b)
    return params


# ----------------------------------------------------------------------------
# Full forward: embedding -> 2-layer BiLSTM -> classifier (one fused kernel)
# ----------------------------------------------------------------------------
def bilstm_crf_forward(params, input_ids):
    B, T = input_ids.shape
    H = params["hidden_size"]
    C = params["target_size"]
    Cp = params["cls_b"].shape[1]

    # Embedding gather, directly in time-major order (only int ids are transposed).
    # TODO(synk): could be moved in-kernel via scalar-prefetched ids + row-gather BlockSpec.
    ids_tm = input_ids.T.reshape(-1)                                # (T*B,)
    x0 = jnp.take(params["embedding"], ids_tm, axis=0)              # (T*B, E)

    out = _build_fused_forward(T, B, H, Cp)(
        x0,
        params["wih0"], params["b0"], params["whh0f"], params["whh0b"],
        params["wih1_top"], params["wih1_bot"], params["b1"],
        params["whh1f"], params["whh1b"],
        params["cls_w_top"], params["cls_w_bot"], params["cls_b"])  # (T*B, Cp)

    return out.reshape(T, B, Cp)[:, :, :C].transpose(1, 0, 2)       # (B, T, target_size)


# ----------------------------------------------------------------------------
# Pure-JAX reference (same packed params) for correctness checking.
# ----------------------------------------------------------------------------
def reference_forward(params, input_ids):
    H = params["hidden_size"]
    C = params["target_size"]
    emb = params["embedding"][input_ids]                            # (B, T, E)

    def lstm_dir(x, w_ih, w_hh, b, reverse):                        # x: (B, T, D)
        Bb, Tt, _ = x.shape

        def step(carry, xt):
            h, c = carry
            gates = xt @ w_ih + h @ w_hh + b
            i = jax.nn.sigmoid(gates[:, :H])
            f = jax.nn.sigmoid(gates[:, H:2 * H])
            g = jnp.tanh(gates[:, 2 * H:3 * H])
            o = jax.nn.sigmoid(gates[:, 3 * H:])
            c = f * c + i * g
            h = o * jnp.tanh(c)
            return (h, c), h

        xs = jnp.transpose(x, (1, 0, 2))
        if reverse:
            xs = xs[::-1]
        _, hs = jax.lax.scan(step, (jnp.zeros((Bb, H)), jnp.zeros((Bb, H))), xs)
        if reverse:
            hs = hs[::-1]
        return jnp.transpose(hs, (1, 0, 2))                         # (B, T, H)

    x = emb
    f0 = lstm_dir(x, params["wih0"][:, :4 * H], params["whh0f"], params["b0"][:, :4 * H], False)
    r0 = lstm_dir(x, params["wih0"][:, 4 * H:], params["whh0b"], params["b0"][:, 4 * H:], True)
    x = jnp.concatenate([f0, r0], axis=-1)
    wih1 = jnp.concatenate([params["wih1_top"], params["wih1_bot"]], axis=0)
    f1 = lstm_dir(x, wih1[:, :4 * H], params["whh1f"], params["b1"][:, :4 * H], False)
    r1 = lstm_dir(x, wih1[:, 4 * H:], params["whh1b"], params["b1"][:, 4 * H:], True)
    x = jnp.concatenate([f1, r1], axis=-1)                          # (B, T, 2H)
    cls_w = jnp.concatenate([params["cls_w_top"], params["cls_w_bot"]], axis=0)
    return (x @ cls_w + params["cls_b"])[:, :, :C]


if __name__ == "__main__":
    embedding_size = 32
    hidden_size = 32
    vocab_size = 50
    target_size = 8
    B, T = 2, 8

    key = jax.random.PRNGKey(0)
    k_param, k_ids = jax.random.split(key)
    params = init_params(k_param,
                         embedding_size=embedding_size,
                         hidden_size=hidden_size,
                         vocab_size=vocab_size,
                         target_size=target_size)
    input_ids = jax.random.randint(k_ids, (B, T), 0, vocab_size, dtype=jnp.int32)

    fwd = jax.jit(functools.partial(bilstm_crf_forward, params))
    tag_scores = fwd(input_ids)
    jax.block_until_ready(tag_scores)

    assert tag_scores.shape == (B, T, target_size)
    assert tag_scores.dtype == jnp.float32

    ref = reference_forward(params, input_ids)
    assert bool(jnp.allclose(tag_scores, ref, atol=1e-4, rtol=1e-4)), (
        "Pallas kernel does not match JAX reference")

    print("KERNEL_OK")
</pallas_src>

<mosaic_0001>
module attributes {stable_mosaic.version = 11 : i64} {
  func.func @kernel(%arg0: memref<16x32xf32, #tpu.memory_space<vmem>>, %arg1: memref<32x256xf32, #tpu.memory_space<vmem>>, %arg2: memref<1x256xf32, #tpu.memory_space<vmem>>, %arg3: memref<32x128xf32, #tpu.memory_space<vmem>>, %arg4: memref<32x128xf32, #tpu.memory_space<vmem>>, %arg5: memref<32x256xf32, #tpu.memory_space<vmem>>, %arg6: memref<32x256xf32, #tpu.memory_space<vmem>>, %arg7: memref<1x256xf32, #tpu.memory_space<vmem>>, %arg8: memref<32x128xf32, #tpu.memory_space<vmem>>, %arg9: memref<32x128xf32, #tpu.memory_space<vmem>>, %arg10: memref<32x128xf32, #tpu.memory_space<vmem>>, %arg11: memref<32x128xf32, #tpu.memory_space<vmem>>, %arg12: memref<1x128xf32, #tpu.memory_space<vmem>>, %arg13: memref<16x128xf32, #tpu.memory_space<vmem>>, %arg14: memref<16x32xf32, #tpu.memory_space<vmem>>, %arg15: memref<16x32xf32, #tpu.memory_space<vmem>>, %arg16: memref<16x32xf32, #tpu.memory_space<vmem>>, %arg17: memref<16x32xf32, #tpu.memory_space<vmem>>) attributes {dimension_semantics = [], scalar_prefetch = 0 : i64, scratch_operands = 4 : i64, tpu.core_type = #tpu.core_type<tc>} {
    %c0 = arith.constant 0 : index
    %c0_0 = arith.constant 0 : index
    %0 = vector.load %arg0[%c0, %c0_0] : memref<16x32xf32, #tpu.memory_space<vmem>>, vector<16x32xf32>
    %c0_1 = arith.constant 0 : index
    %c0_2 = arith.constant 0 : index
    %1 = vector.load %arg1[%c0_1, %c0_2] : memref<32x256xf32, #tpu.memory_space<vmem>>, vector<32x256xf32>
    %cst = arith.constant dense<0.000000e+00> : vector<16x256xf32>
    %2 = tpu.matmul %0, %1, %cst {dimension_numbers = #tpu.dot_dimension_numbers<[1], [0], [0], [1], [0, 0, 1, 1], [], []>} : vector<16x32xf32>, vector<32x256xf32>, vector<16x256xf32> -> vector<16x256xf32>
    %c0_3 = arith.constant 0 : index
    %c0_4 = arith.constant 0 : index
    %3 = vector.load %arg2[%c0_3, %c0_4] : memref<1x256xf32, #tpu.memory_space<vmem>>, vector<1x256xf32>
    %4 = vector.broadcast %3 : vector<1x256xf32> to vector<16x256xf32>
    %5 = arith.addf %2, %4 : vector<16x256xf32>
    %c0_5 = arith.constant 0 : index
    %c0_6 = arith.constant 0 : index
    %6 = vector.load %arg3[%c0_5, %c0_6] : memref<32x128xf32, #tpu.memory_space<vmem>>, vector<32x128xf32>
    %c0_7 = arith.constant 0 : index
    %c0_8 = arith.constant 0 : index
    %7 = vector.load %arg4[%c0_7, %c0_8] : memref<32x128xf32, #tpu.memory_space<vmem>>, vector<32x128xf32>
    %8 = vector.extract_strided_slice %5 {offsets = [0, 0], sizes = [16, 128], strides = [1, 1]} : vector<16x256xf32> to vector<16x128xf32>
    %9 = vector.extract_strided_slice %5 {offsets = [0, 128], sizes = [16, 128], strides = [1, 1]} : vector<16x256xf32> to vector<16x128xf32>
    %cst_9 = arith.constant 0.000000e+00 : f32
    %10 = vector.broadcast %cst_9 : f32 to vector<2x32xf32>
    %cst_10 = arith.constant 0.000000e+00 : f32
    %11 = vector.broadcast %cst_10 : f32 to vector<2x32xf32>
    %cst_11 = arith.constant 0.000000e+00 : f32
    %12 = vector.broadcast %cst_11 : f32 to vector<2x32xf32>
    %cst_12 = arith.constant 0.000000e+00 : f32
    %13 = vector.broadcast %cst_12 : f32 to vector<2x32xf32>
    %14 = vector.extract_strided_slice %8 {offsets = [0, 0], sizes = [2, 128], strides = [1, 1]} : vector<16x128xf32> to vector<2x128xf32>
    %cst_13 = arith.constant dense<0.000000e+00> : vector<2x128xf32>
    %15 = tpu.matmul %10, %6, %cst_13 {dimension_numbers = #tpu.dot_dimension_numbers<[1], [0], [0], [1], [0, 0, 1, 1], [], []>} : vector<2x32xf32>, vector<32x128xf32>, vector<2x128xf32> -> vector<2x128xf32>
    %16 = arith.addf %14, %15 : vector<2x128xf32>
    %17 = vector.extract_strided_slice %16 {offsets = [0, 0], sizes = [2, 32], strides = [1, 1]} : vector<2x128xf32> to vector<2x32xf32>
    %18 = arith.negf %17 : vector<2x32xf32>
    %19 = math.exp %18 : vector<2x32xf32>
    %cst_14 = arith.constant 1.000000e+00 : f32
    %20 = vector.broadcast %cst_14 : f32 to vector<2x32xf32>
    %21 = arith.addf %20, %19 : vector<2x32xf32>
    %22 = arith.divf %20, %21 : vector<2x32xf32>
    %23 = vector.extract_strided_slice %16 {offsets = [0, 32], sizes = [2, 32], strides = [1, 1]} : vector<2x128xf32> to vector<2x32xf32>
    %24 = arith.negf %23 : vector<2x32xf32>
    %25 = math.exp %24 : vector<2x32xf32>
    %cst_15 = arith.constant 1.000000e+00 : f32
    %26 = vector.broadcast %cst_15 : f32 to vector<2x32xf32>
    %27 = arith.addf %26, %25 : vector<2x32xf32>
    %28 = arith.divf %26, %27 : vector<2x32xf32>
    %29 = vector.extract_strided_slice %16 {offsets = [0, 64], sizes = [2, 32], strides = [1, 1]} : vector<2x128xf32> to vector<2x32xf32>
    %30 = math.tanh %29 : vector<2x32xf32>
    %31 = vector.extract_strided_slice %16 {offsets = [0, 96], sizes = [2, 32], strides = [1, 1]} : vector<2x128xf32> to vector<2x32xf32>
    %32 = arith.negf %31 : vector<2x32xf32>
    %33 = math.exp %32 : vector<2x32xf32>
    %cst_16 = arith.constant 1.000000e+00 : f32
    %34 = vector.broadcast %cst_16 : f32 to vector<2x32xf32>
    %35 = arith.addf %34, %33 : vector<2x32xf32>
    %36 = arith.divf %34, %35 : vector<2x32xf32>
    %37 = arith.mulf %28, %11 : vector<2x32xf32>
    %38 = arith.mulf %22, %30 : vector<2x32xf32>
    %39 = arith.addf %37, %38 : vector<2x32xf32>
    %40 = math.tanh %39 : vector<2x32xf32>
    %41 = arith.mulf %36, %40 : vector<2x32xf32>
    %42 = vector.extract_strided_slice %9 {offsets = [14, 0], sizes = [2, 128], strides = [1, 1]} : vector<16x128xf32> to vector<2x128xf32>
    %cst_17 = arith.constant dense<0.000000e+00> : vector<2x128xf32>
    %43 = tpu.matmul %12, %7, %cst_17 {dimension_numbers = #tpu.dot_dimension_numbers<[1], [0], [0], [1], [0, 0, 1, 1], [], []>} : vector<2x32xf32>, vector<32x128xf32>, vector<2x128xf32> -> vector<2x128xf32>
    %44 = arith.addf %42, %43 : vector<2x128xf32>
    %45 = vector.extract_strided_slice %44 {offsets = [0, 0], sizes = [2, 32], strides = [1, 1]} : vector<2x128xf32> to vector<2x32xf32>
    %46 = arith.negf %45 : vector<2x32xf32>
    %47 = math.exp %46 : vector<2x32xf32>
    %cst_18 = arith.constant 1.000000e+00 : f32
    %48 = vector.broadcast %cst_18 : f32 to vector<2x32xf32>
    %49 = arith.addf %48, %47 : vector<2x32xf32>
    %50 = arith.divf %48, %49 : vector<2x32xf32>
    %51 = vector.extract_strided_slice %44 {offsets = [0, 32], sizes = [2, 32], strides = [1, 1]} : vector<2x128xf32> to vector<2x32xf32>
    %52 = arith.negf %51 : vector<2x32xf32>
    %53 = math.exp %52 : vector<2x32xf32>
    %cst_19 = arith.constant 1.000000e+00 : f32
    %54 = vector.broadcast %cst_19 : f32 to vector<2x32xf32>
    %55 = arith.addf %54, %53 : vector<2x32xf32>
    %56 = arith.divf %54, %55 : vector<2x32xf32>
    %57 = vector.extract_strided_slice %44 {offsets = [0, 64], sizes = [2, 32], strides = [1, 1]} : vector<2x128xf32> to vector<2x32xf32>
    %58 = math.tanh %57 : vector<2x32xf32>
    %59 = vector.extract_strided_slice %44 {offsets = [0, 96], sizes = [2, 32], strides = [1, 1]} : vector<2x128xf32> to vector<2x32xf32>
    %60 = arith.negf %59 : vector<2x32xf32>
    %61 = math.exp %60 : vector<2x32xf32>
    %cst_20 = arith.constant 1.000000e+00 : f32
    %62 = vector.broadcast %cst_20 : f32 to vector<2x32xf32>
    %63 = arith.addf %62, %61 : vector<2x32xf32>
    %64 = arith.divf %62, %63 : vector<2x32xf32>
    %65 = arith.mulf %56, %13 : vector<2x32xf32>
    %66 = arith.mulf %50, %58 : vector<2x32xf32>
    %67 = arith.addf %65, %66 : vector<2x32xf32>
    %68 = math.tanh %67 : vector<2x32xf32>
    %69 = arith.mulf %64, %68 : vector<2x32xf32>
    %c0_21 = arith.constant 0 : index
    %c0_22 = arith.constant 0 : index
    %70 = vector.load %arg14[%c0_21, %c0_22] : memref<16x32xf32, #tpu.memory_space<vmem>>, vector<2x32xf32>
    tpu.vector_store %arg14[%c0_21, %c0_22], %41 {strides = array<i32>} : memref<16x32xf32, #tpu.memory_space<vmem>>, vector<2x32xf32>,
    %c14 = arith.constant 14 : index
    %c0_23 = arith.constant 0 : index
    %71 = vector.load %arg15[%c14, %c0_23] : memref<16x32xf32, #tpu.memory_space<vmem>>, vector<2x32xf32>
    tpu.vector_store %arg15[%c14, %c0_23], %69 {strides = array<i32>} : memref<16x32xf32, #tpu.memory_space<vmem>>, vector<2x32xf32>,
    %72 = vector.extract_strided_slice %8 {offsets = [2, 0], sizes = [2, 128], strides = [1, 1]} : vector<16x128xf32> to vector<2x128xf32>
    %cst_24 = arith.constant dense<0.000000e+00> : vector<2x128xf32>
    %73 = tpu.matmul %41, %6, %cst_24 {dimension_numbers = #tpu.dot_dimension_numbers<[1], [0], [0], [1], [0, 0, 1, 1], [], []>} : vector<2x32xf32>, vector<32x128xf32>, vector<2x128xf32> -> vector<2x128xf32>
    %74 = arith.addf %72, %73 : vector<2x128xf32>
    %75 = vector.extract_strided_slice %74 {offsets = [0, 0], sizes = [2, 32], strides = [1, 1]} : vector<2x128xf32> to vector<2x32xf32>
    %76 = arith.negf %75 : vector<2x32xf32>
    %77 = math.exp %76 : vector<2x32xf32>
    %cst_25 = arith.constant 1.000000e+00 : f32
    %78 = vector.broadcast %cst_25 : f32 to vector<2x32xf32>
    %79 = arith.addf %78, %77 : vector<2x32xf32>
    %80 = arith.divf %78, %79 : vector<2x32xf32>
    %81 = vector.extract_strided_slice %74 {offsets = [0, 32], sizes = [2, 32], strides = [1, 1]} : vector<2x128xf32> to vector<2x32xf32>
    %82 = arith.negf %81 : vector<2x32xf32>
    %83 = math.exp %82 : vector<2x32xf32>
    %cst_26 = arith.constant 1.000000e+00 : f32
    %84 = vector.broadcast %cst_26 : f32 to vector<2x32xf32>
    %85 = arith.addf %84, %83 : vector<2x32xf32>
    %86 = arith.divf %84, %85 : vector<2x32xf32>
    %87 = vector.extract_strided_slice %74 {offsets = [0, 64], sizes = [2, 32], strides = [1, 1]} : vector<2x128xf32> to vector<2x32xf32>
    %88 = math.tanh %87 : vector<2x32xf32>
    %89 = vector.extract_strided_slice %74 {offsets = [0, 96], sizes = [2, 32], strides = [1, 1]} : vector<2x128xf32> to vector<2x32xf32>
    %90 = arith.negf %89 : vector<2x32xf32>
    %91 = math.exp %90 : vector<2x32xf32>
    %cst_27 = arith.constant 1.000000e+00 : f32
    %92 = vector.broadcast %cst_27 : f32 to vector<2x32xf32>
    %93 = arith.addf %92, %91 : vector<2x32xf32>
    %94 = arith.divf %92, %93 : vector<2x32xf32>
    %95 = arith.mulf %86, %39 : vector<2x32xf32>
    %96 = arith.mulf %80, %88 : vector<2x32xf32>
    %97 = arith.addf %95, %96 : vector<2x32xf32>
    %98 = math.tanh %97 : vector<2x32xf32>
    %99 = arith.mulf %94, %98 : vector<2x32xf32>
    %100 = vector.extract_strided_slice %9 {offsets = [12, 0], sizes = [2, 128], strides = [1, 1]} : vector<16x128xf32> to vector<2x128xf32>
    %cst_28 = arith.constant dense<0.000000e+00> : vector<2x128xf32>
    %101 = tpu.matmul %69, %7, %cst_28 {dimension_numbers = #tpu.dot_dimension_numbers<[1], [0], [0], [1], [0, 0, 1, 1], [], []>} : vector<2x32xf32>, vector<32x128xf32>, vector<2x128xf32> -> vector<2x128xf32>
    %102 = arith.addf %100, %101 : vector<2x128xf32>
    %103 = vector.extract_strided_slice %102 {offsets = [0, 0], sizes = [2, 32], strides = [1, 1]} : vector<2x128xf32> to vector<2x32xf32>
    %104 = arith.negf %103 : vector<2x32xf32>
    %105 = math.exp %104 : vector<2x32xf32>
    %cst_29 = arith.constant 1.000000e+00 : f32
    %106 = vector.broadcast %cst_29 : f32 to vector<2x32xf32>
    %107 = arith.addf %106, %105 : vector<2x32xf32>
    %108 = arith.divf %106, %107 : vector<2x32xf32>
    %109 = vector.extract_strided_slice %102 {offsets = [0, 32], sizes = [2, 32], strides = [1, 1]} : vector<2x128xf32> to vector<2x32xf32>
    %110 = arith.negf %109 : vector<2x32xf32>
    %111 = math.exp %110 : vector<2x32xf32>
    %cst_30 = arith.constant 1.000000e+00 : f32
    %112 = vector.broadcast %cst_30 : f32 to vector<2x32xf32>
    %113 = arith.addf %112, %111 : vector<2x32xf32>
    %114 = arith.divf %112, %113 : vector<2x32xf32>
    %115 = vector.extract_strided_slice %102 {offsets = [0, 64], sizes = [2, 32], strides = [1, 1]} : vector<2x128xf32> to vector<2x32xf32>
    %116 = math.tanh %115 : vector<2x32xf32>
    %117 = vector.extract_strided_slice %102 {offsets = [0, 96], sizes = [2, 32], strides = [1, 1]} : vector<2x128xf32> to vector<2x32xf32>
    %118 = arith.negf %117 : vector<2x32xf32>
    %119 = math.exp %118 : vector<2x32xf32>
    %cst_31 = arith.constant 1.000000e+00 : f32
    %120 = vector.broadcast %cst_31 : f32 to vector<2x32xf32>
    %121 = arith.addf %120, %119 : vector<2x32xf32>
    %122 = arith.divf %120, %121 : vector<2x32xf32>
    %123 = arith.mulf %114, %67 : vector<2x32xf32>
    %124 = arith.mulf %108, %116 : vector<2x32xf32>
    %125 = arith.addf %123, %124 : vector<2x32xf32>
    %126 = math.tanh %125 : vector<2x32xf32>
    %127 = arith.mulf %122, %126 : vector<2x32xf32>
    %c2 = arith.constant 2 : index
    %c0_32 = arith.constant 0 : index
    %128 = vector.load %arg14[%c2, %c0_32] : memref<16x32xf32, #tpu.memory_space<vmem>>, vector<2x32xf32>
    tpu.vector_store %arg14[%c2, %c0_32], %99 {strides = array<i32>} : memref<16x32xf32, #tpu.memory_space<vmem>>, vector<2x32xf32>,
    %c12 = arith.constant 12 : index
    %c0_33 = arith.constant 0 : index
    %129 = vector.load %arg15[%c12, %c0_33] : memref<16x32xf32, #tpu.memory_space<vmem>>, vector<2x32xf32>
    tpu.vector_store %arg15[%c12, %c0_33], %127 {strides = array<i32>} : memref<16x32xf32, #tpu.memory_space<vmem>>, vector<2x32xf32>,
    %130 = vector.extract_strided_slice %8 {offsets = [4, 0], sizes = [2, 128], strides = [1, 1]} : vector<16x128xf32> to vector<2x128xf32>
    %cst_34 = arith.constant dense<0.000000e+00> : vector<2x128xf32>
    %131 = tpu.matmul %99, %6, %cst_34 {dimension_numbers = #tpu.dot_dimension_numbers<[1], [0], [0], [1], [0, 0, 1, 1], [], []>} : vector<2x32xf32>, vector<32x128xf32>, vector<2x128xf32> -> vector<2x128xf32>
    %132 = arith.addf %130, %131 : vector<2x128xf32>
    %133 = vector.extract_strided_slice %132 {offsets = [0, 0], sizes = [2, 32], strides = [1, 1]} : vector<2x128xf32> to vector<2x32xf32>
    %134 = arith.negf %133 : vector<2x32xf32>
    %135 = math.exp %134 : vector<2x32xf32>
    %cst_35 = arith.constant 1.000000e+00 : f32
    %136 = vector.broadcast %cst_35 : f32 to vector<2x32xf32>
    %137 = arith.addf %136, %135 : vector<2x32xf32>
    %138 = arith.divf %136, %137 : vector<2x32xf32>
    %139 = vector.extract_strided_slice %132 {offsets = [0, 32], sizes = [2, 32], strides = [1, 1]} : vector<2x128xf32> to vector<2x32xf32>
    %140 = arith.negf %139 : vector<2x32xf32>
    %141 = math.exp %140 : vector<2x32xf32>
    %cst_36 = arith.constant 1.000000e+00 : f32
    %142 = vector.broadcast %cst_36 : f32 to vector<2x32xf32>
    %143 = arith.addf %142, %141 : vector<2x32xf32>
    %144 = arith.divf %142, %143 : vector<2x32xf32>
    %145 = vector.extract_strided_slice %132 {offsets = [0, 64], sizes = [2, 32], strides = [1, 1]} : vector<2x128xf32> to vector<2x32xf32>
    %146 = math.tanh %145 : vector<2x32xf32>
    %147 = vector.extract_strided_slice %132 {offsets = [0, 96], sizes = [2, 32], strides = [1, 1]} : vector<2x128xf32> to vector<2x32xf32>
    %148 = arith.negf %147 : vector<2x32xf32>
    %149 = math.exp %148 : vector<2x32xf32>
    %cst_37 = arith.constant 1.000000e+00 : f32
    %150 = vector.broadcast %cst_37 : f32 to vector<2x32xf32>
    %151 = arith.addf %150, %149 : vector<2x32xf32>
    %152 = arith.divf %150, %151 : vector<2x32xf32>
    %153 = arith.mulf %144, %97 : vector<2x32xf32>
    %154 = arith.mulf %138, %146 : vector<2x32xf32>
    %155 = arith.addf %153, %154 : vector<2x32xf32>
    %156 = math.tanh %155 : vector<2x32xf32>
    %157 = arith.mulf %152, %156 : vector<2x32xf32>
    %158 = vector.extract_strided_slice %9 {offsets = [10, 0], sizes = [2, 128], strides = [1, 1]} : vector<16x128xf32> to vector<2x128xf32>
    %cst_38 = arith.constant dense<0.000000e+00> : vector<2x128xf32>
    %159 = tpu.matmul %127, %7, %cst_38 {dimension_numbers = #tpu.dot_dimension_numbers<[1], [0], [0], [1], [0, 0, 1, 1], [], []>} : vector<2x32xf32>, vector<32x128xf32>, vector<2x128xf32> -> vector<2x128xf32>
    %160 = arith.addf %158, %159 : vector<2x128xf32>
    %161 = vector.extract_strided_slice %160 {offsets = [0, 0], sizes = [2, 32], strides = [1, 1]} : vector<2x128xf32> to vector<2x32xf32>
    %162 = arith.negf %161 : vector<2x32xf32>
    %163 = math.exp %162 : vector<2x32xf32>
    %cst_39 = arith.constant 1.000000e+00 : f32
    %164 = vector.broadcast %cst_39 : f32 to vector<2x32xf32>
    %165 = arith.addf %164, %163 : vector<2x32xf32>
    %166 = arith.divf %164, %165 : vector<2x32xf32>
    %167 = vector.extract_strided_slice %160 {offsets = [0, 32], sizes = [2, 32], strides = [1, 1]} : vector<2x128xf32> to vector<2x32xf32>
    %168 = arith.negf %167 : vector<2x32xf32>
    %169 = math.exp %168 : vector<2x32xf32>
    %cst_40 = arith.constant 1.000000e+00 : f32
    %170 = vector.broadcast %cst_40 : f32 to vector<2x32xf32>
    %171 = arith.addf %170, %169 : vector<2x32xf32>
    %172 = arith.divf %170, %171 : vector<2x32xf32>
    %173 = vector.extract_strided_slice %160 {offsets = [0, 64], sizes = [2, 32], strides = [1, 1]} : vector<2x128xf32> to vector<2x32xf32>
    %174 = math.tanh %173 : vector<2x32xf32>
    %175 = vector.extract_strided_slice %160 {offsets = [0, 96], sizes = [2, 32], strides = [1, 1]} : vector<2x128xf32> to vector<2x32xf32>
    %176 = arith.negf %175 : vector<2x32xf32>
    %177 = math.exp %176 : vector<2x32xf32>
    %cst_41 = arith.constant 1.000000e+00 : f32
    %178 = vector.broadcast %cst_41 : f32 to vector<2x32xf32>
    %179 = arith.addf %178, %177 : vector<2x32xf32>
    %180 = arith.divf %178, %179 : vector<2x32xf32>
    %181 = arith.mulf %172, %125 : vector<2x32xf32>
    %182 = arith.mulf %166, %174 : vector<2x32xf32>
    %183 = arith.addf %181, %182 : vector<2x32xf32>
    %184 = math.tanh %183 : vector<2x32xf32>
    %185 = arith.mulf %180, %184 : vector<2x32xf32>
    %c4 = arith.constant 4 : index
    %c0_42 = arith.constant 0 : index
    %186 = vector.load %arg14[%c4, %c0_42] : memref<16x32xf32, #tpu.memory_space<vmem>>, vector<2x32xf32>
    tpu.vector_store %arg14[%c4, %c0_42], %157 {strides = array<i32>} : memref<16x32xf32, #tpu.memory_space<vmem>>, vector<2x32xf32>,
    %c10 = arith.constant 10 : index
    %c0_43 = arith.constant 0 : index
    %187 = vector.load %arg15[%c10, %c0_43] : memref<16x32xf32, #tpu.memory_space<vmem>>, vector<2x32xf32>
    tpu.vector_store %arg15[%c10, %c0_43], %185 {strides = array<i32>} : memref<16x32xf32, #tpu.memory_space<vmem>>, vector<2x32xf32>,
    %188 = vector.extract_strided_slice %8 {offsets = [6, 0], sizes = [2, 128], strides = [1, 1]} : vector<16x128xf32> to vector<2x128xf32>
    %cst_44 = arith.constant dense<0.000000e+00> : vector<2x128xf32>
    %189 = tpu.matmul %157, %6, %cst_44 {dimension_numbers = #tpu.dot_dimension_numbers<[1], [0], [0], [1], [0, 0, 1, 1], [], []>} : vector<2x32xf32>, vector<32x128xf32>, vector<2x128xf32> -> vector<2x128xf32>
    %190 = arith.addf %188, %189 : vector<2x128xf32>
    %191 = vector.extract_strided_slice %190 {offsets = [0, 0], sizes = [2, 32], strides = [1, 1]} : vector<2x128xf32> to vector<2x32xf32>
    %192 = arith.negf %191 : vector<2x32xf32>
    %193 = math.exp %192 : vector<2x32xf32>
    %cst_45 = arith.constant 1.000000e+00 : f32
    %194 = vector.broadcast %cst_45 : f32 to vector<2x32xf32>
    %195 = arith.addf %194, %193 : vector<2x32xf32>
    %196 = arith.divf %194, %195 : vector<2x32xf32>
    %197 = vector.extract_strided_slice %190 {offsets = [0, 32], sizes = [2, 32], strides = [1, 1]} : vector<2x128xf32> to vector<2x32xf32>
    %198 = arith.negf %197 : vector<2x32xf32>
    %199 = math.exp %198 : vector<2x32xf32>
    %cst_46 = arith.constant 1.000000e+00 : f32
    %200 = vector.broadcast %cst_46 : f32 to vector<2x32xf32>
    %201 = arith.addf %200, %199 : vector<2x32xf32>
    %202 = arith.divf %200, %201 : vector<2x32xf32>
    %203 = vector.extract_strided_slice %190 {offsets = [0, 64], sizes = [2, 32], strides = [1, 1]} : vector<2x128xf32> to vector<2x32xf32>
    %204 = math.tanh %203 : vector<2x32xf32>
    %205 = vector.extract_strided_slice %190 {offsets = [0, 96], sizes = [2, 32], strides = [1, 1]} : vector<2x128xf32> to vector<2x32xf32>
    %206 = arith.negf %205 : vector<2x32xf32>
    %207 = math.exp %206 : vector<2x32xf32>
    %cst_47 = arith.constant 1.000000e+00 : f32
    %208 = vector.broadcast %cst_47 : f32 to vector<2x32xf32>
    %209 = arith.addf %208, %207 : vector<2x32xf32>
    %210 = arith.divf %208, %209 : vector<2x32xf32>
    %211 = arith.mulf %202, %155 : vector<2x32xf32>
    %212 = arith.mulf %196, %204 : vector<2x32xf32>
    %213 = arith.addf %211, %212 : vector<2x32xf32>
    %214 = math.tanh %213 : vector<2x32xf32>
    %215 = arith.mulf %210, %214 : vector<2x32xf32>
    %216 = vector.extract_strided_slice %9 {offsets = [8, 0], sizes = [2, 128], strides = [1, 1]} : vector<16x128xf32> to vector<2x128xf32>
    %cst_48 = arith.constant dense<0.000000e+00> : vector<2x128xf32>
    %217 = tpu.matmul %185, %7, %cst_48 {dimension_numbers = #tpu.dot_dimension_numbers<[1], [0], [0], [1], [0, 0, 1, 1], [], []>} : vector<2x32xf32>, vector<32x128xf32>, vector<2x128xf32> -> vector<2x128xf32>
    %218 = arith.addf %216, %217 : vector<2x128xf32>
    %219 = vector.extract_strided_slice %218 {offsets = [0, 0], sizes = [2, 32], strides = [1, 1]} : vector<2x128xf32> to vector<2x32xf32>
    %220 = arith.negf %219 : vector<2x32xf32>
    %221 = math.exp %220 : vector<2x32xf32>
    %cst_49 = arith.constant 1.000000e+00 : f32
    %222 = vector.broadcast %cst_49 : f32 to vector<2x32xf32>
    %223 = arith.addf %222, %221 : vector<2x32xf32>
    %224 = arith.divf %222, %223 : vector<2x32xf32>
    %225 = vector.extract_strided_slice %218 {offsets = [0, 32], sizes = [2, 32], strides = [1, 1]} : vector<2x128xf32> to vector<2x32xf32>
    %226 = arith.negf %225 : vector<2x32xf32>
    %227 = math.exp %226 : vector<2x32xf32>
    %cst_50 = arith.constant 1.000000e+00 : f32
    %228 = vector.broadcast %cst_50 : f32 to vector<2x32xf32>
    %229 = arith.addf %228, %227 : vector<2x32xf32>
    %230 = arith.divf %228, %229 : vector<2x32xf32>
    %231 = vector.extract_strided_slice %218 {offsets = [0, 64], sizes = [2, 32], strides = [1, 1]} : vector<2x128xf32> to vector<2x32xf32>
    %232 = math.tanh %231 : vector<2x32xf32>
    %233 = vector.extract_strided_slice %218 {offsets = [0, 96], sizes = [2, 32], strides = [1, 1]} : vector<2x128xf32> to vector<2x32xf32>
    %234 = arith.negf %233 : vector<2x32xf32>
    %235 = math.exp %234 : vector<2x32xf32>
    %cst_51 = arith.constant 1.000000e+00 : f32
    %236 = vector.broadcast %cst_51 : f32 to vector<2x32xf32>
    %237 = arith.addf %236, %235 : vector<2x32xf32>
    %238 = arith.divf %236, %237 : vector<2x32xf32>
    %239 = arith.mulf %230, %183 : vector<2x32xf32>
    %240 = arith.mulf %224, %232 : vector<2x32xf32>
    %241 = arith.addf %239, %240 : vector<2x32xf32>
    %242 = math.tanh %241 : vector<2x32xf32>
    %243 = arith.mulf %238, %242 : vector<2x32xf32>
    %c6 = arith.constant 6 : index
    %c0_52 = arith.constant 0 : index
    %244 = vector.load %arg14[%c6, %c0_52] : memref<16x32xf32, #tpu.memory_space<vmem>>, vector<2x32xf32>
    tpu.vector_store %arg14[%c6, %c0_52], %215 {strides = array<i32>} : memref<16x32xf32, #tpu.memory_space<vmem>>, vector<2x32xf32>,
    %c8 = arith.constant 8 : index
    %c0_53 = arith.constant 0 : index
    %245 = vector.load %arg15[%c8, %c0_53] : memref<16x32xf32, #tpu.memory_space<vmem>>, vector<2x32xf32>
    tpu.vector_store %arg15[%c8, %c0_53], %243 {strides = array<i32>} : memref<16x32xf32, #tpu.memory_space<vmem>>, vector<2x32xf32>,
    %246 = vector.extract_strided_slice %8 {offsets = [8, 0], sizes = [2, 128], strides = [1, 1]} : vector<16x128xf32> to vector<2x128xf32>
    %cst_54 = arith.constant dense<0.000000e+00> : vector<2x128xf32>
    %247 = tpu.matmul %215, %6, %cst_54 {dimension_numbers = #tpu.dot_dimension_numbers<[1], [0], [0], [1], [0, 0, 1, 1], [], []>} : vector<2x32xf32>, vector<32x128xf32>, vector<2x128xf32> -> vector<2x128xf32>
    %248 = arith.addf %246, %247 : vector<2x128xf32>
    %249 = vector.extract_strided_slice %248 {offsets = [0, 0], sizes = [2, 32], strides = [1, 1]} : vector<2x128xf32> to vector<2x32xf32>
    %250 = arith.negf %249 : vector<2x32xf32>
    %251 = math.exp %250 : vector<2x32xf32>
    %cst_55 = arith.constant 1.000000e+00 : f32
    %252 = vector.broadcast %cst_55 : f32 to vector<2x32xf32>
    %253 = arith.addf %252, %251 : vector<2x32xf32>
    %254 = arith.divf %252, %253 : vector<2x32xf32>
    %255 = vector.extract_strided_slice %248 {offsets = [0, 32], sizes = [2, 32], strides = [1, 1]} : vector<2x128xf32> to vector<2x32xf32>
    %256 = arith.negf %255 : vector<2x32xf32>
    %257 = math.exp %256 : vector<2x32xf32>
    %cst_56 = arith.constant 1.000000e+00 : f32
    %258 = vector.broadcast %cst_56 : f32 to vector<2x32xf32>
    %259 = arith.addf %258, %257 : vector<2x32xf32>
    %260 = arith.divf %258, %259 : vector<2x32xf32>
    %261 = vector.extract_strided_slice %248 {offsets = [0, 64], sizes = [2, 32], strides = [1, 1]} : vector<2x128xf32> to vector<2x32xf32>
    %262 = math.tanh %261 : vector<2x32xf32>
    %263 = vector.extract_strided_slice %248 {offsets = [0, 96], sizes = [2, 32], strides = [1, 1]} : vector<2x128xf32> to vector<2x32xf32>
    %264 = arith.negf %263 : vector<2x32xf32>
    %265 = math.exp %264 : vector<2x32xf32>
    %cst_57 = arith.constant 1.000000e+00 : f32
    %266 = vector.broadcast %cst_57 : f32 to vector<2x32xf32>
    %267 = arith.addf %266, %265 : vector<2x32xf32>
    %268 = arith.divf %266, %267 : vector<2x32xf32>
    %269 = arith.mulf %260, %213 : vector<2x32xf32>
    %270 = arith.mulf %254, %262 : vector<2x32xf32>
    %271 = arith.addf %269, %270 : vector<2x32xf32>
    %272 = math.tanh %271 : vector<2x32xf32>
    %273 = arith.mulf %268, %272 : vector<2x32xf32>
    %274 = vector.extract_strided_slice %9 {offsets = [6, 0], sizes = [2, 128], strides = [1, 1]} : vector<16x128xf32> to vector<2x128xf32>
    %cst_58 = arith.constant dense<0.000000e+00> : vector<2x128xf32>
    %275 = tpu.matmul %243, %7, %cst_58 {dimension_numbers = #tpu.dot_dimension_numbers<[1], [0], [0], [1], [0, 0, 1, 1], [], []>} : vector<2x32xf32>, vector<32x128xf32>, vector<2x128xf32> -> vector<2x128xf32>
    %276 = arith.addf %274, %275 : vector<2x128xf32>
    %277 = vector.extract_strided_slice %276 {offsets = [0, 0], sizes = [2, 32], strides = [1, 1]} : vector<2x128xf32> to vector<2x32xf32>
    %278 = arith.negf %277 : vector<2x32xf32>
    %279 = math.exp %278 : vector<2x32xf32>
    %cst_59 = arith.constant 1.000000e+00 : f32
    %280 = vector.broadcast %cst_59 : f32 to vector<2x32xf32>
    %281 = arith.addf %280, %279 : vector<2x32xf32>
    %282 = arith.divf %280, %281 : vector<2x32xf32>
    %283 = vector.extract_strided_slice %276 {offsets = [0, 32], sizes = [2, 32], strides = [1, 1]} : vector<2x128xf32> to vector<2x32xf32>
    %284 = arith.negf %283 : vector<2x32xf32>
    %285 = math.exp %284 : vector<2x32xf32>
    %cst_60 = arith.constant 1.000000e+00 : f32
    %286 = vector.broadcast %cst_60 : f32 to vector<2x32xf32>
    %287 = arith.addf %286, %285 : vector<2x32xf32>
    %288 = arith.divf %286, %287 : vector<2x32xf32>
    %289 = vector.extract_strided_slice %276 {offsets = [0, 64], sizes = [2, 32], strides = [1, 1]} : vector<2x128xf32> to vector<2x32xf32>
    %290 = math.tanh %289 : vector<2x32xf32>
    %291 = vector.extract_strided_slice %276 {offsets = [0, 96], sizes = [2, 32], strides = [1, 1]} : vector<2x128xf32> to vector<2x32xf32>
    %292 = arith.negf %291 : vector<2x32xf32>
    %293 = math.exp %292 : vector<2x32xf32>
    %cst_61 = arith.constant 1.000000e+00 : f32
    %294 = vector.broadcast %cst_61 : f32 to vector<2x32xf32>
    %295 = arith.addf %294, %293 : vector<2x32xf32>
    %296 = arith.divf %294, %295 : vector<2x32xf32>
    %297 = arith.mulf %288, %241 : vector<2x32xf32>
    %298 = arith.mulf %282, %290 : vector<2x32xf32>
    %299 = arith.addf %297, %298 : vector<2x32xf32>
    %300 = math.tanh %299 : vector<2x32xf32>
    %301 = arith.mulf %296, %300 : vector<2x32xf32>
    %c8_62 = arith.constant 8 : index
    %c0_63 = arith.constant 0 : index
    %302 = vector.load %arg14[%c8_62, %c0_63] : memref<16x32xf32, #tpu.memory_space<vmem>>, vector<2x32xf32>
    tpu.vector_store %arg14[%c8_62, %c0_63], %273 {strides = array<i32>} : memref<16x32xf32, #tpu.memory_space<vmem>>, vector<2x32xf32>,
    %c6_64 = arith.constant 6 : index
    %c0_65 = arith.constant 0 : index
    %303 = vector.load %arg15[%c6_64, %c0_65] : memref<16x32xf32, #tpu.memory_space<vmem>>, vector<2x32xf32>
    tpu.vector_store %arg15[%c6_64, %c0_65], %301 {strides = array<i32>} : memref<16x32xf32, #tpu.memory_space<vmem>>, vector<2x32xf32>,
    %304 = vector.extract_strided_slice %8 {offsets = [10, 0], sizes = [2, 128], strides = [1, 1]} : vector<16x128xf32> to vector<2x128xf32>
    %cst_66 = arith.constant dense<0.000000e+00> : vector<2x128xf32>
    %305 = tpu.matmul %273, %6, %cst_66 {dimension_numbers = #tpu.dot_dimension_numbers<[1], [0], [0], [1], [0, 0, 1, 1], [], []>} : vector<2x32xf32>, vector<32x128xf32>, vector<2x128xf32> -> vector<2x128xf32>
    %306 = arith.addf %304, %305 : vector<2x128xf32>
    %307 = vector.extract_strided_slice %306 {offsets = [0, 0], sizes = [2, 32], strides = [1, 1]} : vector<2x128xf32> to vector<2x32xf32>
    %308 = arith.negf %307 : vector<2x32xf32>
    %309 = math.exp %308 : vector<2x32xf32>
    %cst_67 = arith.constant 1.000000e+00 : f32
    %310 = vector.broadcast %cst_67 : f32 to vector<2x32xf32>
    %311 = arith.addf %310, %309 : vector<2x32xf32>
    %312 = arith.divf %310, %311 : vector<2x32xf32>
    %313 = vector.extract_strided_slice %306 {offsets = [0, 32], sizes = [2, 32], strides = [1, 1]} : vector<2x128xf32> to vector<2x32xf32>
    %314 = arith.negf %313 : vector<2x32xf32>
    %315 = math.exp %314 : vector<2x32xf32>
    %cst_68 = arith.constant 1.000000e+00 : f32
    %316 = vector.broadcast %cst_68 : f32 to vector<2x32xf32>
    %317 = arith.addf %316, %315 : vector<2x32xf32>
    %318 = arith.divf %316, %317 : vector<2x32xf32>
    %319 = vector.extract_strided_slice %306 {offsets = [0, 64], sizes = [2, 32], strides = [1, 1]} : vector<2x128xf32> to vector<2x32xf32>
    %320 = math.tanh %319 : vector<2x32xf32>
    %321 = vector.extract_strided_slice %306 {offsets = [0, 96], sizes = [2, 32], strides = [1, 1]} : vector<2x128xf32> to vector<2x32xf32>
    %322 = arith.negf %321 : vector<2x32xf32>
    %323 = math.exp %322 : vector<2x32xf32>
    %cst_69 = arith.constant 1.000000e+00 : f32
    %324 = vector.broadcast %cst_69 : f32 to vector<2x32xf32>
    %325 = arith.addf %324, %323 : vector<2x32xf32>
    %326 = arith.divf %324, %325 : vector<2x32xf32>
    %327 = arith.mulf %318, %271 : vector<2x32xf32>
    %328 = arith.mulf %312, %320 : vector<2x32xf32>
    %329 = arith.addf %327, %328 : vector<2x32xf32>
    %330 = math.tanh %329 : vector<2x32xf32>
    %331 = arith.mulf %326, %330 : vector<2x32xf32>
    %332 = vector.extract_strided_slice %9 {offsets = [4, 0], sizes = [2, 128], strides = [1, 1]} : vector<16x128xf32> to vector<2x128xf32>
    %cst_70 = arith.constant dense<0.000000e+00> : vector<2x128xf32>
    %333 = tpu.matmul %301, %7, %cst_70 {dimension_numbers = #tpu.dot_dimension_numbers<[1], [0], [0], [1], [0, 0, 1, 1], [], []>} : vector<2x32xf32>, vector<32x128xf32>, vector<2x128xf32> -> vector<2x128xf32>
    %334 = arith.addf %332, %333 : vector<2x128xf32>
    %335 = vector.extract_strided_slice %334 {offsets = [0, 0], sizes = [2, 32], strides = [1, 1]} : vector<2x128xf32> to vector<2x32xf32>
    %336 = arith.negf %335 : vector<2x32xf32>
    %337 = math.exp %336 : vector<2x32xf32>
    %cst_71 = arith.constant 1.000000e+00 : f32
    %338 = vector.broadcast %cst_71 : f32 to vector<2x32xf32>
    %339 = arith.addf %338, %337 : vector<2x32xf32>
    %340 = arith.divf %338, %339 : vector<2x32xf32>
    %341 = vector.extract_strided_slice %334 {offsets = [0, 32], sizes = [2, 32], strides = [1, 1]} : vector<2x128xf32> to vector<2x32xf32>
    %342 = arith.negf %341 : vector<2x32xf32>
    %343 = math.exp %342 : vector<2x32xf32>
    %cst_72 = arith.constant 1.000000e+00 : f32
    %344 = vector.broadcast %cst_72 : f32 to vector<2x32xf32>
    %345 = arith.addf %344, %343 : vector<2x32xf32>
    %346 = arith.divf %344, %345 : vector<2x32xf32>
    %347 = vector.extract_strided_slice %334 {offsets = [0, 64], sizes = [2, 32], strides = [1, 1]} : vector<2x128xf32> to vector<2x32xf32>
    %348 = math.tanh %347 : vector<2x32xf32>
    %349 = vector.extract_strided_slice %334 {offsets = [0, 96], sizes = [2, 32], strides = [1, 1]} : vector<2x128xf32> to vector<2x32xf32>
    %350 = arith.negf %349 : vector<2x32xf32>
    %351 = math.exp %350 : vector<2x32xf32>
    %cst_73 = arith.constant 1.000000e+00 : f32
    %352 = vector.broadcast %cst_73 : f32 to vector<2x32xf32>
    %353 = arith.addf %352, %351 : vector<2x32xf32>
    %354 = arith.divf %352, %353 : vector<2x32xf32>
    %355 = arith.mulf %346, %299 : vector<2x32xf32>
    %356 = arith.mulf %340, %348 : vector<2x32xf32>
    %357 = arith.addf %355, %356 : vector<2x32xf32>
    %358 = math.tanh %357 : vector<2x32xf32>
    %359 = arith.mulf %354, %358 : vector<2x32xf32>
    %c10_74 = arith.constant 10 : index
    %c0_75 = arith.constant 0 : index
    %360 = vector.load %arg14[%c10_74, %c0_75] : memref<16x32xf32, #tpu.memory_space<vmem>>, vector<2x32xf32>
    tpu.vector_store %arg14[%c10_74, %c0_75], %331 {strides = array<i32>} : memref<16x32xf32, #tpu.memory_space<vmem>>, vector<2x32xf32>,
    %c4_76 = arith.constant 4 : index
    %c0_77 = arith.constant 0 : index
    %361 = vector.load %arg15[%c4_76, %c0_77] : memref<16x32xf32, #tpu.memory_space<vmem>>, vector<2x32xf32>
    tpu.vector_store %arg15[%c4_76, %c0_77], %359 {strides = array<i32>} : memref<16x32xf32, #tpu.memory_space<vmem>>, vector<2x32xf32>,
    %362 = vector.extract_strided_slice %8 {offsets = [12, 0], sizes = [2, 128], strides = [1, 1]} : vector<16x128xf32> to vector<2x128xf32>
    %cst_78 = arith.constant dense<0.000000e+00> : vector<2x128xf32>
    %363 = tpu.matmul %331, %6, %cst_78 {dimension_numbers = #tpu.dot_dimension_numbers<[1], [0], [0], [1], [0, 0, 1, 1], [], []>} : vector<2x32xf32>, vector<32x128xf32>, vector<2x128xf32> -> vector<2x128xf32>
    %364 = arith.addf %362, %363 : vector<2x128xf32>
    %365 = vector.extract_strided_slice %364 {offsets = [0, 0], sizes = [2, 32], strides = [1, 1]} : vector<2x128xf32> to vector<2x32xf32>
    %366 = arith.negf %365 : vector<2x32xf32>
    %367 = math.exp %366 : vector<2x32xf32>
    %cst_79 = arith.constant 1.000000e+00 : f32
    %368 = vector.broadcast %cst_79 : f32 to vector<2x32xf32>
    %369 = arith.addf %368, %367 : vector<2x32xf32>
    %370 = arith.divf %368, %369 : vector<2x32xf32>
    %371 = vector.extract_strided_slice %364 {offsets = [0, 32], sizes = [2, 32], strides = [1, 1]} : vector<2x128xf32> to vector<2x32xf32>
    %372 = arith.negf %371 : vector<2x32xf32>
    %373 = math.exp %372 : vector<2x32xf32>
    %cst_80 = arith.constant 1.000000e+00 : f32
    %374 = vector.broadcast %cst_80 : f32 to vector<2x32xf32>
    %375 = arith.addf %374, %373 : vector<2x32xf32>
    %376 = arith.divf %374, %375 : vector<2x32xf32>
    %377 = vector.extract_strided_slice %364 {offsets = [0, 64], sizes = [2, 32], strides = [1, 1]} : vector<2x128xf32> to vector<2x32xf32>
    %378 = math.tanh %377 : vector<2x32xf32>
    %379 = vector.extract_strided_slice %364 {offsets = [0, 96], sizes = [2, 32], strides = [1, 1]} : vector<2x128xf32> to vector<2x32xf32>
    %380 = arith.negf %379 : vector<2x32xf32>
    %381 = math.exp %380 : vector<2x32xf32>
    %cst_81 = arith.constant 1.000000e+00 : f32
    %382 = vector.broadcast %cst_81 : f32 to vector<2x32xf32>
    %383 = arith.addf %382, %381 : vector<2x32xf32>
    %384 = arith.divf %382, %383 : vector<2x32xf32>
    %385 = arith.mulf %376, %329 : vector<2x32xf32>
    %386 = arith.mulf %370, %378 : vector<2x32xf32>
    %387 = arith.addf %385, %386 : vector<2x32xf32>
    %388 = math.tanh %387 : vector<2x32xf32>
    %389 = arith.mulf %384, %388 : vector<2x32xf32>
    %390 = vector.extract_strided_slice %9 {offsets = [2, 0], sizes = [2, 128], strides = [1, 1]} : vector<16x128xf32> to vector<2x128xf32>
    %cst_82 = arith.constant dense<0.000000e+00> : vector<2x128xf32>
    %391 = tpu.matmul %359, %7, %cst_82 {dimension_numbers = #tpu.dot_dimension_numbers<[1], [0], [0], [1], [0, 0, 1, 1], [], []>} : vector<2x32xf32>, vector<32x128xf32>, vector<2x128xf32> -> vector<2x128xf32>
    %392 = arith.addf %390, %391 : vector<2x128xf32>
    %393 = vector.extract_strided_slice %392 {offsets = [0, 0], sizes = [2, 32], strides = [1, 1]} : vector<2x128xf32> to vector<2x32xf32>
    %394 = arith.negf %393 : vector<2x32xf32>
    %395 = math.exp %394 : vector<2x32xf32>
    %cst_83 = arith.constant 1.000000e+00 : f32
    %396 = vector.broadcast %cst_83 : f32 to vector<2x32xf32>
    %397 = arith.addf %396, %395 : vector<2x32xf32>
    %398 = arith.divf %396, %397 : vector<2x32xf32>
    %399 = vector.extract_strided_slice %392 {offsets = [0, 32], sizes = [2, 32], strides = [1, 1]} : vector<2x128xf32> to vector<2x32xf32>
    %400 = arith.negf %399 : vector<2x32xf32>
    %401 = math.exp %400 : vector<2x32xf32>
    %cst_84 = arith.constant 1.000000e+00 : f32
    %402 = vector.broadcast %cst_84 : f32 to vector<2x32xf32>
    %403 = arith.addf %402, %401 : vector<2x32xf32>
    %404 = arith.divf %402, %403 : vector<2x32xf32>
    %405 = vector.extract_strided_slice %392 {offsets = [0, 64], sizes = [2, 32], strides = [1, 1]} : vector<2x128xf32> to vector<2x32xf32>
    %406 = math.tanh %405 : vector<2x32xf32>
    %407 = vector.extract_strided_slice %392 {offsets = [0, 96], sizes = [2, 32], strides = [1, 1]} : vector<2x128xf32> to vector<2x32xf32>
    %408 = arith.negf %407 : vector<2x32xf32>
    %409 = math.exp %408 : vector<2x32xf32>
    %cst_85 = arith.constant 1.000000e+00 : f32
    %410 = vector.broadcast %cst_85 : f32 to vector<2x32xf32>
    %411 = arith.addf %410, %409 : vector<2x32xf32>
    %412 = arith.divf %410, %411 : vector<2x32xf32>
    %413 = arith.mulf %404, %357 : vector<2x32xf32>
    %414 = arith.mulf %398, %406 : vector<2x32xf32>
    %415 = arith.addf %413, %414 : vector<2x32xf32>
    %416 = math.tanh %415 : vector<2x32xf32>
    %417 = arith.mulf %412, %416 : vector<2x32xf32>
    %c12_86 = arith.constant 12 : index
    %c0_87 = arith.constant 0 : index
    %418 = vector.load %arg14[%c12_86, %c0_87] : memref<16x32xf32, #tpu.memory_space<vmem>>, vector<2x32xf32>
    tpu.vector_store %arg14[%c12_86, %c0_87], %389 {strides = array<i32>} : memref<16x32xf32, #tpu.memory_space<vmem>>, vector<2x32xf32>,
    %c2_88 = arith.constant 2 : index
    %c0_89 = arith.constant 0 : index
    %419 = vector.load %arg15[%c2_88, %c0_89] : memref<16x32xf32, #tpu.memory_space<vmem>>, vector<2x32xf32>
    tpu.vector_store %arg15[%c2_88, %c0_89], %417 {strides = array<i32>} : memref<16x32xf32, #tpu.memory_space<vmem>>, vector<2x32xf32>,
    %420 = vector.extract_strided_slice %8 {offsets = [14, 0], sizes = [2, 128], strides = [1, 1]} : vector<16x128xf32> to vector<2x128xf32>
    %cst_90 = arith.constant dense<0.000000e+00> : vector<2x128xf32>
    %421 = tpu.matmul %389, %6, %cst_90 {dimension_numbers = #tpu.dot_dimension_numbers<[1], [0], [0], [1], [0, 0, 1, 1], [], []>} : vector<2x32xf32>, vector<32x128xf32>, vector<2x128xf32> -> vector<2x128xf32>
    %422 = arith.addf %420, %421 : vector<2x128xf32>
    %423 = vector.extract_strided_slice %422 {offsets = [0, 0], sizes = [2, 32], strides = [1, 1]} : vector<2x128xf32> to vector<2x32xf32>
    %424 = arith.negf %423 : vector<2x32xf32>
    %425 = math.exp %424 : vector<2x32xf32>
    %cst_91 = arith.constant 1.000000e+00 : f32
    %426 = vector.broadcast %cst_91 : f32 to vector<2x32xf32>
    %427 = arith.addf %426, %425 : vector<2x32xf32>
    %428 = arith.divf %426, %427 : vector<2x32xf32>
    %429 = vector.extract_strided_slice %422 {offsets = [0, 32], sizes = [2, 32], strides = [1, 1]} : vector<2x128xf32> to vector<2x32xf32>
    %430 = arith.negf %429 : vector<2x32xf32>
    %431 = math.exp %430 : vector<2x32xf32>
    %cst_92 = arith.constant 1.000000e+00 : f32
    %432 = vector.broadcast %cst_92 : f32 to vector<2x32xf32>
    %433 = arith.addf %432, %431 : vector<2x32xf32>
    %434 = arith.divf %432, %433 : vector<2x32xf32>
    %435 = vector.extract_strided_slice %422 {offsets = [0, 64], sizes = [2, 32], strides = [1, 1]} : vector<2x128xf32> to vector<2x32xf32>
    %436 = math.tanh %435 : vector<2x32xf32>
    %437 = vector.extract_strided_slice %422 {offsets = [0, 96], sizes = [2, 32], strides = [1, 1]} : vector<2x128xf32> to vector<2x32xf32>
    %438 = arith.negf %437 : vector<2x32xf32>
    %439 = math.exp %438 : vector<2x32xf32>
    %cst_93 = arith.constant 1.000000e+00 : f32
    %440 = vector.broadcast %cst_93 : f32 to vector<2x32xf32>
    %441 = arith.addf %440, %439 : vector<2x32xf32>
    %442 = arith.divf %440, %441 : vector<2x32xf32>
    %443 = arith.mulf %434, %387 : vector<2x32xf32>
    %444 = arith.mulf %428, %436 : vector<2x32xf32>
    %445 = arith.addf %443, %444 : vector<2x32xf32>
    %446 = math.tanh %445 : vector<2x32xf32>
    %447 = arith.mulf %442, %446 : vector<2x32xf32>
    %448 = vector.extract_strided_slice %9 {offsets = [0, 0], sizes = [2, 128], strides = [1, 1]} : vector<16x128xf32> to vector<2x128xf32>
    %cst_94 = arith.constant dense<0.000000e+00> : vector<2x128xf32>
    %449 = tpu.matmul %417, %7, %cst_94 {dimension_numbers = #tpu.dot_dimension_numbers<[1], [0], [0], [1], [0, 0, 1, 1], [], []>} : vector<2x32xf32>, vector<32x128xf32>, vector<2x128xf32> -> vector<2x128xf32>
    %450 = arith.addf %448, %449 : vector<2x128xf32>
    %451 = vector.extract_strided_slice %450 {offsets = [0, 0], sizes = [2, 32], strides = [1, 1]} : vector<2x128xf32> to vector<2x32xf32>
    %452 = arith.negf %451 : vector<2x32xf32>
    %453 = math.exp %452 : vector<2x32xf32>
    %cst_95 = arith.constant 1.000000e+00 : f32
    %454 = vector.broadcast %cst_95 : f32 to vector<2x32xf32>
    %455 = arith.addf %454, %453 : vector<2x32xf32>
    %456 = arith.divf %454, %455 : vector<2x32xf32>
    %457 = vector.extract_strided_slice %450 {offsets = [0, 32], sizes = [2, 32], strides = [1, 1]} : vector<2x128xf32> to vector<2x32xf32>
    %458 = arith.negf %457 : vector<2x32xf32>
    %459 = math.exp %458 : vector<2x32xf32>
    %cst_96 = arith.constant 1.000000e+00 : f32
    %460 = vector.broadcast %cst_96 : f32 to vector<2x32xf32>
    %461 = arith.addf %460, %459 : vector<2x32xf32>
    %462 = arith.divf %460, %461 : vector<2x32xf32>
    %463 = vector.extract_strided_slice %450 {offsets = [0, 64], sizes = [2, 32], strides = [1, 1]} : vector<2x128xf32> to vector<2x32xf32>
    %464 = math.tanh %463 : vector<2x32xf32>
    %465 = vector.extract_strided_slice %450 {offsets = [0, 96], sizes = [2, 32], strides = [1, 1]} : vector<2x128xf32> to vector<2x32xf32>
    %466 = arith.negf %465 : vector<2x32xf32>
    %467 = math.exp %466 : vector<2x32xf32>
    %cst_97 = arith.constant 1.000000e+00 : f32
    %468 = vector.broadcast %cst_97 : f32 to vector<2x32xf32>
    %469 = arith.addf %468, %467 : vector<2x32xf32>
    %470 = arith.divf %468, %469 : vector<2x32xf32>
    %471 = arith.mulf %462, %415 : vector<2x32xf32>
    %472 = arith.mulf %456, %464 : vector<2x32xf32>
    %473 = arith.addf %471, %472 : vector<2x32xf32>
    %474 = math.tanh %473 : vector<2x32xf32>
    %475 = arith.mulf %470, %474 : vector<2x32xf32>
    %c14_98 = arith.constant 14 : index
    %c0_99 = arith.constant 0 : index
    %476 = vector.load %arg14[%c14_98, %c0_99] : memref<16x32xf32, #tpu.memory_space<vmem>>, vector<2x32xf32>
    tpu.vector_store %arg14[%c14_98, %c0_99], %447 {strides = array<i32>} : memref<16x32xf32, #tpu.memory_space<vmem>>, vector<2x32xf32>,
    %c0_100 = arith.constant 0 : index
    %c0_101 = arith.constant 0 : index
    %477 = vector.load %arg15[%c0_100, %c0_101] : memref<16x32xf32, #tpu.memory_space<vmem>>, vector<2x32xf32>
    tpu.vector_store %arg15[%c0_100, %c0_101], %475 {strides = array<i32>} : memref<16x32xf32, #tpu.memory_space<vmem>>, vector<2x32xf32>,
    %c0_102 = arith.constant 0 : index
    %c0_103 = arith.constant 0 : index
    %478 = vector.load %arg14[%c0_102, %c0_103] : memref<16x32xf32, #tpu.memory_space<vmem>>, vector<16x32xf32>
    %c0_104 = arith.constant 0 : index
    %c0_105 = arith.constant 0 : index
    %479 = vector.load %arg5[%c0_104, %c0_105] : memref<32x256xf32, #tpu.memory_space<vmem>>, vector<32x256xf32>
    %cst_106 = arith.constant dense<0.000000e+00> : vector<16x256xf32>
    %480 = tpu.matmul %478, %479, %cst_106 {dimension_numbers = #tpu.dot_dimension_numbers<[1], [0], [0], [1], [0, 0, 1, 1], [], []>} : vector<16x32xf32>, vector<32x256xf32>, vector<16x256xf32> -> vector<16x256xf32>
    %c0_107 = arith.constant 0 : index
    %c0_108 = arith.constant 0 : index
    %481 = vector.load %arg15[%c0_107, %c0_108] : memref<16x32xf32, #tpu.memory_space<vmem>>, vector<16x32xf32>
    %c0_109 = arith.constant 0 : index
    %c0_110 = arith.constant 0 : index
    %482 = vector.load %arg6[%c0_109, %c0_110] : memref<32x256xf32, #tpu.memory_space<vmem>>, vector<32x256xf32>
    %cst_111 = arith.constant dense<0.000000e+00> : vector<16x256xf32>
    %483 = tpu.matmul %481, %482, %cst_111 {dimension_numbers = #tpu.dot_dimension_numbers<[1], [0], [0], [1], [0, 0, 1, 1], [], []>} : vector<16x32xf32>, vector<32x256xf32>, vector<16x256xf32> -> vector<16x256xf32>
    %484 = arith.addf %480, %483 : vector<16x256xf32>
    %c0_112 = arith.constant 0 : index
    %c0_113 = arith.constant 0 : index
    %485 = vector.load %arg7[%c0_112, %c0_113] : memref<1x256xf32, #tpu.memory_space<vmem>>, vector<1x256xf32>
    %486 = vector.broadcast %485 : vector<1x256xf32> to vector<16x256xf32>
    %487 = arith.addf %484, %486 : vector<16x256xf32>
    %c0_114 = arith.constant 0 : index
    %c0_115 = arith.constant 0 : index
    %488 = vector.load %arg8[%c0_114, %c0_115] : memref<32x128xf32, #tpu.memory_space<vmem>>, vector<32x128xf32>
    %c0_116 = arith.constant 0 : index
    %c0_117 = arith.constant 0 : index
    %489 = vector.load %arg9[%c0_116, %c0_117] : memref<32x128xf32, #tpu.memory_space<vmem>>, vector<32x128xf32>
    %490 = vector.extract_strided_slice %487 {offsets = [0, 0], sizes = [16, 128], strides = [1, 1]} : vector<16x256xf32> to vector<16x128xf32>
    %491 = vector.extract_strided_slice %487 {offsets = [0, 128], sizes = [16, 128], strides = [1, 1]} : vector<16x256xf32> to vector<16x128xf32>
    %cst_118 = arith.constant 0.000000e+00 : f32
    %492 = vector.broadcast %cst_118 : f32 to vector<2x32xf32>
    %cst_119 = arith.constant 0.000000e+00 : f32
    %493 = vector.broadcast %cst_119 : f32 to vector<2x32xf32>
    %cst_120 = arith.constant 0.000000e+00 : f32
    %494 = vector.broadcast %cst_120 : f32 to vector<2x32xf32>
    %cst_121 = arith.constant 0.000000e+00 : f32
    %495 = vector.broadcast %cst_121 : f32 to vector<2x32xf32>
    %496 = vector.extract_strided_slice %490 {offsets = [0, 0], sizes = [2, 128], strides = [1, 1]} : vector<16x128xf32> to vector<2x128xf32>
    %cst_122 = arith.constant dense<0.000000e+00> : vector<2x128xf32>
    %497 = tpu.matmul %492, %488, %cst_122 {dimension_numbers = #tpu.dot_dimension_numbers<[1], [0], [0], [1], [0, 0, 1, 1], [], []>} : vector<2x32xf32>, vector<32x128xf32>, vector<2x128xf32> -> vector<2x128xf32>
    %498 = arith.addf %496, %497 : vector<2x128xf32>
    %499 = vector.extract_strided_slice %498 {offsets = [0, 0], sizes = [2, 32], strides = [1, 1]} : vector<2x128xf32> to vector<2x32xf32>
    %500 = arith.negf %499 : vector<2x32xf32>
    %501 = math.exp %500 : vector<2x32xf32>
    %cst_123 = arith.constant 1.000000e+00 : f32
    %502 = vector.broadcast %cst_123 : f32 to vector<2x32xf32>
    %503 = arith.addf %502, %501 : vector<2x32xf32>
    %504 = arith.divf %502, %503 : vector<2x32xf32>
    %505 = vector.extract_strided_slice %498 {offsets = [0, 32], sizes = [2, 32], strides = [1, 1]} : vector<2x128xf32> to vector<2x32xf32>
    %506 = arith.negf %505 : vector<2x32xf32>
    %507 = math.exp %506 : vector<2x32xf32>
    %cst_124 = arith.constant 1.000000e+00 : f32
    %508 = vector.broadcast %cst_124 : f32 to vector<2x32xf32>
    %509 = arith.addf %508, %507 : vector<2x32xf32>
    %510 = arith.divf %508, %509 : vector<2x32xf32>
    %511 = vector.extract_strided_slice %498 {offsets = [0, 64], sizes = [2, 32], strides = [1, 1]} : vector<2x128xf32> to vector<2x32xf32>
    %512 = math.tanh %511 : vector<2x32xf32>
    %513 = vector.extract_strided_slice %498 {offsets = [0, 96], sizes = [2, 32], strides = [1, 1]} : vector<2x128xf32> to vector<2x32xf32>
    %514 = arith.negf %513 : vector<2x32xf32>
    %515 = math.exp %514 : vector<2x32xf32>
    %cst_125 = arith.constant 1.000000e+00 : f32
    %516 = vector.broadcast %cst_125 : f32 to vector<2x32xf32>
    %517 = arith.addf %516, %515 : vector<2x32xf32>
    %518 = arith.divf %516, %517 : vector<2x32xf32>
    %519 = arith.mulf %510, %493 : vector<2x32xf32>
    %520 = arith.mulf %504, %512 : vector<2x32xf32>
    %521 = arith.addf %519, %520 : vector<2x32xf32>
    %522 = math.tanh %521 : vector<2x32xf32>
    %523 = arith.mulf %518, %522 : vector<2x32xf32>
    %524 = vector.extract_strided_slice %491 {offsets = [14, 0], sizes = [2, 128], strides = [1, 1]} : vector<16x128xf32> to vector<2x128xf32>
    %cst_126 = arith.constant dense<0.000000e+00> : vector<2x128xf32>
    %525 = tpu.matmul %494, %489, %cst_126 {dimension_numbers = #tpu.dot_dimension_numbers<[1], [0], [0], [1], [0, 0, 1, 1], [], []>} : vector<2x32xf32>, vector<32x128xf32>, vector<2x128xf32> -> vector<2x128xf32>
    %526 = arith.addf %524, %525 : vector<2x128xf32>
    %527 = vector.extract_strided_slice %526 {offsets = [0, 0], sizes = [2, 32], strides = [1, 1]} : vector<2x128xf32> to vector<2x32xf32>
    %528 = arith.negf %527 : vector<2x32xf32>
    %529 = math.exp %528 : vector<2x32xf32>
    %cst_127 = arith.constant 1.000000e+00 : f32
    %530 = vector.broadcast %cst_127 : f32 to vector<2x32xf32>
    %531 = arith.addf %530, %529 : vector<2x32xf32>
    %532 = arith.divf %530, %531 : vector<2x32xf32>
    %533 = vector.extract_strided_slice %526 {offsets = [0, 32], sizes = [2, 32], strides = [1, 1]} : vector<2x128xf32> to vector<2x32xf32>
    %534 = arith.negf %533 : vector<2x32xf32>
    %535 = math.exp %534 : vector<2x32xf32>
    %cst_128 = arith.constant 1.000000e+00 : f32
    %536 = vector.broadcast %cst_128 : f32 to vector<2x32xf32>
    %537 = arith.addf %536, %535 : vector<2x32xf32>
    %538 = arith.divf %536, %537 : vector<2x32xf32>
    %539 = vector.extract_strided_slice %526 {offsets = [0, 64], sizes = [2, 32], strides = [1, 1]} : vector<2x128xf32> to vector<2x32xf32>
    %540 = math.tanh %539 : vector<2x32xf32>
    %541 = vector.extract_strided_slice %526 {offsets = [0, 96], sizes = [2, 32], strides = [1, 1]} : vector<2x128xf32> to vector<2x32xf32>
    %542 = arith.negf %541 : vector<2x32xf32>
    %543 = math.exp %542 : vector<2x32xf32>
    %cst_129 = arith.constant 1.000000e+00 : f32
    %544 = vector.broadcast %cst_129 : f32 to vector<2x32xf32>
    %545 = arith.addf %544, %543 : vector<2x32xf32>
    %546 = arith.divf %544, %545 : vector<2x32xf32>
    %547 = arith.mulf %538, %495 : vector<2x32xf32>
    %548 = arith.mulf %532, %540 : vector<2x32xf32>
    %549 = arith.addf %547, %548 : vector<2x32xf32>
    %550 = math.tanh %549 : vector<2x32xf32>
    %551 = arith.mulf %546, %550 : vector<2x32xf32>
    %c0_130 = arith.constant 0 : index
    %c0_131 = arith.constant 0 : index
    %552 = vector.load %arg16[%c0_130, %c0_131] : memref<16x32xf32, #tpu.memory_space<vmem>>, vector<2x32xf32>
    tpu.vector_store %arg16[%c0_130, %c0_131], %523 {strides = array<i32>} : memref<16x32xf32, #tpu.memory_space<vmem>>, vector<2x32xf32>,
    %c14_132 = arith.constant 14 : index
    %c0_133 = arith.constant 0 : index
    %553 = vector.load %arg17[%c14_132, %c0_133] : memref<16x32xf32, #tpu.memory_space<vmem>>, vector<2x32xf32>
    tpu.vector_store %arg17[%c14_132, %c0_133], %551 {strides = array<i32>} : memref<16x32xf32, #tpu.memory_space<vmem>>, vector<2x32xf32>,
    %554 = vector.extract_strided_slice %490 {offsets = [2, 0], sizes = [2, 128], strides = [1, 1]} : vector<16x128xf32> to vector<2x128xf32>
    %cst_134 = arith.constant dense<0.000000e+00> : vector<2x128xf32>
    %555 = tpu.matmul %523, %488, %cst_134 {dimension_numbers = #tpu.dot_dimension_numbers<[1], [0], [0], [1], [0, 0, 1, 1], [], []>} : vector<2x32xf32>, vector<32x128xf32>, vector<2x128xf32> -> vector<2x128xf32>
    %556 = arith.addf %554, %555 : vector<2x128xf32>
    %557 = vector.extract_strided_slice %556 {offsets = [0, 0], sizes = [2, 32], strides = [1, 1]} : vector<2x128xf32> to vector<2x32xf32>
    %558 = arith.negf %557 : vector<2x32xf32>
    %559 = math.exp %558 : vector<2x32xf32>
    %cst_135 = arith.constant 1.000000e+00 : f32
    %560 = vector.broadcast %cst_135 : f32 to vector<2x32xf32>
    %561 = arith.addf %560, %559 : vector<2x32xf32>
    %562 = arith.divf %560, %561 : vector<2x32xf32>
    %563 = vector.extract_strided_slice %556 {offsets = [0, 32], sizes = [2, 32], strides = [1, 1]} : vector<2x128xf32> to vector<2x32xf32>
    %564 = arith.negf %563 : vector<2x32xf32>
    %565 = math.exp %564 : vector<2x32xf32>
    %cst_136 = arith.constant 1.000000e+00 : f32
    %566 = vector.broadcast %cst_136 : f32 to vector<2x32xf32>
    %567 = arith.addf %566, %565 : vector<2x32xf32>
    %568 = arith.divf %566, %567 : vector<2x32xf32>
    %569 = vector.extract_strided_slice %556 {offsets = [0, 64], sizes = [2, 32], strides = [1, 1]} : vector<2x128xf32> to vector<2x32xf32>
    %570 = math.tanh %569 : vector<2x32xf32>
    %571 = vector.extract_strided_slice %556 {offsets = [0, 96], sizes = [2, 32], strides = [1, 1]} : vector<2x128xf32> to vector<2x32xf32>
    %572 = arith.negf %571 : vector<2x32xf32>
    %573 = math.exp %572 : vector<2x32xf32>
    %cst_137 = arith.constant 1.000000e+00 : f32
    %574 = vector.broadcast %cst_137 : f32 to vector<2x32xf32>
    %575 = arith.addf %574, %573 : vector<2x32xf32>
    %576 = arith.divf %574, %575 : vector<2x32xf32>
    %577 = arith.mulf %568, %521 : vector<2x32xf32>
    %578 = arith.mulf %562, %570 : vector<2x32xf32>
    %579 = arith.addf %577, %578 : vector<2x32xf32>
    %580 = math.tanh %579 : vector<2x32xf32>
    %581 = arith.mulf %576, %580 : vector<2x32xf32>
    %582 = vector.extract_strided_slice %491 {offsets = [12, 0], sizes = [2, 128], strides = [1, 1]} : vector<16x128xf32> to vector<2x128xf32>
    %cst_138 = arith.constant dense<0.000000e+00> : vector<2x128xf32>
    %583 = tpu.matmul %551, %489, %cst_138 {dimension_numbers = #tpu.dot_dimension_numbers<[1], [0], [0], [1], [0, 0, 1, 1], [], []>} : vector<2x32xf32>, vector<32x128xf32>, vector<2x128xf32> -> vector<2x128xf32>
    %584 = arith.addf %582, %583 : vector<2x128xf32>
    %585 = vector.extract_strided_slice %584 {offsets = [0, 0], sizes = [2, 32], strides = [1, 1]} : vector<2x128xf32> to vector<2x32xf32>
    %586 = arith.negf %585 : vector<2x32xf32>
    %587 = math.exp %586 : vector<2x32xf32>
    %cst_139 = arith.constant 1.000000e+00 : f32
    %588 = vector.broadcast %cst_139 : f32 to vector<2x32xf32>
    %589 = arith.addf %588, %587 : vector<2x32xf32>
    %590 = arith.divf %588, %589 : vector<2x32xf32>
    %591 = vector.extract_strided_slice %584 {offsets = [0, 32], sizes = [2, 32], strides = [1, 1]} : vector<2x128xf32> to vector<2x32xf32>
    %592 = arith.negf %591 : vector<2x32xf32>
    %593 = math.exp %592 : vector<2x32xf32>
    %cst_140 = arith.constant 1.000000e+00 : f32
    %594 = vector.broadcast %cst_140 : f32 to vector<2x32xf32>
    %595 = arith.addf %594, %593 : vector<2x32xf32>
    %596 = arith.divf %594, %595 : vector<2x32xf32>
    %597 = vector.extract_strided_slice %584 {offsets = [0, 64], sizes = [2, 32], strides = [1, 1]} : vector<2x128xf32> to vector<2x32xf32>
    %598 = math.tanh %597 : vector<2x32xf32>
    %599 = vector.extract_strided_slice %584 {offsets = [0, 96], sizes = [2, 32], strides = [1, 1]} : vector<2x128xf32> to vector<2x32xf32>
    %600 = arith.negf %599 : vector<2x32xf32>
    %601 = math.exp %600 : vector<2x32xf32>
    %cst_141 = arith.constant 1.000000e+00 : f32
    %602 = vector.broadcast %cst_141 : f32 to vector<2x32xf32>
    %603 = arith.addf %602, %601 : vector<2x32xf32>
    %604 = arith.divf %602, %603 : vector<2x32xf32>
    %605 = arith.mulf %596, %549 : vector<2x32xf32>
    %606 = arith.mulf %590, %598 : vector<2x32xf32>
    %607 = arith.addf %605, %606 : vector<2x32xf32>
    %608 = math.tanh %607 : vector<2x32xf32>
    %609 = arith.mulf %604, %608 : vector<2x32xf32>
    %c2_142 = arith.constant 2 : index
    %c0_143 = arith.constant 0 : index
    %610 = vector.load %arg16[%c2_142, %c0_143] : memref<16x32xf32, #tpu.memory_space<vmem>>, vector<2x32xf32>
    tpu.vector_store %arg16[%c2_142, %c0_143], %581 {strides = array<i32>} : memref<16x32xf32, #tpu.memory_space<vmem>>, vector<2x32xf32>,
    %c12_144 = arith.constant 12 : index
    %c0_145 = arith.constant 0 : index
    %611 = vector.load %arg17[%c12_144, %c0_145] : memref<16x32xf32, #tpu.memory_space<vmem>>, vector<2x32xf32>
    tpu.vector_store %arg17[%c12_144, %c0_145], %609 {strides = array<i32>} : memref<16x32xf32, #tpu.memory_space<vmem>>, vector<2x32xf32>,
    %612 = vector.extract_strided_slice %490 {offsets = [4, 0], sizes = [2, 128], strides = [1, 1]} : vector<16x128xf32> to vector<2x128xf32>
    %cst_146 = arith.constant dense<0.000000e+00> : vector<2x128xf32>
    %613 = tpu.matmul %581, %488, %cst_146 {dimension_numbers = #tpu.dot_dimension_numbers<[1], [0], [0], [1], [0, 0, 1, 1], [], []>} : vector<2x32xf32>, vector<32x128xf32>, vector<2x128xf32> -> vector<2x128xf32>
    %614 = arith.addf %612, %613 : vector<2x128xf32>
    %615 = vector.extract_strided_slice %614 {offsets = [0, 0], sizes = [2, 32], strides = [1, 1]} : vector<2x128xf32> to vector<2x32xf32>
    %616 = arith.negf %615 : vector<2x32xf32>
    %617 = math.exp %616 : vector<2x32xf32>
    %cst_147 = arith.constant 1.000000e+00 : f32
    %618 = vector.broadcast %cst_147 : f32 to vector<2x32xf32>
    %619 = arith.addf %618, %617 : vector<2x32xf32>
    %620 = arith.divf %618, %619 : vector<2x32xf32>
    %621 = vector.extract_strided_slice %614 {offsets = [0, 32], sizes = [2, 32], strides = [1, 1]} : vector<2x128xf32> to vector<2x32xf32>
    %622 = arith.negf %621 : vector<2x32xf32>
    %623 = math.exp %622 : vector<2x32xf32>
    %cst_148 = arith.constant 1.000000e+00 : f32
    %624 = vector.broadcast %cst_148 : f32 to vector<2x32xf32>
    %625 = arith.addf %624, %623 : vector<2x32xf32>
    %626 = arith.divf %624, %625 : vector<2x32xf32>
    %627 = vector.extract_strided_slice %614 {offsets = [0, 64], sizes = [2, 32], strides = [1, 1]} : vector<2x128xf32> to vector<2x32xf32>
    %628 = math.tanh %627 : vector<2x32xf32>
    %629 = vector.extract_strided_slice %614 {offsets = [0, 96], sizes = [2, 32], strides = [1, 1]} : vector<2x128xf32> to vector<2x32xf32>
    %630 = arith.negf %629 : vector<2x32xf32>
    %631 = math.exp %630 : vector<2x32xf32>
    %cst_149 = arith.constant 1.000000e+00 : f32
    %632 = vector.broadcast %cst_149 : f32 to vector<2x32xf32>
    %633 = arith.addf %632, %631 : vector<2x32xf32>
    %634 = arith.divf %632, %633 : vector<2x32xf32>
    %635 = arith.mulf %626, %579 : vector<2x32xf32>
    %636 = arith.mulf %620, %628 : vector<2x32xf32>
    %637 = arith.addf %635, %636 : vector<2x32xf32>
    %638 = math.tanh %637 : vector<2x32xf32>
    %639 = arith.mulf %634, %638 : vector<2x32xf32>
    %640 = vector.extract_strided_slice %491 {offsets = [10, 0], sizes = [2, 128], strides = [1, 1]} : vector<16x128xf32> to vector<2x128xf32>
    %cst_150 = arith.constant dense<0.000000e+00> : vector<2x128xf32>
    %641 = tpu.matmul %609, %489, %cst_150 {dimension_numbers = #tpu.dot_dimension_numbers<[1], [0], [0], [1], [0, 0, 1, 1], [], []>} : vector<2x32xf32>, vector<32x128xf32>, vector<2x128xf32> -> vector<2x128xf32>
    %642 = arith.addf %640, %641 : vector<2x128xf32>
    %643 = vector.extract_strided_slice %642 {offsets = [0, 0], sizes = [2, 32], strides = [1, 1]} : vector<2x128xf32> to vector<2x32xf32>
    %644 = arith.negf %643 : vector<2x32xf32>
    %645 = math.exp %644 : vector<2x32xf32>
    %cst_151 = arith.constant 1.000000e+00 : f32
    %646 = vector.broadcast %cst_151 : f32 to vector<2x32xf32>
    %647 = arith.addf %646, %645 : vector<2x32xf32>
    %648 = arith.divf %646, %647 : vector<2x32xf32>
    %649 = vector.extract_strided_slice %642 {offsets = [0, 32], sizes = [2, 32], strides = [1, 1]} : vector<2x128xf32> to vector<2x32xf32>
    %650 = arith.negf %649 : vector<2x32xf32>
    %651 = math.exp %650 : vector<2x32xf32>
    %cst_152 = arith.constant 1.000000e+00 : f32
    %652 = vector.broadcast %cst_152 : f32 to vector<2x32xf32>
    %653 = arith.addf %652, %651 : vector<2x32xf32>
    %654 = arith.divf %652, %653 : vector<2x32xf32>
    %655 = vector.extract_strided_slice %642 {offsets = [0, 64], sizes = [2, 32], strides = [1, 1]} : vector<2x128xf32> to vector<2x32xf32>
    %656 = math.tanh %655 : vector<2x32xf32>
    %657 = vector.extract_strided_slice %642 {offsets = [0, 96], sizes = [2, 32], strides = [1, 1]} : vector<2x128xf32> to vector<2x32xf32>
    %658 = arith.negf %657 : vector<2x32xf32>
    %659 = math.exp %658 : vector<2x32xf32>
    %cst_153 = arith.constant 1.000000e+00 : f32
    %660 = vector.broadcast %cst_153 : f32 to vector<2x32xf32>
    %661 = arith.addf %660, %659 : vector<2x32xf32>
    %662 = arith.divf %660, %661 : vector<2x32xf32>
    %663 = arith.mulf %654, %607 : vector<2x32xf32>
    %664 = arith.mulf %648, %656 : vector<2x32xf32>
    %665 = arith.addf %663, %664 : vector<2x32xf32>
    %666 = math.tanh %665 : vector<2x32xf32>
    %667 = arith.mulf %662, %666 : vector<2x32xf32>
    %c4_154 = arith.constant 4 : index
    %c0_155 = arith.constant 0 : index
    %668 = vector.load %arg16[%c4_154, %c0_155] : memref<16x32xf32, #tpu.memory_space<vmem>>, vector<2x32xf32>
    tpu.vector_store %arg16[%c4_154, %c0_155], %639 {strides = array<i32>} : memref<16x32xf32, #tpu.memory_space<vmem>>, vector<2x32xf32>,
    %c10_156 = arith.constant 10 : index
    %c0_157 = arith.constant 0 : index
    %669 = vector.load %arg17[%c10_156, %c0_157] : memref<16x32xf32, #tpu.memory_space<vmem>>, vector<2x32xf32>
    tpu.vector_store %arg17[%c10_156, %c0_157], %667 {strides = array<i32>} : memref<16x32xf32, #tpu.memory_space<vmem>>, vector<2x32xf32>,
    %670 = vector.extract_strided_slice %490 {offsets = [6, 0], sizes = [2, 128], strides = [1, 1]} : vector<16x128xf32> to vector<2x128xf32>
    %cst_158 = arith.constant dense<0.000000e+00> : vector<2x128xf32>
    %671 = tpu.matmul %639, %488, %cst_158 {dimension_numbers = #tpu.dot_dimension_numbers<[1], [0], [0], [1], [0, 0, 1, 1], [], []>} : vector<2x32xf32>, vector<32x128xf32>, vector<2x128xf32> -> vector<2x128xf32>
    %672 = arith.addf %670, %671 : vector<2x128xf32>
    %673 = vector.extract_strided_slice %672 {offsets = [0, 0], sizes = [2, 32], strides = [1, 1]} : vector<2x128xf32> to vector<2x32xf32>
    %674 = arith.negf %673 : vector<2x32xf32>
    %675 = math.exp %674 : vector<2x32xf32>
    %cst_159 = arith.constant 1.000000e+00 : f32
    %676 = vector.broadcast %cst_159 : f32 to vector<2x32xf32>
    %677 = arith.addf %676, %675 : vector<2x32xf32>
    %678 = arith.divf %676, %677 : vector<2x32xf32>
    %679 = vector.extract_strided_slice %672 {offsets = [0, 32], sizes = [2, 32], strides = [1, 1]} : vector<2x128xf32> to vector<2x32xf32>
    %680 = arith.negf %679 : vector<2x32xf32>
    %681 = math.exp %680 : vector<2x32xf32>
    %cst_160 = arith.constant 1.000000e+00 : f32
    %682 = vector.broadcast %cst_160 : f32 to vector<2x32xf32>
    %683 = arith.addf %682, %681 : vector<2x32xf32>
    %684 = arith.divf %682, %683 : vector<2x32xf32>
    %685 = vector.extract_strided_slice %672 {offsets = [0, 64], sizes = [2, 32], strides = [1, 1]} : vector<2x128xf32> to vector<2x32xf32>
    %686 = math.tanh %685 : vector<2x32xf32>
    %687 = vector.extract_strided_slice %672 {offsets = [0, 96], sizes = [2, 32], strides = [1, 1]} : vector<2x128xf32> to vector<2x32xf32>
    %688 = arith.negf %687 : vector<2x32xf32>
    %689 = math.exp %688 : vector<2x32xf32>
    %cst_161 = arith.constant 1.000000e+00 : f32
    %690 = vector.broadcast %cst_161 : f32 to vector<2x32xf32>
    %691 = arith.addf %690, %689 : vector<2x32xf32>
    %692 = arith.divf %690, %691 : vector<2x32xf32>
    %693 = arith.mulf %684, %637 : vector<2x32xf32>
    %694 = arith.mulf %678, %686 : vector<2x32xf32>
    %695 = arith.addf %693, %694 : vector<2x32xf32>
    %696 = math.tanh %695 : vector<2x32xf32>
    %697 = arith.mulf %692, %696 : vector<2x32xf32>
    %698 = vector.extract_strided_slice %491 {offsets = [8, 0], sizes = [2, 128], strides = [1, 1]} : vector<16x128xf32> to vector<2x128xf32>
    %cst_162 = arith.constant dense<0.000000e+00> : vector<2x128xf32>
    %699 = tpu.matmul %667, %489, %cst_162 {dimension_numbers = #tpu.dot_dimension_numbers<[1], [0], [0], [1], [0, 0, 1, 1], [], []>} : vector<2x32xf32>, vector<32x128xf32>, vector<2x128xf32> -> vector<2x128xf32>
    %700 = arith.addf %698, %699 : vector<2x128xf32>
    %701 = vector.extract_strided_slice %700 {offsets = [0, 0], sizes = [2, 32], strides = [1, 1]} : vector<2x128xf32> to vector<2x32xf32>
    %702 = arith.negf %701 : vector<2x32xf32>
    %703 = math.exp %702 : vector<2x32xf32>
    %cst_163 = arith.constant 1.000000e+00 : f32
    %704 = vector.broadcast %cst_163 : f32 to vector<2x32xf32>
    %705 = arith.addf %704, %703 : vector<2x32xf32>
    %706 = arith.divf %704, %705 : vector<2x32xf32>
    %707 = vector.extract_strided_slice %700 {offsets = [0, 32], sizes = [2, 32], strides = [1, 1]} : vector<2x128xf32> to vector<2x32xf32>
    %708 = arith.negf %707 : vector<2x32xf32>
    %709 = math.exp %708 : vector<2x32xf32>
    %cst_164 = arith.constant 1.000000e+00 : f32
    %710 = vector.broadcast %cst_164 : f32 to vector<2x32xf32>
    %711 = arith.addf %710, %709 : vector<2x32xf32>
    %712 = arith.divf %710, %711 : vector<2x32xf32>
    %713 = vector.extract_strided_slice %700 {offsets = [0, 64], sizes = [2, 32], strides = [1, 1]} : vector<2x128xf32> to vector<2x32xf32>
    %714 = math.tanh %713 : vector<2x32xf32>
    %715 = vector.extract_strided_slice %700 {offsets = [0, 96], sizes = [2, 32], strides = [1, 1]} : vector<2x128xf32> to vector<2x32xf32>
    %716 = arith.negf %715 : vector<2x32xf32>
    %717 = math.exp %716 : vector<2x32xf32>
    %cst_165 = arith.constant 1.000000e+00 : f32
    %718 = vector.broadcast %cst_165 : f32 to vector<2x32xf32>
    %719 = arith.addf %718, %717 : vector<2x32xf32>
    %720 = arith.divf %718, %719 : vector<2x32xf32>
    %721 = arith.mulf %712, %665 : vector<2x32xf32>
    %722 = arith.mulf %706, %714 : vector<2x32xf32>
    %723 = arith.addf %721, %722 : vector<2x32xf32>
    %724 = math.tanh %723 : vector<2x32xf32>
    %725 = arith.mulf %720, %724 : vector<2x32xf32>
    %c6_166 = arith.constant 6 : index
    %c0_167 = arith.constant 0 : index
    %726 = vector.load %arg16[%c6_166, %c0_167] : memref<16x32xf32, #tpu.memory_space<vmem>>, vector<2x32xf32>
    tpu.vector_store %arg16[%c6_166, %c0_167], %697 {strides = array<i32>} : memref<16x32xf32, #tpu.memory_space<vmem>>, vector<2x32xf32>,
    %c8_168 = arith.constant 8 : index
    %c0_169 = arith.constant 0 : index
    %727 = vector.load %arg17[%c8_168, %c0_169] : memref<16x32xf32, #tpu.memory_space<vmem>>, vector<2x32xf32>
    tpu.vector_store %arg17[%c8_168, %c0_169], %725 {strides = array<i32>} : memref<16x32xf32, #tpu.memory_space<vmem>>, vector<2x32xf32>,
    %728 = vector.extract_strided_slice %490 {offsets = [8, 0], sizes = [2, 128], strides = [1, 1]} : vector<16x128xf32> to vector<2x128xf32>
    %cst_170 = arith.constant dense<0.000000e+00> : vector<2x128xf32>
    %729 = tpu.matmul %697, %488, %cst_170 {dimension_numbers = #tpu.dot_dimension_numbers<[1], [0], [0], [1], [0, 0, 1, 1], [], []>} : vector<2x32xf32>, vector<32x128xf32>, vector<2x128xf32> -> vector<2x128xf32>
    %730 = arith.addf %728, %729 : vector<2x128xf32>
    %731 = vector.extract_strided_slice %730 {offsets = [0, 0], sizes = [2, 32], strides = [1, 1]} : vector<2x128xf32> to vector<2x32xf32>
    %732 = arith.negf %731 : vector<2x32xf32>
    %733 = math.exp %732 : vector<2x32xf32>
    %cst_171 = arith.constant 1.000000e+00 : f32
    %734 = vector.broadcast %cst_171 : f32 to vector<2x32xf32>
    %735 = arith.addf %734, %733 : vector<2x32xf32>
    %736 = arith.divf %734, %735 : vector<2x32xf32>
    %737 = vector.extract_strided_slice %730 {offsets = [0, 32], sizes = [2, 32], strides = [1, 1]} : vector<2x128xf32> to vector<2x32xf32>
    %738 = arith.negf %737 : vector<2x32xf32>
    %739 = math.exp %738 : vector<2x32xf32>
    %cst_172 = arith.constant 1.000000e+00 : f32
    %740 = vector.broadcast %cst_172 : f32 to vector<2x32xf32>
    %741 = arith.addf %740, %739 : vector<2x32xf32>
    %742 = arith.divf %740, %741 : vector<2x32xf32>
    %743 = vector.extract_strided_slice %730 {offsets = [0, 64], sizes = [2, 32], strides = [1, 1]} : vector<2x128xf32> to vector<2x32xf32>
    %744 = math.tanh %743 : vector<2x32xf32>
    %745 = vector.extract_strided_slice %730 {offsets = [0, 96], sizes = [2, 32], strides = [1, 1]} : vector<2x128xf32> to vector<2x32xf32>
    %746 = arith.negf %745 : vector<2x32xf32>
    %747 = math.exp %746 : vector<2x32xf32>
    %cst_173 = arith.constant 1.000000e+00 : f32
    %748 = vector.broadcast %cst_173 : f32 to vector<2x32xf32>
    %749 = arith.addf %748, %747 : vector<2x32xf32>
    %750 = arith.divf %748, %749 : vector<2x32xf32>
    %751 = arith.mulf %742, %695 : vector<2x32xf32>
    %752 = arith.mulf %736, %744 : vector<2x32xf32>
    %753 = arith.addf %751, %752 : vector<2x32xf32>
    %754 = math.tanh %753 : vector<2x32xf32>
    %755 = arith.mulf %750, %754 : vector<2x32xf32>
    %756 = vector.extract_strided_slice %491 {offsets = [6, 0], sizes = [2, 128], strides = [1, 1]} : vector<16x128xf32> to vector<2x128xf32>
    %cst_174 = arith.constant dense<0.000000e+00> : vector<2x128xf32>
    %757 = tpu.matmul %725, %489, %cst_174 {dimension_numbers = #tpu.dot_dimension_numbers<[1], [0], [0], [1], [0, 0, 1, 1], [], []>} : vector<2x32xf32>, vector<32x128xf32>, vector<2x128xf32> -> vector<2x128xf32>
    %758 = arith.addf %756, %757 : vector<2x128xf32>
    %759 = vector.extract_strided_slice %758 {offsets = [0, 0], sizes = [2, 32], strides = [1, 1]} : vector<2x128xf32> to vector<2x32xf32>
    %760 = arith.negf %759 : vector<2x32xf32>
    %761 = math.exp %760 : vector<2x32xf32>
    %cst_175 = arith.constant 1.000000e+00 : f32
    %762 = vector.broadcast %cst_175 : f32 to vector<2x32xf32>
    %763 = arith.addf %762, %761 : vector<2x32xf32>
    %764 = arith.divf %762, %763 : vector<2x32xf32>
    %765 = vector.extract_strided_slice %758 {offsets = [0, 32], sizes = [2, 32], strides = [1, 1]} : vector<2x128xf32> to vector<2x32xf32>
    %766 = arith.negf %765 : vector<2x32xf32>
    %767 = math.exp %766 : vector<2x32xf32>
    %cst_176 = arith.constant 1.000000e+00 : f32
    %768 = vector.broadcast %cst_176 : f32 to vector<2x32xf32>
    %769 = arith.addf %768, %767 : vector<2x32xf32>
    %770 = arith.divf %768, %769 : vector<2x32xf32>
    %771 = vector.extract_strided_slice %758 {offsets = [0, 64], sizes = [2, 32], strides = [1, 1]} : vector<2x128xf32> to vector<2x32xf32>
    %772 = math.tanh %771 : vector<2x32xf32>
    %773 = vector.extract_strided_slice %758 {offsets = [0, 96], sizes = [2, 32], strides = [1, 1]} : vector<2x128xf32> to vector<2x32xf32>
    %774 = arith.negf %773 : vector<2x32xf32>
    %775 = math.exp %774 : vector<2x32xf32>
    %cst_177 = arith.constant 1.000000e+00 : f32
    %776 = vector.broadcast %cst_177 : f32 to vector<2x32xf32>
    %777 = arith.addf %776, %775 : vector<2x32xf32>
    %778 = arith.divf %776, %777 : vector<2x32xf32>
    %779 = arith.mulf %770, %723 : vector<2x32xf32>
    %780 = arith.mulf %764, %772 : vector<2x32xf32>
    %781 = arith.addf %779, %780 : vector<2x32xf32>
    %782 = math.tanh %781 : vector<2x32xf32>
    %783 = arith.mulf %778, %782 : vector<2x32xf32>
    %c8_178 = arith.constant 8 : index
    %c0_179 = arith.constant 0 : index
    %784 = vector.load %arg16[%c8_178, %c0_179] : memref<16x32xf32, #tpu.memory_space<vmem>>, vector<2x32xf32>
    tpu.vector_store %arg16[%c8_178, %c0_179], %755 {strides = array<i32>} : memref<16x32xf32, #tpu.memory_space<vmem>>, vector<2x32xf32>,
    %c6_180 = arith.constant 6 : index
    %c0_181 = arith.constant 0 : index
    %785 = vector.load %arg17[%c6_180, %c0_181] : memref<16x32xf32, #tpu.memory_space<vmem>>, vector<2x32xf32>
    tpu.vector_store %arg17[%c6_180, %c0_181], %783 {strides = array<i32>} : memref<16x32xf32, #tpu.memory_space<vmem>>, vector<2x32xf32>,
    %786 = vector.extract_strided_slice %490 {offsets = [10, 0], sizes = [2, 128], strides = [1, 1]} : vector<16x128xf32> to vector<2x128xf32>
    %cst_182 = arith.constant dense<0.000000e+00> : vector<2x128xf32>
    %787 = tpu.matmul %755, %488, %cst_182 {dimension_numbers = #tpu.dot_dimension_numbers<[1], [0], [0], [1], [0, 0, 1, 1], [], []>} : vector<2x32xf32>, vector<32x128xf32>, vector<2x128xf32> -> vector<2x128xf32>
    %788 = arith.addf %786, %787 : vector<2x128xf32>
    %789 = vector.extract_strided_slice %788 {offsets = [0, 0], sizes = [2, 32], strides = [1, 1]} : vector<2x128xf32> to vector<2x32xf32>
    %790 = arith.negf %789 : vector<2x32xf32>
    %791 = math.exp %790 : vector<2x32xf32>
    %cst_183 = arith.constant 1.000000e+00 : f32
    %792 = vector.broadcast %cst_183 : f32 to vector<2x32xf32>
    %793 = arith.addf %792, %791 : vector<2x32xf32>
    %794 = arith.divf %792, %793 : vector<2x32xf32>
    %795 = vector.extract_strided_slice %788 {offsets = [0, 32], sizes = [2, 32], strides = [1, 1]} : vector<2x128xf32> to vector<2x32xf32>
    %796 = arith.negf %795 : vector<2x32xf32>
    %797 = math.exp %796 : vector<2x32xf32>
    %cst_184 = arith.constant 1.000000e+00 : f32
    %798 = vector.broadcast %cst_184 : f32 to vector<2x32xf32>
    %799 = arith.addf %798, %797 : vector<2x32xf32>
    %800 = arith.divf %798, %799 : vector<2x32xf32>
    %801 = vector.extract_strided_slice %788 {offsets = [0, 64], sizes = [2, 32], strides = [1, 1]} : vector<2x128xf32> to vector<2x32xf32>
    %802 = math.tanh %801 : vector<2x32xf32>
    %803 = vector.extract_strided_slice %788 {offsets = [0, 96], sizes = [2, 32], strides = [1, 1]} : vector<2x128xf32> to vector<2x32xf32>
    %804 = arith.negf %803 : vector<2x32xf32>
    %805 = math.exp %804 : vector<2x32xf32>
    %cst_185 = arith.constant 1.000000e+00 : f32
    %806 = vector.broadcast %cst_185 : f32 to vector<2x32xf32>
    %807 = arith.addf %806, %805 : vector<2x32xf32>
    %808 = arith.divf %806, %807 : vector<2x32xf32>
    %809 = arith.mulf %800, %753 : vector<2x32xf32>
    %810 = arith.mulf %794, %802 : vector<2x32xf32>
    %811 = arith.addf %809, %810 : vector<2x32xf32>
    %812 = math.tanh %811 : vector<2x32xf32>
    %813 = arith.mulf %808, %812 : vector<2x32xf32>
    %814 = vector.extract_strided_slice %491 {offsets = [4, 0], sizes = [2, 128], strides = [1, 1]} : vector<16x128xf32> to vector<2x128xf32>
    %cst_186 = arith.constant dense<0.000000e+00> : vector<2x128xf32>
    %815 = tpu.matmul %783, %489, %cst_186 {dimension_numbers = #tpu.dot_dimension_numbers<[1], [0], [0], [1], [0, 0, 1, 1], [], []>} : vector<2x32xf32>, vector<32x128xf32>, vector<2x128xf32> -> vector<2x128xf32>
    %816 = arith.addf %814, %815 : vector<2x128xf32>
    %817 = vector.extract_strided_slice %816 {offsets = [0, 0], sizes = [2, 32], strides = [1, 1]} : vector<2x128xf32> to vector<2x32xf32>
    %818 = arith.negf %817 : vector<2x32xf32>
    %819 = math.exp %818 : vector<2x32xf32>
    %cst_187 = arith.constant 1.000000e+00 : f32
    %820 = vector.broadcast %cst_187 : f32 to vector<2x32xf32>
    %821 = arith.addf %820, %819 : vector<2x32xf32>
    %822 = arith.divf %820, %821 : vector<2x32xf32>
    %823 = vector.extract_strided_slice %816 {offsets = [0, 32], sizes = [2, 32], strides = [1, 1]} : vector<2x128xf32> to vector<2x32xf32>
    %824 = arith.negf %823 : vector<2x32xf32>
    %825 = math.exp %824 : vector<2x32xf32>
    %cst_188 = arith.constant 1.000000e+00 : f32
    %826 = vector.broadcast %cst_188 : f32 to vector<2x32xf32>
    %827 = arith.addf %826, %825 : vector<2x32xf32>
    %828 = arith.divf %826, %827 : vector<2x32xf32>
    %829 = vector.extract_strided_slice %816 {offsets = [0, 64], sizes = [2, 32], strides = [1, 1]} : vector<2x128xf32> to vector<2x32xf32>
    %830 = math.tanh %829 : vector<2x32xf32>
    %831 = vector.extract_strided_slice %816 {offsets = [0, 96], sizes = [2, 32], strides = [1, 1]} : vector<2x128xf32> to vector<2x32xf32>
    %832 = arith.negf %831 : vector<2x32xf32>
    %833 = math.exp %832 : vector<2x32xf32>
    %cst_189 = arith.constant 1.000000e+00 : f32
    %834 = vector.broadcast %cst_189 : f32 to vector<2x32xf32>
    %835 = arith.addf %834, %833 : vector<2x32xf32>
    %836 = arith.divf %834, %835 : vector<2x32xf32>
    %837 = arith.mulf %828, %781 : vector<2x32xf32>
    %838 = arith.mulf %822, %830 : vector<2x32xf32>
    %839 = arith.addf %837, %838 : vector<2x32xf32>
    %840 = math.tanh %839 : vector<2x32xf32>
    %841 = arith.mulf %836, %840 : vector<2x32xf32>
    %c10_190 = arith.constant 10 : index
    %c0_191 = arith.constant 0 : index
    %842 = vector.load %arg16[%c10_190, %c0_191] : memref<16x32xf32, #tpu.memory_space<vmem>>, vector<2x32xf32>
    tpu.vector_store %arg16[%c10_190, %c0_191], %813 {strides = array<i32>} : memref<16x32xf32, #tpu.memory_space<vmem>>, vector<2x32xf32>,
    %c4_192 = arith.constant 4 : index
    %c0_193 = arith.constant 0 : index
    %843 = vector.load %arg17[%c4_192, %c0_193] : memref<16x32xf32, #tpu.memory_space<vmem>>, vector<2x32xf32>
    tpu.vector_store %arg17[%c4_192, %c0_193], %841 {strides = array<i32>} : memref<16x32xf32, #tpu.memory_space<vmem>>, vector<2x32xf32>,
    %844 = vector.extract_strided_slice %490 {offsets = [12, 0], sizes = [2, 128], strides = [1, 1]} : vector<16x128xf32> to vector<2x128xf32>
    %cst_194 = arith.constant dense<0.000000e+00> : vector<2x128xf32>
    %845 = tpu.matmul %813, %488, %cst_194 {dimension_numbers = #tpu.dot_dimension_numbers<[1], [0], [0], [1], [0, 0, 1, 1], [], []>} : vector<2x32xf32>, vector<32x128xf32>, vector<2x128xf32> -> vector<2x128xf32>
    %846 = arith.addf %844, %845 : vector<2x128xf32>
    %847 = vector.extract_strided_slice %846 {offsets = [0, 0], sizes = [2, 32], strides = [1, 1]} : vector<2x128xf32> to vector<2x32xf32>
    %848 = arith.negf %847 : vector<2x32xf32>
    %849 = math.exp %848 : vector<2x32xf32>
    %cst_195 = arith.constant 1.000000e+00 : f32
    %850 = vector.broadcast %cst_195 : f32 to vector<2x32xf32>
    %851 = arith.addf %850, %849 : vector<2x32xf32>
    %852 = arith.divf %850, %851 : vector<2x32xf32>
    %853 = vector.extract_strided_slice %846 {offsets = [0, 32], sizes = [2, 32], strides = [1, 1]} : vector<2x128xf32> to vector<2x32xf32>
    %854 = arith.negf %853 : vector<2x32xf32>
    %855 = math.exp %854 : vector<2x32xf32>
    %cst_196 = arith.constant 1.000000e+00 : f32
    %856 = vector.broadcast %cst_196 : f32 to vector<2x32xf32>
    %857 = arith.addf %856, %855 : vector<2x32xf32>
    %858 = arith.divf %856, %857 : vector<2x32xf32>
    %859 = vector.extract_strided_slice %846 {offsets = [0, 64], sizes = [2, 32], strides = [1, 1]} : vector<2x128xf32> to vector<2x32xf32>
    %860 = math.tanh %859 : vector<2x32xf32>
    %861 = vector.extract_strided_slice %846 {offsets = [0, 96], sizes = [2, 32], strides = [1, 1]} : vector<2x128xf32> to vector<2x32xf32>
    %862 = arith.negf %861 : vector<2x32xf32>
    %863 = math.exp %862 : vector<2x32xf32>
    %cst_197 = arith.constant 1.000000e+00 : f32
    %864 = vector.broadcast %cst_197 : f32 to vector<2x32xf32>
    %865 = arith.addf %864, %863 : vector<2x32xf32>
    %866 = arith.divf %864, %865 : vector<2x32xf32>
    %867 = arith.mulf %858, %811 : vector<2x32xf32>
    %868 = arith.mulf %852, %860 : vector<2x32xf32>
    %869 = arith.addf %867, %868 : vector<2x32xf32>
    %870 = math.tanh %869 : vector<2x32xf32>
    %871 = arith.mulf %866, %870 : vector<2x32xf32>
    %872 = vector.extract_strided_slice %491 {offsets = [2, 0], sizes = [2, 128], strides = [1, 1]} : vector<16x128xf32> to vector<2x128xf32>
    %cst_198 = arith.constant dense<0.000000e+00> : vector<2x128xf32>
    %873 = tpu.matmul %841, %489, %cst_198 {dimension_numbers = #tpu.dot_dimension_numbers<[1], [0], [0], [1], [0, 0, 1, 1], [], []>} : vector<2x32xf32>, vector<32x128xf32>, vector<2x128xf32> -> vector<2x128xf32>
    %874 = arith.addf %872, %873 : vector<2x128xf32>
    %875 = vector.extract_strided_slice %874 {offsets = [0, 0], sizes = [2, 32], strides = [1, 1]} : vector<2x128xf32> to vector<2x32xf32>
    %876 = arith.negf %875 : vector<2x32xf32>
    %877 = math.exp %876 : vector<2x32xf32>
    %cst_199 = arith.constant 1.000000e+00 : f32
    %878 = vector.broadcast %cst_199 : f32 to vector<2x32xf32>
    %879 = arith.addf %878, %877 : vector<2x32xf32>
    %880 = arith.divf %878, %879 : vector<2x32xf32>
    %881 = vector.extract_strided_slice %874 {offsets = [0, 32], sizes = [2, 32], strides = [1, 1]} : vector<2x128xf32> to vector<2x32xf32>
    %882 = arith.negf %881 : vector<2x32xf32>
    %883 = math.exp %882 : vector<2x32xf32>
    %cst_200 = arith.constant 1.000000e+00 : f32
    %884 = vector.broadcast %cst_200 : f32 to vector<2x32xf32>
    %885 = arith.addf %884, %883 : vector<2x32xf32>
    %886 = arith.divf %884, %885 : vector<2x32xf32>
    %887 = vector.extract_strided_slice %874 {offsets = [0, 64], sizes = [2, 32], strides = [1, 1]} : vector<2x128xf32> to vector<2x32xf32>
    %888 = math.tanh %887 : vector<2x32xf32>
    %889 = vector.extract_strided_slice %874 {offsets = [0, 96], sizes = [2, 32], strides = [1, 1]} : vector<2x128xf32> to vector<2x32xf32>
    %890 = arith.negf %889 : vector<2x32xf32>
    %891 = math.exp %890 : vector<2x32xf32>
    %cst_201 = arith.constant 1.000000e+00 : f32
    %892 = vector.broadcast %cst_201 : f32 to vector<2x32xf32>
    %893 = arith.addf %892, %891 : vector<2x32xf32>
    %894 = arith.divf %892, %893 : vector<2x32xf32>
    %895 = arith.mulf %886, %839 : vector<2x32xf32>
    %896 = arith.mulf %880, %888 : vector<2x32xf32>
    %897 = arith.addf %895, %896 : vector<2x32xf32>
    %898 = math.tanh %897 : vector<2x32xf32>
    %899 = arith.mulf %894, %898 : vector<2x32xf32>
    %c12_202 = arith.constant 12 : index
    %c0_203 = arith.constant 0 : index
    %900 = vector.load %arg16[%c12_202, %c0_203] : memref<16x32xf32, #tpu.memory_space<vmem>>, vector<2x32xf32>
    tpu.vector_store %arg16[%c12_202, %c0_203], %871 {strides = array<i32>} : memref<16x32xf32, #tpu.memory_space<vmem>>, vector<2x32xf32>,
    %c2_204 = arith.constant 2 : index
    %c0_205 = arith.constant 0 : index
    %901 = vector.load %arg17[%c2_204, %c0_205] : memref<16x32xf32, #tpu.memory_space<vmem>>, vector<2x32xf32>
    tpu.vector_store %arg17[%c2_204, %c0_205], %899 {strides = array<i32>} : memref<16x32xf32, #tpu.memory_space<vmem>>, vector<2x32xf32>,
    %902 = vector.extract_strided_slice %490 {offsets = [14, 0], sizes = [2, 128], strides = [1, 1]} : vector<16x128xf32> to vector<2x128xf32>
    %cst_206 = arith.constant dense<0.000000e+00> : vector<2x128xf32>
    %903 = tpu.matmul %871, %488, %cst_206 {dimension_numbers = #tpu.dot_dimension_numbers<[1], [0], [0], [1], [0, 0, 1, 1], [], []>} : vector<2x32xf32>, vector<32x128xf32>, vector<2x128xf32> -> vector<2x128xf32>
    %904 = arith.addf %902, %903 : vector<2x128xf32>
    %905 = vector.extract_strided_slice %904 {offsets = [0, 0], sizes = [2, 32], strides = [1, 1]} : vector<2x128xf32> to vector<2x32xf32>
    %906 = arith.negf %905 : vector<2x32xf32>
    %907 = math.exp %906 : vector<2x32xf32>
    %cst_207 = arith.constant 1.000000e+00 : f32
    %908 = vector.broadcast %cst_207 : f32 to vector<2x32xf32>
    %909 = arith.addf %908, %907 : vector<2x32xf32>
    %910 = arith.divf %908, %909 : vector<2x32xf32>
    %911 = vector.extract_strided_slice %904 {offsets = [0, 32], sizes = [2, 32], strides = [1, 1]} : vector<2x128xf32> to vector<2x32xf32>
    %912 = arith.negf %911 : vector<2x32xf32>
    %913 = math.exp %912 : vector<2x32xf32>
    %cst_208 = arith.constant 1.000000e+00 : f32
    %914 = vector.broadcast %cst_208 : f32 to vector<2x32xf32>
    %915 = arith.addf %914, %913 : vector<2x32xf32>
    %916 = arith.divf %914, %915 : vector<2x32xf32>
    %917 = vector.extract_strided_slice %904 {offsets = [0, 64], sizes = [2, 32], strides = [1, 1]} : vector<2x128xf32> to vector<2x32xf32>
    %918 = math.tanh %917 : vector<2x32xf32>
    %919 = vector.extract_strided_slice %904 {offsets = [0, 96], sizes = [2, 32], strides = [1, 1]} : vector<2x128xf32> to vector<2x32xf32>
    %920 = arith.negf %919 : vector<2x32xf32>
    %921 = math.exp %920 : vector<2x32xf32>
    %cst_209 = arith.constant 1.000000e+00 : f32
    %922 = vector.broadcast %cst_209 : f32 to vector<2x32xf32>
    %923 = arith.addf %922, %921 : vector<2x32xf32>
    %924 = arith.divf %922, %923 : vector<2x32xf32>
    %925 = arith.mulf %916, %869 : vector<2x32xf32>
    %926 = arith.mulf %910, %918 : vector<2x32xf32>
    %927 = arith.addf %925, %926 : vector<2x32xf32>
    %928 = math.tanh %927 : vector<2x32xf32>
    %929 = arith.mulf %924, %928 : vector<2x32xf32>
    %930 = vector.extract_strided_slice %491 {offsets = [0, 0], sizes = [2, 128], strides = [1, 1]} : vector<16x128xf32> to vector<2x128xf32>
    %cst_210 = arith.constant dense<0.000000e+00> : vector<2x128xf32>
    %931 = tpu.matmul %899, %489, %cst_210 {dimension_numbers = #tpu.dot_dimension_numbers<[1], [0], [0], [1], [0, 0, 1, 1], [], []>} : vector<2x32xf32>, vector<32x128xf32>, vector<2x128xf32> -> vector<2x128xf32>
    %932 = arith.addf %930, %931 : vector<2x128xf32>
    %933 = vector.extract_strided_slice %932 {offsets = [0, 0], sizes = [2, 32], strides = [1, 1]} : vector<2x128xf32> to vector<2x32xf32>
    %934 = arith.negf %933 : vector<2x32xf32>
    %935 = math.exp %934 : vector<2x32xf32>
    %cst_211 = arith.constant 1.000000e+00 : f32
    %936 = vector.broadcast %cst_211 : f32 to vector<2x32xf32>
    %937 = arith.addf %936, %935 : vector<2x32xf32>
    %938 = arith.divf %936, %937 : vector<2x32xf32>
    %939 = vector.extract_strided_slice %932 {offsets = [0, 32], sizes = [2, 32], strides = [1, 1]} : vector<2x128xf32> to vector<2x32xf32>
    %940 = arith.negf %939 : vector<2x32xf32>
    %941 = math.exp %940 : vector<2x32xf32>
    %cst_212 = arith.constant 1.000000e+00 : f32
    %942 = vector.broadcast %cst_212 : f32 to vector<2x32xf32>
    %943 = arith.addf %942, %941 : vector<2x32xf32>
    %944 = arith.divf %942, %943 : vector<2x32xf32>
    %945 = vector.extract_strided_slice %932 {offsets = [0, 64], sizes = [2, 32], strides = [1, 1]} : vector<2x128xf32> to vector<2x32xf32>
    %946 = math.tanh %945 : vector<2x32xf32>
    %947 = vector.extract_strided_slice %932 {offsets = [0, 96], sizes = [2, 32], strides = [1, 1]} : vector<2x128xf32> to vector<2x32xf32>
    %948 = arith.negf %947 : vector<2x32xf32>
    %949 = math.exp %948 : vector<2x32xf32>
    %cst_213 = arith.constant 1.000000e+00 : f32
    %950 = vector.broadcast %cst_213 : f32 to vector<2x32xf32>
    %951 = arith.addf %950, %949 : vector<2x32xf32>
    %952 = arith.divf %950, %951 : vector<2x32xf32>
    %953 = arith.mulf %944, %897 : vector<2x32xf32>
    %954 = arith.mulf %938, %946 : vector<2x32xf32>
    %955 = arith.addf %953, %954 : vector<2x32xf32>
    %956 = math.tanh %955 : vector<2x32xf32>
    %957 = arith.mulf %952, %956 : vector<2x32xf32>
    %c14_214 = arith.constant 14 : index
    %c0_215 = arith.constant 0 : index
    %958 = vector.load %arg16[%c14_214, %c0_215] : memref<16x32xf32, #tpu.memory_space<vmem>>, vector<2x32xf32>
    tpu.vector_store %arg16[%c14_214, %c0_215], %929 {strides = array<i32>} : memref<16x32xf32, #tpu.memory_space<vmem>>, vector<2x32xf32>,
    %c0_216 = arith.constant 0 : index
    %c0_217 = arith.constant 0 : index
    %959 = vector.load %arg17[%c0_216, %c0_217] : memref<16x32xf32, #tpu.memory_space<vmem>>, vector<2x32xf32>
    tpu.vector_store %arg17[%c0_216, %c0_217], %957 {strides = array<i32>} : memref<16x32xf32, #tpu.memory_space<vmem>>, vector<2x32xf32>,
    %c0_218 = arith.constant 0 : index
    %c0_219 = arith.constant 0 : index
    %960 = vector.load %arg16[%c0_218, %c0_219] : memref<16x32xf32, #tpu.memory_space<vmem>>, vector<16x32xf32>
    %c0_220 = arith.constant 0 : index
    %c0_221 = arith.constant 0 : index
    %961 = vector.load %arg10[%c0_220, %c0_221] : memref<32x128xf32, #tpu.memory_space<vmem>>, vector<32x128xf32>
    %cst_222 = arith.constant dense<0.000000e+00> : vector<16x128xf32>
    %962 = tpu.matmul %960, %961, %cst_222 {dimension_numbers = #tpu.dot_dimension_numbers<[1], [0], [0], [1], [0, 0, 1, 1], [], []>} : vector<16x32xf32>, vector<32x128xf32>, vector<16x128xf32> -> vector<16x128xf32>
    %c0_223 = arith.constant 0 : index
    %c0_224 = arith.constant 0 : index
    %963 = vector.load %arg17[%c0_223, %c0_224] : memref<16x32xf32, #tpu.memory_space<vmem>>, vector<16x32xf32>
    %c0_225 = arith.constant 0 : index
    %c0_226 = arith.constant 0 : index
    %964 = vector.load %arg11[%c0_225, %c0_226] : memref<32x128xf32, #tpu.memory_space<vmem>>, vector<32x128xf32>
    %cst_227 = arith.constant dense<0.000000e+00> : vector<16x128xf32>
    %965 = tpu.matmul %963, %964, %cst_227 {dimension_numbers = #tpu.dot_dimension_numbers<[1], [0], [0], [1], [0, 0, 1, 1], [], []>} : vector<16x32xf32>, vector<32x128xf32>, vector<16x128xf32> -> vector<16x128xf32>
    %966 = arith.addf %962, %965 : vector<16x128xf32>
    %c0_228 = arith.constant 0 : index
    %c0_229 = arith.constant 0 : index
    %967 = vector.load %arg12[%c0_228, %c0_229] : memref<1x128xf32, #tpu.memory_space<vmem>>, vector<1x128xf32>
    %968 = vector.broadcast %967 : vector<1x128xf32> to vector<16x128xf32>
    %969 = arith.addf %966, %968 : vector<16x128xf32>
    %c0_230 = arith.constant 0 : index
    %c0_231 = arith.constant 0 : index
    %970 = vector.load %arg13[%c0_230, %c0_231] : memref<16x128xf32, #tpu.memory_space<vmem>>, vector<16x128xf32>
    tpu.vector_store %arg13[%c0_230, %c0_231], %969 {strides = array<i32>} : memref<16x128xf32, #tpu.memory_space<vmem>>, vector<16x128xf32>,
    return
  }
}

</mosaic_0001>

<bundles_post_ra>
// kernel: bilstm_crf_forward.1
= control target key start
LH: loop header
LB: loop body
LE: loop exit
PB: predicated region body
PF: predicated region fallthrough
CT: control target
= control target key end

     0   :  { %18 = vsyncpa [#allocation7], 0  ;;  %s6178_s0 = inlined_call_operand.vmem [shape: f32[16,32], index: 0, kind: input, shape index: {}]   ;;  %s6179_s1 = inlined_call_operand.hbm [shape: f32[32,256], index: 1, kind: input, shape index: {}]   ;;  %s6180_s2 = inlined_call_operand.vmem [shape: f32[1,256], index: 2, kind: input, shape index: {}]   ;;  %s6181_s3 = inlined_call_operand.hbm [shape: f32[32,128], index: 3, kind: input, shape index: {}]   ;;  %s6182_s4 = inlined_call_operand.hbm [shape: f32[32,128], index: 4, kind: input, shape index: {}]   ;;  %s6183_s5 = inlined_call_operand.vmem [shape: f32[32,256], index: 5, kind: input, shape index: {}]   ;;  %s6184_s6 = inlined_call_operand.vmem [shape: f32[32,256], index: 6, kind: input, shape index: {}]   ;;  %s6185_s7 = inlined_call_operand.vmem [shape: f32[1,256], index: 7, kind: input, shape index: {}]   ;;  %s6186_s8 = inlined_call_operand.hbm [shape: f32[32,128], index: 8, kind: input, shape index: {}]   ;;  %s6187_s9 = inlined_call_operand.hbm [shape: f32[32,128], index: 9, kind: input, shape index: {}]   ;;  %s6188_s10 = inlined_call_operand.hbm [shape: f32[32,128], index: 10, kind: input, shape index: {}]   ;;  %s6189_s11 = inlined_call_operand.vmem [shape: f32[32,128], index: 11, kind: input, shape index: {}]   ;;  %s6190_s12 = inlined_call_operand.vmem [shape: f32[1,128], index: 12, kind: input, shape index: {}]   ;;  %s6191_s13 = inlined_call_operand.vmem [shape: f32[16,128], index: 13, kind: output, shape index: {}]  }
   0x1   :  { %19 = vsyncpa [#allocation9], 0 }
   0x2   :  { %20 = vsyncpa [#allocation12], 0 }
   0x3   :  { %21 = vsyncpa [#allocation15], 0  ;;  %s5151_s25 = smov [#allocation8]  }
   0x4   :  { %s43_s26 = sshll.u32 %s5151_s25, 4  ;;  %s44_s26 = int_to_ptr.vmem [resolvable:$true] %s43_s26 }
   0x5   :  { %s5031_s27 = scalar_lea.vmem %s44_s26, 512  ;;  %p5036_p1 = scmp.lt.s32.totalorder %s44_s26, %s44_s26 }
   0x6   :  { %p5032_p0 = scmp.ne.s32.totalorder %s44_s26, %s5031_s27  ;;  %p5037_p2 = scmp.lt.s32.totalorder %s5031_s27, %s5031_s27 }
   0x8   :  { %p5038_p3 = por %p5037_p2, %p5036_p1 }
   0xa   :  { %p5039_p4 = pnand %p5038_p3, %p5032_p0 }
   0xc   :  { %5042 = shalt.err (!%p5039_p4)
}
   0xd   :  { %s5152_s28 = smov 128   ;;  %s5153_s29 = smov 8  }
   0xe   :  { %49 = dma.hbm_to_vmem [thread:$0]  %s6181_s3, 512, %s44_s26, [#allocation9], %s5152_s28, %s5152_s28, %s5153_s29  }
   0xf   :  { %s5154_s15 = smov [#allocation11]   ;;  %s5155_s17 = smov [#allocation6]  }
  0x10   :  { %s73_s16 = sshll.u32 %s5154_s15, 4  ;;  %s29_s18 = sshll.u32 %s5155_s17, 4  ;;  %s74_s16 = int_to_ptr.vmem [resolvable:$true] %s73_s16  ;;  %s30_s18 = int_to_ptr.vmem [resolvable:$true] %s29_s18 }
  0x11   :  { %s5051_s19 = scalar_lea.vmem %s74_s16, 512  ;;  %p5056_p6 = scmp.lt.s32.totalorder %s74_s16, %s74_s16 }
  0x12   :  { %p5052_p5 = scmp.ne.s32.totalorder %s74_s16, %s5051_s19  ;;  %p5057_p7 = scmp.lt.s32.totalorder %s5051_s19, %s5051_s19 }
  0x14   :  { %p5058_p8 = por %p5057_p7, %p5056_p6 }
  0x16   :  { %p5059_p9 = pnand %p5058_p8, %p5052_p5 }
  0x18   :  { %5062 = shalt.err (!%p5059_p9)
}
  0x19   :  { %79 = dma.hbm_to_vmem [thread:$0]  %s6186_s8, 512, %s74_s16, [#allocation12], %s5152_s28, %s5152_s28, %s5153_s29  }
  0x1a   :  { %s5071_s3 = scalar_lea.vmem %s30_s18, 1024  ;;  %p5076_p11 = scmp.lt.s32.totalorder %s30_s18, %s30_s18 }
  0x1b   :  { %p5072_p10 = scmp.ne.s32.totalorder %s30_s18, %s5071_s3  ;;  %p5077_p12 = scmp.lt.s32.totalorder %s5071_s3, %s5071_s3 }
  0x1d   :  { %p5078_p13 = por %p5077_p12, %p5076_p11 }
  0x1f   :  { %p5079_p0 = pnand %p5078_p13, %p5072_p10 }
  0x21   :  { %5082 = shalt.err (!%p5079_p0)
}
  0x22   :  { %s5156_s22 = smov 256   ;;  %s5157_s23 = smov 16  }
  0x23   :  { %35 = dma.hbm_to_vmem [thread:$0]  %s6179_s1, 1024, %s30_s18, [#allocation7], %s5156_s22, %s5156_s22, %s5157_s23  }
  0x24   :  { %s5158_s26 = smov [#allocation10]   ;;  %s5159_s30 = smov [#allocation13]  }
  0x25   :  { %s55_s27 = sshll.u32 %s5158_s26, 4  ;;  %s85_s14 = sshll.u32 %s5159_s30, 4  ;;  %s56_s27 = int_to_ptr.vmem [resolvable:$true] %s55_s27  ;;  %s86_s14 = int_to_ptr.vmem [resolvable:$true] %s85_s14 }
  0x26   :  { %s5091_s8 = scalar_lea.vmem %s56_s27, 512  ;;  %p5096_p2 = scmp.lt.s32.totalorder %s56_s27, %s56_s27 }
  0x27   :  { %p5092_p1 = scmp.ne.s32.totalorder %s56_s27, %s5091_s8  ;;  %p5097_p3 = scmp.lt.s32.totalorder %s5091_s8, %s5091_s8 }
  0x29   :  { %p5098_p4 = por %p5097_p3, %p5096_p2 }
  0x2b   :  { %p5099_p5 = pnand %p5098_p4, %p5092_p1 }
  0x2d   :  { %5102 = shalt.err (!%p5099_p5)
}
  0x2e   :  { %61 = dma.hbm_to_vmem [thread:$0]  %s6182_s4, 512, %s56_s27, [#allocation9], %s5152_s28, %s5152_s28, %s5153_s29  }
  0x2f   :  { %s5111_s1 = scalar_lea.vmem %s86_s14, 512  ;;  %p5116_p7 = scmp.lt.s32.totalorder %s86_s14, %s86_s14 }
  0x30   :  { %p5112_p6 = scmp.ne.s32.totalorder %s86_s14, %s5111_s1  ;;  %p5117_p8 = scmp.lt.s32.totalorder %s5111_s1, %s5111_s1 }
  0x32   :  { %p5118_p9 = por %p5117_p8, %p5116_p7 }
  0x34   :  { %p5119_p10 = pnand %p5118_p9, %p5112_p6 }
  0x36   :  { %5122 = shalt.err (!%p5119_p10)
}
  0x37   :  { %91 = dma.hbm_to_vmem [thread:$0]  %s6187_s9, 512, %s86_s14, [#allocation12], %s5152_s28, %s5152_s28, %s5153_s29  }
  0x38   :  { %s5160_s19 = smov [#allocation14]  }
  0x39   :  { %s97_s20 = sshll.u32 %s5160_s19, 4  ;;  %s98_s20 = int_to_ptr.vmem [resolvable:$true] %s97_s20 }
  0x3a   :  { %s5131_s21 = scalar_lea.vmem %s98_s20, 512  ;;  %p5136_p12 = scmp.lt.s32.totalorder %s98_s20, %s98_s20 }
  0x3b   :  { %p5132_p11 = scmp.ne.s32.totalorder %s98_s20, %s5131_s21  ;;  %p5137_p13 = scmp.lt.s32.totalorder %s5131_s21, %s5131_s21 }
  0x3d   :  { %p5138_p0 = por %p5137_p13, %p5136_p12 }
  0x3f   :  { %p5139_p1 = pnand %p5138_p0, %p5132_p11 }
  0x41   :  { %5142 = shalt.err (!%p5139_p1)
}
  0x42   :  { %103 = dma.hbm_to_vmem [thread:$0]  %s6188_s10, 512, %s98_s20, [#allocation15], %s5152_s28, %s5152_s28, %s5153_s29  }
  0x43   :  { %5143 = dma.done.wait [#allocation7], 1024  }
  0x44   :  { %5144 = vsyncadd [#allocation7], 4294966272 }
  0x45   :  { %5145 = dma.done.wait [#allocation9], 1024  }
  0x46   :  { %5146 = vsyncadd [#allocation9], 4294966272 }
  0x47   :  { %5147 = dma.done.wait [#allocation12], 1024  }
  0x48   :  { %5148 = vsyncadd [#allocation12], 4294966272 }
  0x49   :  { %5149 = dma.done.wait [#allocation15], 512  }
  0x4a   :  { %5150 = vsyncadd [#allocation15], 4294966784  ;;  %v5161_v0 = vmov 0.0   ;;  %vm5162_vm0 = vmmov 0   ;;  %v135_v1 = vld [vmem:[#allocation6 + $0x38] sm:$0xff]  ;;  %v134_v2 = vld [vmem:[#allocation6 + $0x30] sm:$0xff]  ;;  %v138_v19 = vlaneseq }
  0x4b   :  { %4371 = vmatprep.subr.mxu1 %v5161_v0  ;;  %219 = vmatprep.mubr.f32.mxu0 %v5161_v0  ;;  %v133_v3 = vld [vmem:[#allocation6 + $0x28] sm:$0xff]  ;;  %v132_v4 = vld [vmem:[#allocation6 + $0x20] sm:$0xff]  ;;  %v5272_v5 = vld [vmem:[#allocation8 + $0x18] sm:$0xff]  ;;  %vm148_vm1 = vcmask 261120   ;;  %s5164_s23 = smov 32   ;;  %vm440_vm2 = vcmask 254976  }
  0x4c   :  { %4379 = vmatprep.mubr.msk.f32.mxu1 %vm5162_vm0, %v5161_v0  ;;  %179 = vmatprep.subr.mxu0 %v135_v1  ;;  %v131_v6 = vld [vmem:[#allocation6 + $0x18] sm:$0xff]  ;;  %v5275_v7 = vld [vmem:[#allocation8 + $0x10] sm:$0xff]  ;;  %v5278_v9 = vld [vmem:[#allocation8 + $0x8] sm:$0xff]  ;;  %v5338_v20 = vshrl.u32 %v138_v19, 7  ;;  %vm661_vm3 = vcmask 257026   ;;  %vm446_vm4 = vcmask 261126  }
  0x4d   :  { %180 = vmatpush1.msra.mxu0 %v134_v2  ;;  %4372 = vmatpush3.msra.mxu1 %v5272_v5  ;;  %v130_v8 = vld [vmem:[#allocation6 + $0x10] sm:$0xff]  ;;  %v129_v10 = vld [vmem:[#allocation6 + $0x8] sm:$0xff]  ;;  %v128_v11 = vld [vmem:[#allocation6] sm:$0xff]  ;;  %vm667_vm5 = vcmask 259076  }
  0x4e   :  { %181 = vmatprep.subr.mxu0 %v133_v3  ;;  %4373 = vmatprep.subr.mxu1 %v5161_v0  ;;  %v5282_v12 = vld [vmem:[#allocation8] sm:$0xff]  ;;  %v5289_v14 = vld [vmem:[#allocation10 + $0x18] sm:$0xff]  ;;  %v5294_v15 = vld [vmem:[#allocation10 + $0x10] sm:$0xff]  ;;  %v144_v21 = vsub.s32 1, %v5338_v20  ;;  %v140_v23 = vsub.s32 0, %v5338_v20 }
  0x4f   :  { %182 = vmatpush1.msra.mxu0 %v132_v4  ;;  %4374 = vmatpush3.msra.mxu1 %v5275_v7  ;;  %v126_v13 = vld [vmem:[%s6178_s0] sm:$0xff]  ;;  %v127_v16 = vld [vmem:[%s6178_s0 + $0x8] sm:$0xff] }
  0x50   :  { %183 = vmatprep.subr.mxu0 %v131_v6  ;;  %4375 = vmatprep.subr.mxu1 %v5161_v0  ;;  %v5303_v17 = vld [vmem:[#allocation10 + $0x8] sm:$0xff]  ;;  %v5309_v18 = vld [vmem:[#allocation10] sm:$0xff] }
  0x51   :  { %184 = vmatpush1.msra.mxu0 %v130_v8  ;;  %4376 = vmatpush3.msra.mxu1 %v5278_v9  ;;  %v136_v22 = vld [vmem:[%s6180_s2] sm:$0x3]  ;;  %s5163_s2 = smov 64  }
  0x52   :  { %185 = vmatprep.subr.mxu0 %v129_v10  ;;  %4377 = vmatprep.subr.mxu1 %v5161_v0  ;;  %v145_v24 = vrot.slane %v136_v22, %v144_v21  ;;  %v141_v28 = vrot.slane %v136_v22, %v140_v23 }
  0x53   :  { %186 = vmatpush1.msra.mxu0 %v128_v11  ;;  %4378 = vmatpush3.msra.mxu1 %v5282_v12 }
  0x54   :  { %4128 = vmatmul.mubr.msk.f32.vlgmr.msra.gmra.mxu0 %vm148_vm1, %v126_v13  ;;  %4382 = vmatprep.subr.mxu0 %v5161_v0 }
  0x55   :  { %4383 = vmatpush3.msra.mxu0 %v5289_v14  ;;  %225 = vmatprep.mubr.f32.mxu0 %v5161_v0 }
  0x56   :  { %4384 = vmatprep.subr.mxu0 %v5161_v0  ;;  %4380 = vmatmul.mubr.f32.vlgmr.msra.gmra.mxu1 %v5161_v0 }
  0x57   :  { %4385 = vmatpush3.msra.mxu0 %v5294_v15  ;;  %4393 = vmatprep.subr.mxu1 %v5161_v0 }
  0x58   :  { %4129 = vmatmul.mubr.msk.f32.gmra.mxu0 %vm148_vm1, %v127_v16  ;;  %4386 = vmatprep.subr.mxu0 %v5161_v0 }
  0x59   :  { %4387 = vmatpush3.msra.mxu0 %v5303_v17  ;;  %4390 = vmatprep.mubr.msk.f32.mxu0 %vm5162_vm0, %v5161_v0 }
  0x5a   :  { %4388 = vmatprep.subr.mxu0 %v5161_v0  ;;  %4394 = vmatpush3.msra.mxu1 %v5272_v5 }
  0x5b   :  { %4389 = vmatpush3.msra.mxu0 %v5309_v18  ;;  %4395 = vmatprep.subr.mxu1 %v5161_v0 }
  0x5c   :  { %4391 = vmatmul.mubr.f32.vlgmr.msra.gmra.mxu0 %v5161_v0  ;;  %4404 = vmatprep.subr.mxu0 %v5161_v0 }
  0x5d   :  { %4405 = vmatpush3.msra.mxu0 %v5289_v14  ;;  %4396 = vmatpush3.msra.mxu1 %v5275_v7 }
  0x5e   :  { %4406 = vmatprep.subr.mxu0 %v5161_v0  ;;  %4397 = vmatprep.subr.mxu1 %v5161_v0 }
  0x5f   :  { %4407 = vmatpush3.msra.mxu0 %v5294_v15  ;;  %4398 = vmatpush3.msra.mxu1 %v5278_v9 }
  0x60   :  { %4408 = vmatprep.subr.mxu0 %v5161_v0  ;;  %4412 = vmatprep.mubr.msk.f32.mxu0 %vm5162_vm0, %v5161_v0 }
  0x61   :  { %4409 = vmatpush3.msra.mxu0 %v5303_v17  ;;  %4399 = vmatprep.subr.mxu1 %v5161_v0 }
  0x62   :  { %4410 = vmatprep.subr.mxu0 %v5161_v0  ;;  %4400 = vmatpush3.msra.mxu1 %v5282_v12 }
  0x63   :  { %4411 = vmatpush3.msra.mxu0 %v5309_v18  ;;  %4401 = vmatprep.mubr.msk.f32.mxu1 %vm5162_vm0, %v5161_v0 }
  0x64   :  { %4426 = vmatprep.subr.mxu0 %v5161_v0  ;;  %4415 = vmatprep.subr.mxu1 %v5161_v0 }
 0x114   :  { %v221_v25 = vpop.f32.mrf.mxu0 }
 0x115   :  { %v5353_v35 = vadd.f32 %v221_v25, %v141_v28 }
 0x116   :  { %v223_v26 = vpop.f32.mrf.mxu0  ;;  %v309_v27 = vpop.f32.mrf.mxu1 }
 0x117   :  { %v5349_v29 = vadd.f32 %v223_v26, %v145_v24  ;;  %v313_v40 = vadd.f32 %v309_v27, %v5353_v35 }
 0x118   :  { %v227_v30 = vpop.f32.mrf.mxu0  ;;  %v4381_v31 = vpop.f32.mrf.mxu1 }
 0x119   :  { %v5351_v32 = vadd.f32 %v227_v30, %v141_v28  ;;  %v4130_v44 = vmul.f32 -1.442695, %v313_v40 }
 0x11a   :  { %v229_v33 = vpop.f32.mrf.mxu0 }
 0x11b   :  { %v5355_v36 = vadd.f32 %v229_v33, %v145_v24 }
 0x11c   :  { %v404_v34 = vpop.f32.mrf.mxu0 }
 0x11d   :  { %v409_v37 = vrot.slane %v404_v34, 2 }
 0x11e   :  { %v4392_v38 = vpop.f32.mrf.mxu0 }
 0x11f   :  { %v411_v39 = vadd.f32 %v409_v37, %v5355_v36 }
 0x121   :  { %4759 = vtanh.f32 %v411_v39  ;;  %v4131_v43 = vmul.f32 -1.442695, %v411_v39 }
 0x122   :  { %4761 = vtanh.f32 %v313_v40 }
 0x123   :  { %4763 = vpow2.f32 %v4131_v43 }
 0x124   :  { %4765 = vpow2.f32 %v4130_v44 }
 0x12e   :  { %v4760_v41 = vpop.eup %4759 }
 0x12f   :  { %421 = vrot.lane.b32.xlu0 %v4760_v41, %s5163_s2  ;;  %v4762_v42 = vpop.eup %4761 }
 0x130   :  { %v4764_v45 = vpop.eup %4763 }
 0x131   :  { %v415_v46 = vadd.f32 1.0, %v4764_v45  ;;  %v4766_v47 = vpop.eup %4765 }
 0x132   :  { %v317_v48 = vadd.f32 1.0, %v4766_v47 }
 0x133   :  { %323 = vrot.lane.b32.xlu0 %v4762_v42, %s5163_s2  ;;  %4767 = vrcp.f32 %v415_v46 }
 0x134   :  { %4769 = vrcp.f32 %v317_v48 }
 0x140   :  { %v4768_v49 = vpop.eup %4767 }
 0x141   :  { %v4770_v52 = vpop.eup %4769  ;;  %v419_v55 = vmul.f32 0.0, %v4768_v49 }
 0x142   :  { %v321_v58 = vmul.f32 0.0, %v4770_v52 }
 0x1a1   :  { %v422_v50 = vpop.permute.xlu0 %421 }
 0x1a2   :  { %v424_v51 = vmul.f32 %v4768_v49, %v422_v50 }
 0x1a4   :  { %426 = vrot.lane.b32.xlu1 %v424_v51, %s5164_s23 }
 0x1a5   :  { %v324_v53 = vpop.permute.xlu0 %323 }
 0x1a6   :  { %v326_v54 = vmul.f32 %v4770_v52, %v324_v53 }
 0x1a8   :  { %328 = vrot.lane.b32.xlu1 %v326_v54, %s5164_s23 }
 0x216   :  { %v427_v56 = vpop.permute.xlu1 %426 }
 0x217   :  { %v5363_v57 = vadd.f32 %v427_v56, %v419_v55 }
 0x219   :  { %4771 = vtanh.f32 %v5363_v57  ;;  %v638_v44 = vrot.slane %v5363_v57, 2 }
 0x21a   :  { %v329_v59 = vpop.permute.xlu1 %328 }
 0x21b   :  { %v5366_v60 = vadd.f32 %v329_v59, %v321_v58 }
 0x21d   :  { %4773 = vtanh.f32 %v5366_v60  ;;  %v532_v46 = vrot.slane %v5366_v60, 6 }
 0x226   :  { %v4772_v61 = vpop.eup %4771 }
 0x227   :  { %432 = vrot.lane.b32.xlu0 %v4772_v61, %s5163_s2 }
 0x22a   :  { %v4774_v62 = vpop.eup %4773 }
 0x22b   :  { %334 = vrot.lane.b32.xlu1 %v4774_v62, %s5163_s2 }
 0x299   :  { %v433_v63 = vpop.permute.xlu0 %432 }
 0x29a   :  { %v5371_v1 = vmul.f32 %v4768_v49, %v433_v63 }
 0x29c   :  { %v551_v2 = vrot.slane %v5371_v1, 6 }
 0x29d   :  { %v335_v3 = vpop.permute.xlu1 %334 }
 0x29e   :  { %v337_v4 = vmul.f32 %v4770_v52, %v335_v3  ;;  %552 = vrot.lane.b32.xlu0 %v551_v2, %s5164_s23 }
 0x2a0   :  { %437 = vrot.lane.b32.xlu1 %v337_v4, %s5164_s23 }
 0x310   :  { %v553_v6 = vpop.permute.xlu0 %552 }
 0x311   :  { %4413 = vmatmul.mubr.msk.f32.vlgmr.msra.gmra.mxu0 %vm148_vm1, %v553_v6 }
 0x312   :  { %v438_v8 = vpop.permute.xlu1 %437  ;;  %4427 = vmatpush3.msra.mxu0 %v5289_v14  ;;  %4434 = vmatprep.mubr.msk.f32.mxu0 %vm5162_vm0, %v5161_v0 }
 0x313   :  { %441 = vst.msk [vmem:[#allocation2] sm:$0x3] %vm440_vm2, %v438_v8  ;;  %4402 = vmatmul.mubr.msk.f32.vlgmr.msra.gmra.mxu1 %vm148_vm1, %v438_v8  ;;  %4428 = vmatprep.subr.mxu0 %v5161_v0 }
 0x314   :  { %4416 = vmatpush3.msra.mxu1 %v5272_v5  ;;  %4429 = vmatpush3.msra.mxu0 %v5294_v15 }
 0x315   :  { %4417 = vmatprep.subr.mxu1 %v5161_v0  ;;  %4430 = vmatprep.subr.mxu0 %v5161_v0 }
 0x316   :  { %4418 = vmatpush3.msra.mxu1 %v5275_v7  ;;  %4431 = vmatpush3.msra.mxu0 %v5303_v17 }
 0x317   :  { %4419 = vmatprep.subr.mxu1 %v5161_v0  ;;  %4432 = vmatprep.subr.mxu0 %v5161_v0 }
 0x318   :  { %4433 = vmatpush3.msra.mxu0 %v5309_v18  ;;  %4420 = vmatpush3.msra.mxu1 %v5278_v9 }
 0x319   :  { %4421 = vmatprep.subr.mxu1 %v5161_v0  ;;  %4423 = vmatprep.mubr.msk.f32.mxu1 %vm5162_vm0, %v5161_v0 }
 0x31a   :  { %4422 = vmatpush3.msra.mxu1 %v5282_v12  ;;  %4448 = vmatprep.subr.mxu0 %v5161_v0 }
 0x31b   :  { %4437 = vmatprep.subr.mxu1 %v5161_v0 }
 0x3d1   :  { %v622_v10 = vpop.f32.mrf.mxu0 }
 0x3d2   :  { %v627_v11 = vrot.slane %v622_v10, 4 }
 0x3d3   :  { %v516_v13 = vpop.f32.mrf.mxu1  ;;  %v4414_v16 = vpop.f32.mrf.mxu0 }
 0x3d4   :  { %v629_v19 = vadd.f32 %v627_v11, %v5355_v36  ;;  %v521_v22 = vrot.slane %v516_v13, 6 }
 0x3d5   :  { %v4403_v24 = vpop.f32.mrf.mxu1 }
 0x3d6   :  { %4775 = vtanh.f32 %v629_v19  ;;  %v523_v25 = vadd.f32 %v521_v22, %v5353_v35  ;;  %v4135_v28 = vmul.f32 -1.442695, %v629_v19 }
 0x3d8   :  { %4777 = vtanh.f32 %v523_v25  ;;  %v4133_v30 = vmul.f32 -1.442695, %v523_v25 }
 0x3d9   :  { %4779 = vpow2.f32 %v4135_v28 }
 0x3da   :  { %4781 = vpow2.f32 %v4133_v30 }
 0x3e3   :  { %v4776_v26 = vpop.eup %4775 }
 0x3e4   :  { %642 = vrot.lane.b32.xlu0 %v4776_v26, %s5163_s2 }
 0x3e5   :  { %v4778_v27 = vpop.eup %4777 }
 0x3e6   :  { %536 = vrot.lane.b32.xlu1 %v4778_v27, %s5163_s2  ;;  %v4780_v31 = vpop.eup %4779 }
 0x3e7   :  { %v4782_v33 = vpop.eup %4781  ;;  %v633_v34 = vadd.f32 1.0, %v4780_v31 }
 0x3e8   :  { %v527_v37 = vadd.f32 1.0, %v4782_v33 }
 0x3e9   :  { %4783 = vrcp.f32 %v633_v34 }
 0x3ea   :  { %4785 = vrcp.f32 %v527_v37 }
 0x3f6   :  { %v4784_v38 = vpop.eup %4783 }
 0x3f7   :  { %v4786_v41 = vpop.eup %4785  ;;  %v640_v45 = vmul.f32 %v4784_v38, %v638_v44 }
 0x3f8   :  { %v534_v49 = vmul.f32 %v4786_v41, %v532_v46 }
 0x456   :  { %v643_v39 = vpop.permute.xlu0 %642 }
 0x457   :  { %v645_v40 = vmul.f32 %v4784_v38, %v643_v39 }
 0x458   :  { %v537_v42 = vpop.permute.xlu1 %536 }
 0x459   :  { %647 = vrot.lane.b32.xlu0 %v645_v40, %s5164_s23  ;;  %v539_v43 = vmul.f32 %v4786_v41, %v537_v42 }
 0x45b   :  { %541 = vrot.lane.b32.xlu1 %v539_v43, %s5164_s23 }
 0x4cb   :  { %v648_v47 = vpop.permute.xlu0 %647 }
 0x4cc   :  { %v5407_v48 = vadd.f32 %v648_v47, %v640_v45 }
 0x4cd   :  { %v542_v50 = vpop.permute.xlu1 %541 }
 0x4ce   :  { %4787 = vtanh.f32 %v5407_v48  ;;  %v5410_v51 = vadd.f32 %v542_v50, %v534_v49  ;;  %v862_v37 = vrot.slane %v5407_v48, 2 }
 0x4d0   :  { %4789 = vtanh.f32 %v5410_v51  ;;  %v756_v39 = vrot.slane %v5410_v51, 6 }
 0x4db   :  { %v4788_v52 = vpop.eup %4787 }
 0x4dc   :  { %653 = vrot.lane.b32.xlu0 %v4788_v52, %s5163_s2 }
 0x4dd   :  { %v4790_v53 = vpop.eup %4789 }
 0x4de   :  { %547 = vrot.lane.b32.xlu1 %v4790_v53, %s5163_s2 }
 0x54e   :  { %v654_v54 = vpop.permute.xlu0 %653 }
 0x54f   :  { %v5415_v55 = vmul.f32 %v4784_v38, %v654_v54 }
 0x550   :  { %v548_v57 = vpop.permute.xlu1 %547 }
 0x551   :  { %v775_v56 = vrot.slane %v5415_v55, 4  ;;  %v5418_v58 = vmul.f32 %v4786_v41, %v548_v57 }
 0x553   :  { %776 = vrot.lane.b32.xlu0 %v775_v56, %s5164_s23  ;;  %v669_v59 = vrot.slane %v5418_v58, 2 }
 0x555   :  { %670 = vrot.lane.b32.xlu1 %v669_v59, %s5164_s23 }
 0x5c5   :  { %v777_v60 = vpop.permute.xlu0 %776 }
 0x5c6   :  { %4435 = vmatmul.mubr.msk.f32.vlgmr.msra.gmra.mxu0 %vm148_vm1, %v777_v60 }
 0x5c7   :  { %4449 = vmatpush3.msra.mxu0 %v5289_v14  ;;  %4456 = vmatprep.mubr.msk.f32.mxu0 %vm5162_vm0, %v5161_v0  ;;  %v671_v61 = vpop.permute.xlu1 %670 }
 0x5c8   :  { %4450 = vmatprep.subr.mxu0 %v5161_v0  ;;  %4424 = vmatmul.mubr.msk.f32.vlgmr.msra.gmra.mxu1 %vm148_vm1, %v671_v61 }
 0x5c9   :  { %4451 = vmatpush3.msra.mxu0 %v5294_v15  ;;  %4438 = vmatpush3.msra.mxu1 %v5272_v5 }
 0x5ca   :  { %4452 = vmatprep.subr.mxu0 %v5161_v0  ;;  %4439 = vmatprep.subr.mxu1 %v5161_v0 }
 0x5cb   :  { %4453 = vmatpush3.msra.mxu0 %v5303_v17  ;;  %4440 = vmatpush3.msra.mxu1 %v5275_v7 }
 0x5cc   :  { %4454 = vmatprep.subr.mxu0 %v5161_v0  ;;  %4441 = vmatprep.subr.mxu1 %v5161_v0 }
 0x5cd   :  { %4455 = vmatpush3.msra.mxu0 %v5309_v18  ;;  %4442 = vmatpush3.msra.mxu1 %v5278_v9 }
 0x5ce   :  { %4445 = vmatprep.mubr.msk.f32.mxu1 %vm5162_vm0, %v5161_v0  ;;  %4443 = vmatprep.subr.mxu1 %v5161_v0 }
 0x5cf   :  { %4470 = vmatprep.subr.mxu0 %v5161_v0  ;;  %4444 = vmatpush3.msra.mxu1 %v5282_v12 }
 0x5d0   :  { %4459 = vmatprep.subr.mxu1 %v5161_v0 }
 0x686   :  { %v846_v62 = vpop.f32.mrf.mxu0 }
 0x687   :  { %v851_v63 = vrot.slane %v846_v62, 6 }
 0x688   :  { %v4436_v2 = vpop.f32.mrf.mxu0  ;;  %v740_v4 = vpop.f32.mrf.mxu1 }
 0x689   :  { %v853_v3 = vadd.f32 %v851_v63, %v5355_v36  ;;  %v745_v6 = vrot.slane %v740_v4, 4 }
 0x68a   :  { %v4425_v8 = vpop.f32.mrf.mxu1 }
 0x68b   :  { %4791 = vtanh.f32 %v853_v3  ;;  %v747_v10 = vadd.f32 %v745_v6, %v5353_v35  ;;  %v4139_v16 = vmul.f32 -1.442695, %v853_v3 }
 0x68d   :  { %4793 = vtanh.f32 %v747_v10  ;;  %v4137_v19 = vmul.f32 -1.442695, %v747_v10 }
 0x68e   :  { %4795 = vpow2.f32 %v4139_v16 }
 0x68f   :  { %4797 = vpow2.f32 %v4137_v19 }
 0x698   :  { %v4792_v11 = vpop.eup %4791 }
 0x699   :  { %866 = vrot.lane.b32.xlu0 %v4792_v11, %s5163_s2 }
 0x69a   :  { %v4794_v13 = vpop.eup %4793 }
 0x69b   :  { %760 = vrot.lane.b32.xlu1 %v4794_v13, %s5163_s2  ;;  %v4796_v22 = vpop.eup %4795 }
 0x69c   :  { %v4798_v24 = vpop.eup %4797  ;;  %v857_v25 = vadd.f32 1.0, %v4796_v22 }
 0x69d   :  { %v751_v26 = vadd.f32 1.0, %v4798_v24 }
 0x69e   :  { %4799 = vrcp.f32 %v857_v25 }
 0x69f   :  { %4801 = vrcp.f32 %v751_v26 }
 0x6ab   :  { %v4800_v27 = vpop.eup %4799 }
 0x6ac   :  { %v4802_v31 = vpop.eup %4801  ;;  %v864_v38 = vmul.f32 %v4800_v27, %v862_v37 }
 0x6ad   :  { %v758_v42 = vmul.f32 %v4802_v31, %v756_v39 }
 0x70b   :  { %v867_v28 = vpop.permute.xlu0 %866 }
 0x70c   :  { %v869_v30 = vmul.f32 %v4800_v27, %v867_v28 }
 0x70d   :  { %v761_v33 = vpop.permute.xlu1 %760 }
 0x70e   :  { %871 = vrot.lane.b32.xlu0 %v869_v30, %s5164_s23  ;;  %v763_v34 = vmul.f32 %v4802_v31, %v761_v33 }
 0x710   :  { %765 = vrot.lane.b32.xlu1 %v763_v34, %s5164_s23 }
 0x780   :  { %v872_v40 = vpop.permute.xlu0 %871 }
 0x781   :  { %v5453_v41 = vadd.f32 %v872_v40, %v864_v38 }
 0x782   :  { %v766_v43 = vpop.permute.xlu1 %765 }
 0x783   :  { %4803 = vtanh.f32 %v5453_v41  ;;  %v5456_v44 = vadd.f32 %v766_v43, %v758_v42  ;;  %v1081_v25 = vrot.slane %v5453_v41, 2 }
 0x785   :  { %4805 = vtanh.f32 %v5456_v44  ;;  %v978_v30 = vrot.slane %v5456_v44, 6 }
 0x790   :  { %v4804_v45 = vpop.eup %4803 }
 0x791   :  { %877 = vrot.lane.b32.xlu0 %v4804_v45, %s5163_s2 }
 0x792   :  { %v4806_v46 = vpop.eup %4805 }
 0x793   :  { %771 = vrot.lane.b32.xlu1 %v4806_v46, %s5163_s2 }
 0x803   :  { %v878_v47 = vpop.permute.xlu0 %877 }
 0x804   :  { %v5461_v48 = vmul.f32 %v4800_v27, %v878_v47 }
 0x805   :  { %v772_v50 = vpop.permute.xlu1 %771 }
 0x806   :  { %v997_v49 = vrot.slane %v5461_v48, 2  ;;  %v5464_v51 = vmul.f32 %v4802_v31, %v772_v50 }
 0x808   :  { %998 = vrot.lane.b32.xlu0 %v997_v49, %s5164_s23  ;;  %v891_v52 = vrot.slane %v5464_v51, 4 }
 0x80a   :  { %892 = vrot.lane.b32.xlu1 %v891_v52, %s5164_s23 }
 0x87a   :  { %v999_v53 = vpop.permute.xlu0 %998 }
 0x87b   :  { %4457 = vmatmul.mubr.msk.f32.vlgmr.msra.gmra.mxu0 %vm148_vm1, %v999_v53 }
 0x87c   :  { %4471 = vmatpush3.msra.mxu0 %v5289_v14  ;;  %4478 = vmatprep.mubr.msk.f32.mxu0 %vm5162_vm0, %v5161_v0  ;;  %v893_v54 = vpop.permute.xlu1 %892 }
 0x87d   :  { %4472 = vmatprep.subr.mxu0 %v5161_v0  ;;  %4446 = vmatmul.mubr.msk.f32.vlgmr.msra.gmra.mxu1 %vm148_vm1, %v893_v54 }
 0x87e   :  { %4473 = vmatpush3.msra.mxu0 %v5294_v15  ;;  %4460 = vmatpush3.msra.mxu1 %v5272_v5 }
 0x87f   :  { %4474 = vmatprep.subr.mxu0 %v5161_v0  ;;  %4461 = vmatprep.subr.mxu1 %v5161_v0 }
 0x880   :  { %4475 = vmatpush3.msra.mxu0 %v5303_v17  ;;  %4462 = vmatpush3.msra.mxu1 %v5275_v7 }
 0x881   :  { %4476 = vmatprep.subr.mxu0 %v5161_v0  ;;  %4463 = vmatprep.subr.mxu1 %v5161_v0 }
 0x882   :  { %4477 = vmatpush3.msra.mxu0 %v5309_v18  ;;  %4464 = vmatpush3.msra.mxu1 %v5278_v9 }
 0x883   :  { %4467 = vmatprep.mubr.msk.f32.mxu1 %vm5162_vm0, %v5161_v0  ;;  %4465 = vmatprep.subr.mxu1 %v5161_v0 }
 0x884   :  { %4492 = vmatprep.subr.mxu0 %v5161_v0  ;;  %4466 = vmatpush3.msra.mxu1 %v5282_v12 }
 0x885   :  { %4481 = vmatprep.subr.mxu1 %v5161_v0 }
 0x93b   :  { %v1068_v56 = vpop.f32.mrf.mxu0 }
 0x93c   :  { %v1072_v57 = vadd.f32 %v1068_v56, %v5355_v36 }
 0x93d   :  { %v4458_v59 = vpop.f32.mrf.mxu0  ;;  %v962_v60 = vpop.f32.mrf.mxu1 }
 0x93e   :  { %4807 = vtanh.f32 %v1072_v57  ;;  %v967_v61 = vrot.slane %v962_v60, 2  ;;  %v4143_v4 = vmul.f32 -1.442695, %v1072_v57 }
 0x93f   :  { %v4447_v62 = vpop.f32.mrf.mxu1 }
 0x940   :  { %v969_v63 = vadd.f32 %v967_v61, %v5353_v35 }
 0x942   :  { %4809 = vtanh.f32 %v969_v63  ;;  %v4141_v6 = vmul.f32 -1.442695, %v969_v63 }
 0x943   :  { %4811 = vpow2.f32 %v4143_v4 }
 0x944   :  { %4813 = vpow2.f32 %v4141_v6 }
 0x94b   :  { %v4808_v2 = vpop.eup %4807 }
 0x94c   :  { %1085 = vrot.lane.b32.xlu0 %v4808_v2, %s5163_s2 }
 0x94f   :  { %v4810_v3 = vpop.eup %4809 }
 0x950   :  { %982 = vrot.lane.b32.xlu1 %v4810_v3, %s5163_s2  ;;  %v4812_v8 = vpop.eup %4811 }
 0x951   :  { %v1076_v36 = vadd.f32 1.0, %v4812_v8  ;;  %v4814_v10 = vpop.eup %4813 }
 0x952   :  { %v973_v11 = vadd.f32 1.0, %v4814_v10 }
 0x953   :  { %4815 = vrcp.f32 %v1076_v36 }
 0x954   :  { %4817 = vrcp.f32 %v973_v11 }
 0x960   :  { %v4816_v13 = vpop.eup %4815 }
 0x961   :  { %v4818_v19 = vpop.eup %4817  ;;  %v1083_v26 = vmul.f32 %v4816_v13, %v1081_v25 }
 0x962   :  { %v980_v31 = vmul.f32 %v4818_v19, %v978_v30 }
 0x9be   :  { %v1086_v16 = vpop.permute.xlu0 %1085 }
 0x9bf   :  { %v1088_v35 = vmul.f32 %v4816_v13, %v1086_v16 }
 0x9c1   :  { %1090 = vrot.lane.b32.xlu0 %v1088_v35, %s5164_s23 }
 0x9c2   :  { %v983_v22 = vpop.permute.xlu1 %982 }
 0x9c3   :  { %v985_v24 = vmul.f32 %v4818_v19, %v983_v22 }
 0x9c5   :  { %987 = vrot.lane.b32.xlu1 %v985_v24, %s5164_s23 }
 0xa33   :  { %v1091_v27 = vpop.permute.xlu0 %1090 }
 0xa34   :  { %v5498_v28 = vadd.f32 %v1091_v27, %v1083_v26 }
 0xa36   :  { %4819 = vtanh.f32 %v5498_v28  ;;  %v1297_v11 = vrot.slane %v5498_v28, 2 }
 0xa37   :  { %v988_v33 = vpop.permute.xlu1 %987 }
 0xa38   :  { %v5502_v34 = vadd.f32 %v988_v33, %v980_v31 }
 0xa3a   :  { %4821 = vtanh.f32 %v5502_v34 }
 0xa43   :  { %v4820_v37 = vpop.eup %4819 }
 0xa44   :  { %1096 = vrot.lane.b32.xlu0 %v4820_v37, %s5163_s2 }
 0xa47   :  { %v4822_v38 = vpop.eup %4821 }
 0xa48   :  { %993 = vrot.lane.b32.xlu1 %v4822_v38, %s5163_s2 }
 0xab6   :  { %v1097_v39 = vpop.permute.xlu0 %1096 }
 0xab7   :  { %v1099_v40 = vmul.f32 %v4816_v13, %v1097_v39 }
 0xab9   :  { %1106 = vrot.lane.b32.xlu0 %v1099_v40, %s5164_s23 }
 0xaba   :  { %v994_v41 = vpop.permute.xlu1 %993 }
 0xabb   :  { %v5508_v42 = vmul.f32 %v4818_v19, %v994_v41  ;;  %v1194_v19 = vrot.slane %v5502_v34, 6 }
 0xabd   :  { %v1110_v43 = vrot.slane %v5508_v42, 6 }
 0xabf   :  { %1111 = vrot.lane.b32.xlu1 %v1110_v43, %s5164_s23 }
 0xb2b   :  { %v1107_v44 = vpop.permute.xlu0 %1106 }
 0xb2c   :  { %1109 = vst.msk [vmem:[#allocation3 + $0x8] sm:$0x3] %vm440_vm2, %v1107_v44  ;;  %4479 = vmatmul.mubr.msk.f32.vlgmr.msra.gmra.mxu0 %vm148_vm1, %v1107_v44 }
 0xb2d   :  { %4493 = vmatpush3.msra.mxu0 %v5289_v14  ;;  %4500 = vmatprep.mubr.msk.f32.mxu0 %vm5162_vm0, %v5161_v0 }
 0xb2e   :  { %4494 = vmatprep.subr.mxu0 %v5161_v0 }
 0xb2f   :  { %4495 = vmatpush3.msra.mxu0 %v5294_v15 }
 0xb30   :  { %4496 = vmatprep.subr.mxu0 %v5161_v0 }
 0xb31   :  { %4497 = vmatpush3.msra.mxu0 %v5303_v17  ;;  %v1112_v45 = vpop.permute.xlu1 %1111 }
 0xb32   :  { %4498 = vmatprep.subr.mxu0 %v5161_v0  ;;  %4468 = vmatmul.mubr.msk.f32.vlgmr.msra.gmra.mxu1 %vm148_vm1, %v1112_v45 }
 0xb33   :  { %4499 = vmatpush3.msra.mxu0 %v5309_v18  ;;  %4482 = vmatpush3.msra.mxu1 %v5272_v5 }
 0xb34   :  { %4489 = vmatprep.mubr.msk.f32.mxu1 %vm5162_vm0, %v5161_v0  ;;  %4483 = vmatprep.subr.mxu1 %v5161_v0 }
 0xb35   :  { %4514 = vmatprep.subr.mxu0 %v5161_v0  ;;  %4484 = vmatpush3.msra.mxu1 %v5275_v7 }
 0xb36   :  { %4485 = vmatprep.subr.mxu1 %v5161_v0 }
 0xb37   :  { %4486 = vmatpush3.msra.mxu1 %v5278_v9 }
 0xb38   :  { %4487 = vmatprep.subr.mxu1 %v5161_v0 }
 0xb39   :  { %4488 = vmatpush3.msra.mxu1 %v5282_v12 }
 0xb3a   :  { %4503 = vmatprep.subr.mxu1 %v5161_v0 }
 0xbec   :  { %v1281_v46 = vpop.f32.mrf.mxu0 }
 0xbed   :  { %v1286_v47 = vrot.slane %v1281_v46, 2 }
 0xbee   :  { %v4480_v49 = vpop.f32.mrf.mxu0 }
 0xbef   :  { %v1288_v50 = vadd.f32 %v1286_v47, %v5349_v29 }
 0xbf1   :  { %4823 = vtanh.f32 %v1288_v50  ;;  %v4147_v59 = vmul.f32 -1.442695, %v1288_v50 }
 0xbf2   :  { %v1181_v52 = vpop.f32.mrf.mxu1 }
 0xbf3   :  { %v1185_v53 = vadd.f32 %v1181_v52, %v5351_v32 }
 0xbf4   :  { %v4469_v54 = vpop.f32.mrf.mxu1 }
 0xbf5   :  { %4825 = vtanh.f32 %v1185_v53  ;;  %v4145_v60 = vmul.f32 -1.442695, %v1185_v53 }
 0xbf6   :  { %4827 = vpow2.f32 %v4147_v59 }
 0xbf7   :  { %4829 = vpow2.f32 %v4145_v60 }
 0xbfe   :  { %v4824_v56 = vpop.eup %4823 }
 0xbff   :  { %1301 = vrot.lane.b32.xlu0 %v4824_v56, %s5163_s2 }
 0xc02   :  { %v4826_v57 = vpop.eup %4825 }
 0xc03   :  { %1198 = vrot.lane.b32.xlu1 %v4826_v57, %s5163_s2  ;;  %v4828_v61 = vpop.eup %4827 }
 0xc04   :  { %v1292_v62 = vadd.f32 1.0, %v4828_v61  ;;  %v4830_v63 = vpop.eup %4829 }
 0xc05   :  { %v1189_v2 = vadd.f32 1.0, %v4830_v63 }
 0xc06   :  { %4831 = vrcp.f32 %v1292_v62 }
 0xc07   :  { %4833 = vrcp.f32 %v1189_v2 }
 0xc13   :  { %v4832_v3 = vpop.eup %4831 }
 0xc14   :  { %v4834_v8 = vpop.eup %4833  ;;  %v1299_v13 = vmul.f32 %v4832_v3, %v1297_v11 }
 0xc15   :  { %v1196_v22 = vmul.f32 %v4834_v8, %v1194_v19 }
 0xc71   :  { %v1302_v4 = vpop.permute.xlu0 %1301 }
 0xc72   :  { %v1304_v6 = vmul.f32 %v4832_v3, %v1302_v4 }
 0xc74   :  { %1306 = vrot.lane.b32.xlu0 %v1304_v6, %s5164_s23 }
 0xc75   :  { %v1199_v36 = vpop.permute.xlu1 %1198 }
 0xc76   :  { %v1201_v10 = vmul.f32 %v4834_v8, %v1199_v36 }
 0xc78   :  { %1203 = vrot.lane.b32.xlu1 %v1201_v10, %s5164_s23 }
 0xce6   :  { %v1307_v16 = vpop.permute.xlu0 %1306 }
 0xce7   :  { %v5542_v35 = vadd.f32 %v1307_v16, %v1299_v13 }
 0xce9   :  { %4835 = vtanh.f32 %v5542_v35  ;;  %v1516_v62 = vrot.slane %v5542_v35, 2 }
 0xcea   :  { %v1204_v24 = vpop.permute.xlu1 %1203 }
 0xceb   :  { %v5546_v25 = vadd.f32 %v1204_v24, %v1196_v22 }
 0xced   :  { %4837 = vtanh.f32 %v5546_v25  ;;  %v1410_v2 = vrot.slane %v5546_v25, 6 }
 0xcf6   :  { %v4836_v26 = vpop.eup %4835 }
 0xcf7   :  { %1312 = vrot.lane.b32.xlu0 %v4836_v26, %s5163_s2 }
 0xcfa   :  { %v4838_v27 = vpop.eup %4837 }
 0xcfb   :  { %1209 = vrot.lane.b32.xlu1 %v4838_v27, %s5163_s2  ;;  %v5015_v27 = vld [vmem:[#allocation8 + $0x18] sm:$0xff] }
 0xd69   :  { %v1313_v28 = vpop.permute.xlu0 %1312 }
 0xd6a   :  { %v5551_v30 = vmul.f32 %v4832_v3, %v1313_v28  ;;  %v5016_v28 = vld [vmem:[#allocation8 + $0x10] sm:$0xff] }
 0xd6c   :  { %v1429_v31 = vrot.slane %v5551_v30, 6 }
 0xd6d   :  { %v1210_v33 = vpop.permute.xlu1 %1209 }
 0xd6e   :  { %1430 = vrot.lane.b32.xlu0 %v1429_v31, %s5164_s23  ;;  %v1212_v34 = vmul.f32 %v4834_v8, %v1210_v33 }
 0xd70   :  { %1317 = vrot.lane.b32.xlu1 %v1212_v34, %s5164_s23 }
 0xde0   :  { %v1431_v37 = vpop.permute.xlu0 %1430 }
 0xde1   :  { %4501 = vmatmul.mubr.msk.f32.vlgmr.msra.gmra.mxu0 %vm148_vm1, %v1431_v37 }
 0xde2   :  { %4515 = vmatpush3.msra.mxu0 %v5289_v14  ;;  %4522 = vmatprep.mubr.msk.f32.mxu0 %vm5162_vm0, %v5161_v0  ;;  %v1318_v38 = vpop.permute.xlu1 %1317 }
 0xde3   :  { %4516 = vmatprep.subr.mxu0 %v5161_v0  ;;  %1320 = vst.msk [vmem:[#allocation2 + $0x8] sm:$0x3] %vm440_vm2, %v1318_v38  ;;  %4490 = vmatmul.mubr.msk.f32.vlgmr.msra.gmra.mxu1 %vm148_vm1, %v1318_v38 }
 0xde4   :  { %4517 = vmatpush3.msra.mxu0 %v5294_v15  ;;  %4504 = vmatpush3.msra.mxu1 %v5272_v5 }
 0xde5   :  { %4518 = vmatprep.subr.mxu0 %v5161_v0  ;;  %4505 = vmatprep.subr.mxu1 %v5161_v0 }
 0xde6   :  { %4519 = vmatpush3.msra.mxu0 %v5303_v17  ;;  %4506 = vmatpush3.msra.mxu1 %v5275_v7 }
 0xde7   :  { %4520 = vmatprep.subr.mxu0 %v5161_v0  ;;  %4507 = vmatprep.subr.mxu1 %v5161_v0 }
 0xde8   :  { %4521 = vmatpush3.msra.mxu0 %v5309_v18  ;;  %4508 = vmatpush3.msra.mxu1 %v5278_v9 }
 0xde9   :  { %4511 = vmatprep.mubr.msk.f32.mxu1 %vm5162_vm0, %v5161_v0  ;;  %4509 = vmatprep.subr.mxu1 %v5161_v0 }
 0xdea   :  { %4536 = vmatprep.subr.mxu0 %v5161_v0  ;;  %4510 = vmatpush3.msra.mxu1 %v5282_v12 }
 0xdeb   :  { %4525 = vmatprep.subr.mxu1 %v5161_v0 }
 0xea1   :  { %v1500_v5 = vpop.f32.mrf.mxu0 }
 0xea2   :  { %v1505_v7 = vrot.slane %v1500_v5, 4 }
 0xea3   :  { %v4502_v39 = vpop.f32.mrf.mxu0  ;;  %v1394_v41 = vpop.f32.mrf.mxu1 }
 0xea4   :  { %v1507_v40 = vadd.f32 %v1505_v7, %v5349_v29  ;;  %v1399_v43 = vrot.slane %v1394_v41, 6 }
 0xea5   :  { %v4491_v9 = vpop.f32.mrf.mxu1 }
 0xea6   :  { %4839 = vtanh.f32 %v1507_v40  ;;  %v1401_v44 = vadd.f32 %v1399_v43, %v5351_v32  ;;  %v4151_v12 = vmul.f32 -1.442695, %v1507_v40 }
 0xea8   :  { %4841 = vtanh.f32 %v1401_v44  ;;  %v4149_v47 = vmul.f32 -1.442695, %v1401_v44 }
 0xea9   :  { %4843 = vpow2.f32 %v4151_v12 }
 0xeaa   :  { %4845 = vpow2.f32 %v4149_v47 }
 0xeb3   :  { %v4840_v45 = vpop.eup %4839 }
 0xeb4   :  { %1520 = vrot.lane.b32.xlu0 %v4840_v45, %s5163_s2 }
 0xeb5   :  { %v4842_v46 = vpop.eup %4841 }
 0xeb6   :  { %1414 = vrot.lane.b32.xlu1 %v4842_v46, %s5163_s2  ;;  %v4844_v49 = vpop.eup %4843 }
 0xeb7   :  { %v4846_v50 = vpop.eup %4845  ;;  %v1511_v52 = vadd.f32 1.0, %v4844_v49 }
 0xeb8   :  { %v1405_v53 = vadd.f32 1.0, %v4846_v50 }
 0xeb9   :  { %4847 = vrcp.f32 %v1511_v52 }
 0xeba   :  { %4849 = vrcp.f32 %v1405_v53 }
 0xec6   :  { %v4848_v54 = vpop.eup %4847 }
 0xec7   :  { %v4850_v59 = vpop.eup %4849  ;;  %v1518_v63 = vmul.f32 %v4848_v54, %v1516_v62 }
 0xec8   :  { %v1412_v6 = vmul.f32 %v4850_v59, %v1410_v2 }
 0xf26   :  { %v1521_v56 = vpop.permute.xlu0 %1520 }
 0xf27   :  { %v1523_v57 = vmul.f32 %v4848_v54, %v1521_v56 }
 0xf28   :  { %v1415_v60 = vpop.permute.xlu1 %1414 }
 0xf29   :  { %1525 = vrot.lane.b32.xlu0 %v1523_v57, %s5164_s23  ;;  %v1417_v61 = vmul.f32 %v4850_v59, %v1415_v60 }
 0xf2b   :  { %1419 = vrot.lane.b32.xlu1 %v1417_v61, %s5164_s23 }
 0xf9b   :  { %v1526_v3 = vpop.permute.xlu0 %1525 }
 0xf9c   :  { %v5587_v4 = vadd.f32 %v1526_v3, %v1518_v63 }
 0xf9d   :  { %v1420_v8 = vpop.permute.xlu1 %1419 }
 0xf9e   :  { %4851 = vtanh.f32 %v5587_v4  ;;  %v5590_v36 = vadd.f32 %v1420_v8, %v1412_v6  ;;  %v1738_v53 = vrot.slane %v5587_v4, 2 }
 0xfa0   :  { %4853 = vtanh.f32 %v5590_v36  ;;  %v1632_v56 = vrot.slane %v5590_v36, 6 }
 0xfab   :  { %v4852_v10 = vpop.eup %4851 }
 0xfac   :  { %1531 = vrot.lane.b32.xlu0 %v4852_v10, %s5163_s2 }
 0xfad   :  { %v4854_v11 = vpop.eup %4853 }
 0xfae   :  { %1425 = vrot.lane.b32.xlu1 %v4854_v11, %s5163_s2 }
0x101e   :  { %v1532_v13 = vpop.permute.xlu0 %1531 }
0x101f   :  { %v5595_v16 = vmul.f32 %v4848_v54, %v1532_v13 }
0x1020   :  { %v1426_v19 = vpop.permute.xlu1 %1425 }
0x1021   :  { %v1651_v35 = vrot.slane %v5595_v16, 4  ;;  %v5598_v22 = vmul.f32 %v4850_v59, %v1426_v19 }
0x1023   :  { %1652 = vrot.lane.b32.xlu0 %v1651_v35, %s5164_s23  ;;  %v1545_v24 = vrot.slane %v5598_v22, 2 }
0x1025   :  { %1546 = vrot.lane.b32.xlu1 %v1545_v24, %s5164_s23 }
0x1095   :  { %v1653_v25 = vpop.permute.xlu0 %1652 }
0x1096   :  { %4523 = vmatmul.mubr.msk.f32.vlgmr.msra.gmra.mxu0 %vm148_vm1, %v1653_v25 }
0x1097   :  { %4537 = vmatpush3.msra.mxu0 %v5289_v14  ;;  %4544 = vmatprep.mubr.msk.f32.mxu0 %vm5162_vm0, %v5161_v0  ;;  %v1547_v26 = vpop.permute.xlu1 %1546  ;;  %v5017_v14 = vld [vmem:[#allocation8 + $0x8] sm:$0xff] }
0x1098   :  { %4538 = vmatprep.subr.mxu0 %v5161_v0  ;;  %4512 = vmatmul.mubr.msk.f32.vlgmr.msra.gmra.mxu1 %vm148_vm1, %v1547_v26 }
0x1099   :  { %4539 = vmatpush3.msra.mxu0 %v5294_v15  ;;  %4526 = vmatpush3.msra.mxu1 %v5015_v27  ;;  %v5018_v15 = vld [vmem:[#allocation8] sm:$0xff] }
0x109a   :  { %4540 = vmatprep.subr.mxu0 %v5161_v0  ;;  %4527 = vmatprep.subr.mxu1 %v5161_v0 }
0x109b   :  { %4541 = vmatpush3.msra.mxu0 %v5303_v17  ;;  %4528 = vmatpush3.msra.mxu1 %v5016_v28 }
0x109c   :  { %4542 = vmatprep.subr.mxu0 %v5161_v0  ;;  %4529 = vmatprep.subr.mxu1 %v5161_v0 }
0x109d   :  { %4543 = vmatpush3.msra.mxu0 %v5309_v18  ;;  %4530 = vmatpush3.msra.mxu1 %v5017_v14 }
0x109e   :  { %4533 = vmatprep.mubr.msk.f32.mxu1 %vm5162_vm0, %v5161_v0  ;;  %4531 = vmatprep.subr.mxu1 %v5161_v0 }
0x109f   :  { %4532 = vmatpush3.msra.mxu1 %v5018_v15 }
0x1156   :  { %v1722_v31 = vpop.f32.mrf.mxu0 }
0x1157   :  { %v1727_v33 = vrot.slane %v1722_v31, 6 }
0x1158   :  { %v4524_v17 = vpop.f32.mrf.mxu0  ;;  %v1616_v37 = vpop.f32.mrf.mxu1 }
0x1159   :  { %v1729_v34 = vadd.f32 %v1727_v33, %v5349_v29  ;;  %v1621_v38 = vrot.slane %v1616_v37, 4 }
0x115a   :  { %v4513_v5 = vpop.f32.mrf.mxu1 }
0x115b   :  { %4855 = vtanh.f32 %v1729_v34  ;;  %v1623_v18 = vadd.f32 %v1621_v38, %v5351_v32  ;;  %v4155_v40 = vmul.f32 -1.442695, %v1729_v34 }
0x115d   :  { %4857 = vtanh.f32 %v1623_v18  ;;  %v4153_v41 = vmul.f32 -1.442695, %v1623_v18 }
0x115e   :  { %4859 = vpow2.f32 %v4155_v40 }
0x115f   :  { %4861 = vpow2.f32 %v4153_v41 }
0x1168   :  { %v4856_v7 = vpop.eup %4855 }
0x1169   :  { %1742 = vrot.lane.b32.xlu0 %v4856_v7, %s5163_s2 }
0x116a   :  { %v4858_v39 = vpop.eup %4857 }
0x116b   :  { %1636 = vrot.lane.b32.xlu1 %v4858_v39, %s5163_s2  ;;  %v4860_v43 = vpop.eup %4859 }
0x116c   :  { %v4862_v9 = vpop.eup %4861  ;;  %v1733_v44 = vadd.f32 1.0, %v4860_v43 }
0x116d   :  { %v1627_v45 = vadd.f32 1.0, %v4862_v9 }
0x116e   :  { %4863 = vrcp.f32 %v1733_v44 }
0x116f   :  { %4865 = vrcp.f32 %v1627_v45 }
0x117b   :  { %v4864_v46 = vpop.eup %4863 }
0x117c   :  { %v4866_v49 = vpop.eup %4865  ;;  %v1740_v54 = vmul.f32 %v4864_v46, %v1738_v53 }
0x117d   :  { %v1634_v60 = vmul.f32 %v4866_v49, %v1632_v56  ;;  %v1990_v56 = vld [vmem:[%s6183_s5 + $0x10] sm:$0xff] }
0x11db   :  { %v1743_v12 = vpop.permute.xlu0 %1742 }
0x11dc   :  { %v1745_v47 = vmul.f32 %v4864_v46, %v1743_v12 }
0x11dd   :  { %v1637_v50 = vpop.permute.xlu1 %1636 }
0x11de   :  { %1747 = vrot.lane.b32.xlu0 %v1745_v47, %s5164_s23  ;;  %v1639_v52 = vmul.f32 %v4866_v49, %v1637_v50  ;;  %v1995_v47 = vld [vmem:[%s6183_s5 + $0x38] sm:$0xff]  ;;  %v1993_v50 = vld [vmem:[%s6183_s5 + $0x28] sm:$0xff] }
0x11df   :  { %2119 = vmatprep.subr.mxu0 %v1995_v47 }
0x11e0   :  { %1641 = vrot.lane.b32.xlu1 %v1639_v52, %s5164_s23  ;;  %v1992_v52 = vld [vmem:[%s6183_s5 + $0x20] sm:$0xff] }
0x1250   :  { %v1748_v57 = vpop.permute.xlu0 %1747 }
0x1251   :  { %v1750_v59 = vadd.f32 %v1748_v57, %v1740_v54  ;;  %v1991_v54 = vld [vmem:[%s6183_s5 + $0x18] sm:$0xff]  ;;  %v1989_v57 = vld [vmem:[%s6183_s5 + $0x8] sm:$0xff] }
0x1252   :  { %v1642_v61 = vpop.permute.xlu1 %1641 }
0x1253   :  { %4867 = vtanh.f32 %v1750_v59  ;;  %v1644_v62 = vadd.f32 %v1642_v61, %v1634_v60  ;;  %v1957_v40 = vrot.slane %v1750_v59, 2  ;;  %v1988_v59 = vld [vmem:[%s6183_s5] sm:$0xff] }
0x1255   :  { %4869 = vtanh.f32 %v1644_v62  ;;  %v1854_v44 = vrot.slane %v1644_v62, 6 }
0x1260   :  { %v4868_v63 = vpop.eup %4867 }
0x1261   :  { %1753 = vrot.lane.b32.xlu0 %v4868_v63, %s5163_s2 }
0x1262   :  { %v4870_v2 = vpop.eup %4869 }
0x1263   :  { %1647 = vrot.lane.b32.xlu1 %v4870_v2, %s5163_s2 }
0x12d3   :  { %v1754_v3 = vpop.permute.xlu0 %1753 }
0x12d4   :  { %v5629_v6 = vmul.f32 %v4864_v46, %v1754_v3 }
0x12d5   :  { %v1648_v8 = vpop.permute.xlu1 %1647 }
0x12d6   :  { %v1873_v4 = vrot.slane %v5629_v6, 2  ;;  %v5632_v36 = vmul.f32 %v4866_v49, %v1648_v8  ;;  %v1994_v49 = vld [vmem:[%s6183_s5 + $0x30] sm:$0xff] }
0x12d8   :  { %1874 = vrot.lane.b32.xlu0 %v1873_v4, %s5164_s23  ;;  %v1767_v10 = vrot.slane %v5632_v36, 4 }
0x12da   :  { %1768 = vrot.lane.b32.xlu1 %v1767_v10, %s5164_s23  ;;  %v5738_v10 = vld [vmem:[#allocation13 + $0x18] sm:$0xff] }
0x134a   :  { %v1875_v11 = vpop.permute.xlu0 %1874 }
0x134b   :  { %4545 = vmatmul.mubr.msk.f32.vlgmr.msra.gmra.mxu0 %vm148_vm1, %v1875_v11 }
0x134c   :  { %2159 = vmatprep.mubr.f32.mxu0 %v5161_v0  ;;  %v1769_v13 = vpop.permute.xlu1 %1768  ;;  %2120 = vmatpush1.msra.mxu0 %v1994_v49 }
0x134d   :  { %4534 = vmatmul.mubr.msk.f32.vlgmr.msra.gmra.mxu1 %vm148_vm1, %v1769_v13  ;;  %2121 = vmatprep.subr.mxu0 %v1993_v50 }
0x134e   :  { %2076 = vmatprep.mubr.f32.mxu1 %v5161_v0  ;;  %2122 = vmatpush1.msra.mxu0 %v1992_v52 }
0x134f   :  { %2123 = vmatprep.subr.mxu0 %v1991_v54 }
0x1350   :  { %2124 = vmatpush1.msra.mxu0 %v1990_v56 }
0x1351   :  { %2125 = vmatprep.subr.mxu0 %v1989_v57 }
0x1352   :  { %2126 = vmatpush1.msra.mxu0 %v1988_v59 }
0x1353   :  { %4558 = vmatprep.subr.mxu0 %v5161_v0 }
0x140b   :  { %v1944_v35 = vpop.f32.mrf.mxu0 }
0x140c   :  { %v1948_v19 = vadd.f32 %v1944_v35, %v5349_v29  ;;  %v5743_v35 = vld [vmem:[#allocation13 + $0x10] sm:$0xff] }
0x140d   :  { %v4546_v24 = vpop.f32.mrf.mxu0  ;;  %v1838_v25 = vpop.f32.mrf.mxu1 }
0x140e   :  { %4871 = vtanh.f32 %v1948_v19  ;;  %v1843_v26 = vrot.slane %v1838_v25, 2  ;;  %v4159_v31 = vmul.f32 -1.442695, %v1948_v19  ;;  %v5748_v24 = vld [vmem:[#allocation13 + $0x8] sm:$0xff] }
0x140f   :  { %v4535_v27 = vpop.f32.mrf.mxu1 }
0x1410   :  { %v1845_v28 = vadd.f32 %v1843_v26, %v5351_v32  ;;  %v5754_v26 = vld [vmem:[#allocation13] sm:$0xff] }
0x1412   :  { %4873 = vtanh.f32 %v1845_v28  ;;  %v4157_v33 = vmul.f32 -1.442695, %v1845_v28 }
0x1413   :  { %4875 = vpow2.f32 %v4159_v31  ;;  %v5764_v31 = vld [vmem:[#allocation11 + $0x18] sm:$0xff] }
0x1414   :  { %4877 = vpow2.f32 %v4157_v33 }
0x141b   :  { %v4872_v14 = vpop.eup %4871 }
0x141c   :  { %1961 = vrot.lane.b32.xlu0 %v4872_v14, %s5163_s2 }
0x141f   :  { %v4874_v15 = vpop.eup %4873 }
0x1420   :  { %1858 = vrot.lane.b32.xlu1 %v4874_v15, %s5163_s2  ;;  %v4876_v17 = vpop.eup %4875 }
0x1421   :  { %v1952_v29 = vadd.f32 1.0, %v4876_v17  ;;  %v4878_v34 = vpop.eup %4877  ;;  %v5767_v17 = vld [vmem:[#allocation11 + $0x10] sm:$0xff] }
0x1422   :  { %v1849_v37 = vadd.f32 1.0, %v4878_v34 }
0x1423   :  { %4879 = vrcp.f32 %v1952_v29  ;;  %v5772_v29 = vld [vmem:[#allocation11 + $0x8] sm:$0xff] }
0x1424   :  { %4881 = vrcp.f32 %v1849_v37 }
0x1430   :  { %v5645_v38 = vpop.eup %4879 }
0x1431   :  { %v5649_v18 = vpop.eup %4881  ;;  %v1959_v41 = vmul.f32 %v5645_v38, %v1957_v40 }
0x1432   :  { %v1856_v45 = vmul.f32 %v5649_v18, %v1854_v44 }
0x148e   :  { %v1962_v32 = vpop.permute.xlu0 %1961 }
0x148f   :  { %v1964_v5 = vmul.f32 %v5645_v38, %v1962_v32 }
0x1491   :  { %1966 = vrot.lane.b32.xlu0 %v1964_v5, %s5164_s23 }
0x1492   :  { %v1859_v7 = vpop.permute.xlu1 %1858 }
0x1493   :  { %v1861_v39 = vmul.f32 %v5649_v18, %v1859_v7 }
0x1495   :  { %1863 = vrot.lane.b32.xlu1 %v1861_v39, %s5164_s23 }
0x1503   :  { %v1967_v43 = vpop.permute.xlu0 %1966 }
0x1504   :  { %v1969_v9 = vadd.f32 %v1967_v43, %v1959_v41 }
0x1506   :  { %4883 = vtanh.f32 %v1969_v9 }
0x1507   :  { %v1864_v46 = vpop.permute.xlu1 %1863 }
0x1508   :  { %v1866_v12 = vadd.f32 %v1864_v46, %v1856_v45 }
0x150a   :  { %4885 = vtanh.f32 %v1866_v12 }
0x1513   :  { %v4884_v53 = vpop.eup %4883 }
0x1514   :  { %1972 = vrot.lane.b32.xlu0 %v4884_v53, %s5163_s2 }
0x1517   :  { %v4886_v60 = vpop.eup %4885 }
0x1518   :  { %658 = vrot.lane.b32.xlu0 %v5418_v58, %s5164_s23  ;;  %1869 = vrot.lane.b32.xlu1 %v4886_v60, %s5163_s2  ;;  %v2005_v58 = vld [vmem:[%s6184_s6 + $0x38] sm:$0xff] }
0x1519   :  { %2036 = vmatprep.subr.mxu1 %v2005_v58 }
0x151c   :  { %1101 = vrot.lane.b32.xlu0 %v5508_v42, %s5164_s23  ;;  %882 = vrot.lane.b32.xlu1 %v5464_v51, %s5164_s23  ;;  %v2003_v51 = vld [vmem:[%s6184_s6 + $0x28] sm:$0xff]  ;;  %v2000_v42 = vld [vmem:[%s6184_s6 + $0x10] sm:$0xff] }
0x1520   :  { %1541 = vrot.lane.b32.xlu0 %v5595_v16, %s5164_s23  ;;  %1322 = vrot.lane.b32.xlu1 %v5551_v30, %s5164_s23  ;;  %v1999_v30 = vld [vmem:[%s6184_s6 + $0x8] sm:$0xff]  ;;  %v1998_v16 = vld [vmem:[%s6184_s6] sm:$0xff] }
0x1524   :  { %664 = vrot.lane.b32.xlu0 %v5415_v55, %s5164_s23  ;;  %1763 = vrot.lane.b32.xlu1 %v5629_v6, %s5164_s23  ;;  %v2004_v55 = vld [vmem:[%s6184_s6 + $0x30] sm:$0xff] }
0x1525   :  { %2037 = vmatpush1.msra.mxu1 %v2004_v55 }
0x1526   :  { %2038 = vmatprep.subr.mxu1 %v2003_v51 }
0x1528   :  { %1536 = vrot.lane.b32.xlu0 %v5598_v22, %s5164_s23  ;;  %443 = vrot.lane.b32.xlu1 %v5371_v1, %s5164_s23  ;;  %v2002_v1 = vld [vmem:[%s6184_s6 + $0x20] sm:$0xff] }
0x1529   :  { %2039 = vmatpush1.msra.mxu1 %v2002_v1 }
0x152c   :  { %887 = vrot.lane.b32.xlu1 %v5461_v48, %s5164_s23  ;;  %v2001_v48 = vld [vmem:[%s6184_s6 + $0x18] sm:$0xff] }
0x152d   :  { %2040 = vmatprep.subr.mxu1 %v2001_v48 }
0x152e   :  { %2041 = vmatpush1.msra.mxu1 %v2000_v42 }
0x152f   :  { %2042 = vmatprep.subr.mxu1 %v1999_v30 }
0x1530   :  { %1758 = vrot.lane.b32.xlu1 %v5632_v36, %s5164_s23  ;;  %2043 = vmatpush1.msra.mxu1 %v1998_v16 }
0x1531   :  { %4547 = vmatprep.subr.mxu1 %v5161_v0 }
0x1586   :  { %v1973_v22 = vpop.permute.xlu0 %1972 }
0x1587   :  { %v1975_v61 = vmul.f32 %v5645_v38, %v1973_v22  ;;  %v5777_v38 = vld [vmem:[#allocation11] sm:$0xff] }
0x1589   :  { %1982 = vrot.lane.b32.xlu0 %v1975_v61, %s5164_s23 }
0x158a   :  { %v659_v62 = vpop.permute.xlu0 %658  ;;  %v1870_v63 = vpop.permute.xlu1 %1869 }
0x158b   :  { %662 = vst.msk [vmem:[#allocation2] sm:$0xc] %vm661_vm3, %v659_v62  ;;  %v1872_v2 = vmul.f32 %v5649_v18, %v1870_v63  ;;  %v2172_v18 = vld [vmem:[%s6185_s7] sm:$0x3] }
0x158c   :  { %v2181_v7 = vrot.slane %v2172_v18, %v144_v21  ;;  %v2177_v43 = vrot.slane %v2172_v18, %v140_v23 }
0x158d   :  { %1977 = vrot.lane.b32.xlu0 %v1872_v2, %s5164_s23 }
0x158e   :  { %v1102_v3 = vpop.permute.xlu0 %1101  ;;  %v883_v6 = vpop.permute.xlu1 %882 }
0x158f   :  { %1104 = vst.msk [vmem:[#allocation2] sm:$0xc0] %vm446_vm4, %v1102_v3 }
0x1590   :  { %885 = vst.msk [vmem:[#allocation2] sm:$0x30] %vm667_vm5, %v883_v6 }
0x1592   :  { %v1542_v4 = vpop.permute.xlu0 %1541  ;;  %v1323_v8 = vpop.permute.xlu1 %1322 }
0x1593   :  { %1544 = vst.msk [vmem:[#allocation3] sm:$0x30] %vm667_vm5, %v1542_v4 }
0x1594   :  { %1325 = vst.msk [vmem:[#allocation3] sm:$0xc0] %vm446_vm4, %v1323_v8 }
0x1596   :  { %v665_v36 = vpop.permute.xlu0 %664  ;;  %v1764_v11 = vpop.permute.xlu1 %1763 }
0x1597   :  { %668 = vst.msk [vmem:[#allocation3 + $0x8] sm:$0x30] %vm667_vm5, %v665_v36  ;;  %v1986_v13 = vld [vmem:[#allocation2] sm:$0xff] }
0x1598   :  { %1766 = vst.msk [vmem:[#allocation3] sm:$0xc] %vm661_vm3, %v1764_v11  ;;  %4162 = vmatmul.mubr.msk.f32.vlgmr.msra.gmra.mxu0 %vm148_vm1, %v1986_v13 }
0x1599   :  { %4559 = vmatpush3.msra.mxu0 %v5738_v10  ;;  %2165 = vmatprep.mubr.f32.mxu0 %v5161_v0 }
0x159a   :  { %v1537_v19 = vpop.permute.xlu0 %1536  ;;  %4560 = vmatprep.subr.mxu0 %v5161_v0  ;;  %v444_v25 = vpop.permute.xlu1 %443 }
0x159b   :  { %1539 = vst.msk [vmem:[#allocation2 + $0x8] sm:$0xc] %vm661_vm3, %v1537_v19  ;;  %4561 = vmatpush3.msra.mxu0 %v5743_v35 }
0x159c   :  { %447 = vst.msk [vmem:[#allocation3 + $0x8] sm:$0xc0] %vm446_vm4, %v444_v25  ;;  %4562 = vmatprep.subr.mxu0 %v5161_v0 }
0x159d   :  { %4563 = vmatpush3.msra.mxu0 %v5748_v24 }
0x159e   :  { %4564 = vmatprep.subr.mxu0 %v5161_v0  ;;  %v888_v27 = vpop.permute.xlu1 %887 }
0x159f   :  { %4565 = vmatpush3.msra.mxu0 %v5754_v26  ;;  %890 = vst.msk [vmem:[#allocation3 + $0x8] sm:$0xc] %vm661_vm3, %v888_v27 }
0x15a0   :  { %4580 = vmatprep.subr.mxu0 %v5161_v0 }
0x15a2   :  { %v1759_v28 = vpop.permute.xlu1 %1758 }
0x15a3   :  { %1761 = vst.msk [vmem:[#allocation2 + $0x8] sm:$0x30] %vm667_vm5, %v1759_v28 }
0x15a6   :  { %v1997_v34 = vld [vmem:[#allocation3 + $0x8] sm:$0xff] }
0x15fb   :  { %v1983_v14 = vpop.permute.xlu0 %1982 }
0x15fc   :  { %1985 = vst.msk [vmem:[#allocation3] sm:$0x3] %vm440_vm2, %v1983_v14 }
0x15ff   :  { %v1978_v15 = vpop.permute.xlu0 %1977 }
0x1600   :  { %1980 = vst.msk [vmem:[#allocation2 + $0x8] sm:$0xc0] %vm446_vm4, %v1978_v15 }
0x1603   :  { %v1996_v33 = vld [vmem:[#allocation3] sm:$0xff] }
0x1604   :  { %4160 = vmatmul.mubr.msk.f32.vlgmr.msra.gmra.mxu1 %vm148_vm1, %v1996_v33 }
0x1605   :  { %4548 = vmatpush3.msra.mxu1 %v5764_v31  ;;  %2082 = vmatprep.mubr.f32.mxu1 %v5161_v0 }
0x1606   :  { %4549 = vmatprep.subr.mxu1 %v5161_v0 }
0x1607   :  { %4550 = vmatpush3.msra.mxu1 %v5767_v17  ;;  %v1987_v37 = vld [vmem:[#allocation2 + $0x8] sm:$0xff] }
0x1608   :  { %4161 = vmatmul.mubr.msk.f32.gmra.mxu1 %vm148_vm1, %v1997_v34  ;;  %4551 = vmatprep.subr.mxu1 %v5161_v0 }
0x1609   :  { %4163 = vmatmul.mubr.msk.f32.gmra.mxu0 %vm148_vm1, %v1987_v37  ;;  %4552 = vmatpush3.msra.mxu1 %v5772_v29 }
0x160a   :  { %4553 = vmatprep.subr.mxu1 %v5161_v0  ;;  %4555 = vmatprep.mubr.msk.f32.mxu1 %vm5162_vm0, %v5161_v0 }
0x160b   :  { %4554 = vmatpush3.msra.mxu1 %v5777_v38  ;;  %4566 = vmatprep.mubr.msk.f32.mxu0 %vm5162_vm0, %v5161_v0 }
0x160c   :  { %4556 = vmatmul.mubr.f32.vlgmr.msra.gmra.mxu1 %v5161_v0  ;;  %4569 = vmatprep.subr.mxu1 %v5161_v0 }
0x160d   :  { %4567 = vmatmul.mubr.f32.vlgmr.msra.gmra.mxu0 %v5161_v0  ;;  %4570 = vmatpush3.msra.mxu1 %v5764_v31 }
0x160e   :  { %4571 = vmatprep.subr.mxu1 %v5161_v0  ;;  %4581 = vmatpush3.msra.mxu0 %v5738_v10 }
0x160f   :  { %4572 = vmatpush3.msra.mxu1 %v5767_v17  ;;  %4582 = vmatprep.subr.mxu0 %v5161_v0 }
0x1610   :  { %4573 = vmatprep.subr.mxu1 %v5161_v0  ;;  %4577 = vmatprep.mubr.msk.f32.mxu1 %vm5162_vm0, %v5161_v0 }
0x1611   :  { %4574 = vmatpush3.msra.mxu1 %v5772_v29  ;;  %4583 = vmatpush3.msra.mxu0 %v5743_v35 }
0x1612   :  { %4575 = vmatprep.subr.mxu1 %v5161_v0  ;;  %4584 = vmatprep.subr.mxu0 %v5161_v0 }
0x1613   :  { %4576 = vmatpush3.msra.mxu1 %v5777_v38  ;;  %4585 = vmatpush3.msra.mxu0 %v5748_v24 }
0x1614   :  { %4586 = vmatprep.subr.mxu0 %v5161_v0  ;;  %4588 = vmatprep.mubr.msk.f32.mxu0 %vm5162_vm0, %v5161_v0 }
0x1615   :  { %4587 = vmatpush3.msra.mxu0 %v5754_v26  ;;  %4591 = vmatprep.subr.mxu1 %v5161_v0 }
0x1616   :  { %4602 = vmatprep.subr.mxu0 %v5161_v0 }
0x1658   :  { %v2161_v32 = vpop.f32.mrf.mxu0 }
0x165a   :  { %v2163_v39 = vpop.f32.mrf.mxu0 }
0x16c4   :  { %v2078_v5 = vpop.f32.mrf.mxu1 }
0x16c5   :  { %v2162_v41 = vadd.f32 %v2161_v32, %v2078_v5 }
0x16c6   :  { %v2080_v40 = vpop.f32.mrf.mxu1 }
0x16c7   :  { %v2164_v9 = vadd.f32 %v2163_v39, %v2080_v40  ;;  %v5819_v49 = vadd.f32 %v2177_v43, %v2162_v41 }
0x16c8   :  { %v2084_v44 = vpop.f32.mrf.mxu1 }
0x16c9   :  { %v5817_v45 = vadd.f32 %v2181_v7, %v2164_v9  ;;  %v2167_v46 = vpop.f32.mrf.mxu0 }
0x16ca   :  { %v2168_v12 = vadd.f32 %v2167_v46, %v2084_v44  ;;  %v2086_v47 = vpop.f32.mrf.mxu1 }
0x16cb   :  { %v2169_v50 = vpop.f32.mrf.mxu0 }
0x16cc   :  { %v5821_v52 = vadd.f32 %v2177_v43, %v2168_v12  ;;  %v2170_v53 = vadd.f32 %v2169_v50, %v2086_v47  ;;  %v2262_v21 = vpop.f32.mrf.mxu1 }
0x16cd   :  { %v2266_v54 = vadd.f32 %v2262_v21, %v5819_v49  ;;  %v2357_v56 = vpop.f32.mrf.mxu0 }
0x16ce   :  { %v5824_v57 = vadd.f32 %v2181_v7, %v2170_v53  ;;  %v2362_v20 = vrot.slane %v2357_v56, 2  ;;  %v4557_v23 = vpop.f32.mrf.mxu1 }
0x16cf   :  { %4887 = vtanh.f32 %v2266_v54  ;;  %v4568_v59 = vpop.f32.mrf.mxu0  ;;  %v4164_v51 = vmul.f32 -1.442695, %v2266_v54 }
0x16d0   :  { %v2364_v60 = vadd.f32 %v2362_v20, %v5824_v57 }
0x16d2   :  { %4889 = vtanh.f32 %v2364_v60  ;;  %v4165_v1 = vmul.f32 -1.442695, %v2364_v60 }
0x16d3   :  { %4891 = vpow2.f32 %v4164_v51 }
0x16d4   :  { %4893 = vpow2.f32 %v4165_v1 }
0x16dc   :  { %v4888_v58 = vpop.eup %4887 }
0x16dd   :  { %2276 = vrot.lane.b32.xlu0 %v4888_v58, %s5163_s2 }
0x16df   :  { %v4890_v55 = vpop.eup %4889 }
0x16e0   :  { %2374 = vrot.lane.b32.xlu1 %v4890_v55, %s5163_s2  ;;  %v4892_v48 = vpop.eup %4891 }
0x16e1   :  { %v4894_v42 = vpop.eup %4893  ;;  %v2270_v30 = vadd.f32 1.0, %v4892_v48 }
0x16e2   :  { %v2368_v16 = vadd.f32 1.0, %v4894_v42 }
0x16e3   :  { %4895 = vrcp.f32 %v2270_v30 }
0x16e4   :  { %4897 = vrcp.f32 %v2368_v16 }
0x16f0   :  { %v4896_v22 = vpop.eup %4895 }
0x16f1   :  { %v4898_v63 = vpop.eup %4897  ;;  %v2274_v6 = vmul.f32 0.0, %v4896_v22 }
0x16f2   :  { %v2372_v36 = vmul.f32 0.0, %v4898_v63 }
0x174f   :  { %v2277_v61 = vpop.permute.xlu0 %2276 }
0x1750   :  { %v2279_v62 = vmul.f32 %v4896_v22, %v2277_v61 }
0x1752   :  { %v2375_v2 = vpop.permute.xlu1 %2374  ;;  %2281 = vrot.lane.b32.xlu0 %v2279_v62, %s5164_s23 }
0x1753   :  { %v2377_v3 = vmul.f32 %v4898_v63, %v2375_v2 }
0x1755   :  { %2379 = vrot.lane.b32.xlu1 %v2377_v3, %s5164_s23 }
0x17c4   :  { %v2282_v4 = vpop.permute.xlu0 %2281 }
0x17c5   :  { %v5831_v8 = vadd.f32 %v2282_v4, %v2274_v6 }
0x17c7   :  { %4899 = vtanh.f32 %v5831_v8  ;;  %v2380_v11 = vpop.permute.xlu1 %2379  ;;  %v2483_v58 = vrot.slane %v5831_v8, 6 }
0x17c8   :  { %v5834_v13 = vadd.f32 %v2380_v11, %v2372_v36 }
0x17ca   :  { %4901 = vtanh.f32 %v5834_v13  ;;  %v2589_v48 = vrot.slane %v5834_v13, 2 }
0x17d4   :  { %v4900_v19 = vpop.eup %4899 }
0x17d5   :  { %2287 = vrot.lane.b32.xlu0 %v4900_v19, %s5163_s2 }
0x17d7   :  { %v4902_v25 = vpop.eup %4901 }
0x17d8   :  { %2385 = vrot.lane.b32.xlu1 %v4902_v25, %s5163_s2 }
0x1847   :  { %v2288_v27 = vpop.permute.xlu0 %2287 }
0x1848   :  { %v2290_v28 = vmul.f32 %v4896_v22, %v2288_v27 }
0x184a   :  { %v2386_v14 = vpop.permute.xlu1 %2385  ;;  %2390 = vrot.lane.b32.xlu1 %v2290_v28, %s5164_s23 }
0x184b   :  { %v5840_v15 = vmul.f32 %v4898_v63, %v2386_v14 }
0x184d   :  { %v2502_v33 = vrot.slane %v5840_v15, 6 }
0x184f   :  { %2503 = vrot.lane.b32.xlu0 %v2502_v33, %s5164_s23 }
0x18bc   :  { %v2391_v34 = vpop.permute.xlu1 %2390 }
0x18bd   :  { %2393 = vst.msk [vmem:[#allocation4] sm:$0x3] %vm440_vm2, %v2391_v34  ;;  %4578 = vmatmul.mubr.msk.f32.vlgmr.msra.gmra.mxu1 %vm148_vm1, %v2391_v34 }
0x18be   :  { %4592 = vmatpush3.msra.mxu1 %v5764_v31  ;;  %4599 = vmatprep.mubr.msk.f32.mxu1 %vm5162_vm0, %v5161_v0 }
0x18bf   :  { %4593 = vmatprep.subr.mxu1 %v5161_v0 }
0x18c0   :  { %4594 = vmatpush3.msra.mxu1 %v5767_v17 }
0x18c1   :  { %v2504_v37 = vpop.permute.xlu0 %2503  ;;  %4595 = vmatprep.subr.mxu1 %v5161_v0 }
0x18c2   :  { %4589 = vmatmul.mubr.msk.f32.vlgmr.msra.gmra.mxu0 %vm148_vm1, %v2504_v37  ;;  %4596 = vmatpush3.msra.mxu1 %v5772_v29 }
0x18c3   :  { %4603 = vmatpush3.msra.mxu0 %v5738_v10  ;;  %4597 = vmatprep.subr.mxu1 %v5161_v0 }
0x18c4   :  { %4604 = vmatprep.subr.mxu0 %v5161_v0  ;;  %4598 = vmatpush3.msra.mxu1 %v5777_v38 }
0x18c5   :  { %4605 = vmatpush3.msra.mxu0 %v5743_v35  ;;  %4610 = vmatprep.mubr.msk.f32.mxu0 %vm5162_vm0, %v5161_v0 }
0x18c6   :  { %4606 = vmatprep.subr.mxu0 %v5161_v0  ;;  %4613 = vmatprep.subr.mxu1 %v5161_v0 }
0x18c7   :  { %4607 = vmatpush3.msra.mxu0 %v5748_v24 }
0x18c8   :  { %4608 = vmatprep.subr.mxu0 %v5161_v0 }
0x18c9   :  { %4609 = vmatpush3.msra.mxu0 %v5754_v26 }
0x18ca   :  { %4624 = vmatprep.subr.mxu0 %v5161_v0 }
0x197d   :  { %v2467_v32 = vpop.f32.mrf.mxu1 }
0x197e   :  { %v2472_v5 = vrot.slane %v2467_v32, 6 }
0x197f   :  { %v4579_v18 = vpop.f32.mrf.mxu1 }
0x1980   :  { %v2474_v7 = vadd.f32 %v2472_v5, %v5819_v49 }
0x1982   :  { %4903 = vtanh.f32 %v2474_v7  ;;  %v2573_v39 = vpop.f32.mrf.mxu0  ;;  %v4167_v46 = vmul.f32 -1.442695, %v2474_v7 }
0x1983   :  { %v2578_v40 = vrot.slane %v2573_v39, 4 }
0x1984   :  { %v4590_v41 = vpop.f32.mrf.mxu0 }
0x1985   :  { %v2580_v43 = vadd.f32 %v2578_v40, %v5824_v57 }
0x1987   :  { %4905 = vtanh.f32 %v2580_v43  ;;  %v4169_v12 = vmul.f32 -1.442695, %v2580_v43 }
0x1988   :  { %4907 = vpow2.f32 %v4167_v46 }
0x1989   :  { %4909 = vpow2.f32 %v4169_v12 }
0x198f   :  { %v4904_v9 = vpop.eup %4903 }
0x1990   :  { %2487 = vrot.lane.b32.xlu1 %v4904_v9, %s5163_s2 }
0x1994   :  { %v4906_v44 = vpop.eup %4905 }
0x1995   :  { %2593 = vrot.lane.b32.xlu0 %v4906_v44, %s5163_s2  ;;  %v4908_v47 = vpop.eup %4907 }
0x1996   :  { %v2478_v50 = vadd.f32 1.0, %v4908_v47  ;;  %v4910_v53 = vpop.eup %4909 }
0x1997   :  { %v2584_v21 = vadd.f32 1.0, %v4910_v53 }
0x1998   :  { %4911 = vrcp.f32 %v2478_v50 }
0x1999   :  { %4913 = vrcp.f32 %v2584_v21 }
0x19a5   :  { %v4912_v54 = vpop.eup %4911 }
0x19a6   :  { %v4914_v23 = vpop.eup %4913  ;;  %v2485_v55 = vmul.f32 %v4912_v54, %v2483_v58 }
0x19a7   :  { %v2591_v42 = vmul.f32 %v4914_v23, %v2589_v48 }
0x1a02   :  { %v2488_v56 = vpop.permute.xlu1 %2487 }
0x1a03   :  { %v2490_v20 = vmul.f32 %v4912_v54, %v2488_v56 }
0x1a05   :  { %2492 = vrot.lane.b32.xlu1 %v2490_v20, %s5164_s23 }
0x1a07   :  { %v2594_v59 = vpop.permute.xlu0 %2593 }
0x1a08   :  { %v2596_v60 = vmul.f32 %v4914_v23, %v2594_v59 }
0x1a0a   :  { %2598 = vrot.lane.b32.xlu0 %v2596_v60, %s5164_s23 }
0x1a77   :  { %v2493_v51 = vpop.permute.xlu1 %2492 }
0x1a78   :  { %v5874_v1 = vadd.f32 %v2493_v51, %v2485_v55 }
0x1a7a   :  { %4915 = vtanh.f32 %v5874_v1  ;;  %v2705_v47 = vrot.slane %v5874_v1, 6 }
0x1a7c   :  { %v2599_v30 = vpop.permute.xlu0 %2598 }
0x1a7d   :  { %v5878_v16 = vadd.f32 %v2599_v30, %v2591_v42 }
0x1a7f   :  { %4917 = vtanh.f32 %v5878_v16 }
0x1a87   :  { %v4916_v22 = vpop.eup %4915 }
0x1a88   :  { %2498 = vrot.lane.b32.xlu1 %v4916_v22, %s5163_s2 }
0x1a8c   :  { %v4918_v61 = vpop.eup %4917 }
0x1a8d   :  { %2604 = vrot.lane.b32.xlu0 %v4918_v61, %s5163_s2 }
0x1afa   :  { %v2499_v62 = vpop.permute.xlu1 %2498 }
0x1afb   :  { %v5883_v63 = vmul.f32 %v4912_v54, %v2499_v62  ;;  %v2811_v54 = vrot.slane %v5878_v16, 2 }
0x1afd   :  { %v2618_v2 = vrot.slane %v5883_v63, 2 }
0x1aff   :  { %v2605_v3 = vpop.permute.xlu0 %2604  ;;  %2619 = vrot.lane.b32.xlu1 %v2618_v2, %s5164_s23 }
0x1b00   :  { %v5887_v6 = vmul.f32 %v4914_v23, %v2605_v3 }
0x1b02   :  { %v2724_v4 = vrot.slane %v5887_v6, 4 }
0x1b04   :  { %2725 = vrot.lane.b32.xlu0 %v2724_v4, %s5164_s23 }
0x1b71   :  { %v2620_v8 = vpop.permute.xlu1 %2619 }
0x1b72   :  { %4600 = vmatmul.mubr.msk.f32.vlgmr.msra.gmra.mxu1 %vm148_vm1, %v2620_v8 }
0x1b73   :  { %4614 = vmatpush3.msra.mxu1 %v5764_v31  ;;  %4621 = vmatprep.mubr.msk.f32.mxu1 %vm5162_vm0, %v5161_v0 }
0x1b74   :  { %4615 = vmatprep.subr.mxu1 %v5161_v0 }
0x1b75   :  { %4616 = vmatpush3.msra.mxu1 %v5767_v17 }
0x1b76   :  { %v2726_v36 = vpop.permute.xlu0 %2725  ;;  %4617 = vmatprep.subr.mxu1 %v5161_v0 }
0x1b77   :  { %4611 = vmatmul.mubr.msk.f32.vlgmr.msra.gmra.mxu0 %vm148_vm1, %v2726_v36  ;;  %4618 = vmatpush3.msra.mxu1 %v5772_v29 }
0x1b78   :  { %4625 = vmatpush3.msra.mxu0 %v5738_v10  ;;  %4619 = vmatprep.subr.mxu1 %v5161_v0 }
0x1b79   :  { %4626 = vmatprep.subr.mxu0 %v5161_v0  ;;  %4620 = vmatpush3.msra.mxu1 %v5777_v38 }
0x1b7a   :  { %4627 = vmatpush3.msra.mxu0 %v5743_v35  ;;  %4632 = vmatprep.mubr.msk.f32.mxu0 %vm5162_vm0, %v5161_v0 }
0x1b7b   :  { %4628 = vmatprep.subr.mxu0 %v5161_v0  ;;  %4635 = vmatprep.subr.mxu1 %v5161_v0 }
0x1b7c   :  { %4629 = vmatpush3.msra.mxu0 %v5748_v24 }
0x1b7d   :  { %4630 = vmatprep.subr.mxu0 %v5161_v0 }
0x1b7e   :  { %4631 = vmatpush3.msra.mxu0 %v5754_v26 }
0x1b7f   :  { %4646 = vmatprep.subr.mxu0 %v5161_v0 }
0x1c32   :  { %v2689_v11 = vpop.f32.mrf.mxu1 }
0x1c33   :  { %v2694_v13 = vrot.slane %v2689_v11, 4 }
0x1c34   :  { %v4601_v19 = vpop.f32.mrf.mxu1 }
0x1c35   :  { %v2696_v25 = vadd.f32 %v2694_v13, %v5819_v49 }
0x1c37   :  { %4919 = vtanh.f32 %v2696_v25  ;;  %v2795_v27 = vpop.f32.mrf.mxu0  ;;  %v4171_v32 = vmul.f32 -1.442695, %v2696_v25 }
0x1c38   :  { %v2800_v28 = vrot.slane %v2795_v27, 6 }
0x1c39   :  { %v4612_v14 = vpop.f32.mrf.mxu0 }
0x1c3a   :  { %v2802_v33 = vadd.f32 %v2800_v28, %v5824_v57 }
0x1c3c   :  { %4921 = vtanh.f32 %v2802_v33  ;;  %v4173_v5 = vmul.f32 -1.442695, %v2802_v33 }
0x1c3d   :  { %4923 = vpow2.f32 %v4171_v32 }
0x1c3e   :  { %4925 = vpow2.f32 %v4173_v5 }
0x1c44   :  { %v4920_v34 = vpop.eup %4919 }
0x1c45   :  { %2709 = vrot.lane.b32.xlu1 %v4920_v34, %s5163_s2 }
0x1c49   :  { %v4922_v37 = vpop.eup %4921 }
0x1c4a   :  { %2815 = vrot.lane.b32.xlu0 %v4922_v37, %s5163_s2  ;;  %v4924_v18 = vpop.eup %4923 }
0x1c4b   :  { %v2700_v7 = vadd.f32 1.0, %v4924_v18  ;;  %v4926_v39 = vpop.eup %4925 }
0x1c4c   :  { %v2806_v40 = vadd.f32 1.0, %v4926_v39 }
0x1c4d   :  { %4927 = vrcp.f32 %v2700_v7 }
0x1c4e   :  { %4929 = vrcp.f32 %v2806_v40 }
0x1c5a   :  { %v4928_v41 = vpop.eup %4927 }
0x1c5b   :  { %v4930_v44 = vpop.eup %4929  ;;  %v2707_v50 = vmul.f32 %v4928_v41, %v2705_v47 }
0x1c5c   :  { %v2813_v56 = vmul.f32 %v4930_v44, %v2811_v54 }
0x1cb7   :  { %v2710_v43 = vpop.permute.xlu1 %2709 }
0x1cb8   :  { %v2712_v9 = vmul.f32 %v4928_v41, %v2710_v43 }
0x1cba   :  { %2714 = vrot.lane.b32.xlu1 %v2712_v9, %s5164_s23 }
0x1cbc   :  { %v2816_v46 = vpop.permute.xlu0 %2815 }
0x1cbd   :  { %v2818_v12 = vmul.f32 %v4930_v44, %v2816_v46 }
0x1cbf   :  { %2820 = vrot.lane.b32.xlu0 %v2818_v12, %s5164_s23 }
0x1d2c   :  { %v2715_v53 = vpop.permute.xlu1 %2714 }
0x1d2d   :  { %v5920_v21 = vadd.f32 %v2715_v53, %v2707_v50 }
0x1d2f   :  { %4931 = vtanh.f32 %v5920_v21  ;;  %v2927_v5 = vrot.slane %v5920_v21, 6 }
0x1d31   :  { %v2821_v20 = vpop.permute.xlu0 %2820 }
0x1d32   :  { %v5924_v23 = vadd.f32 %v2821_v20, %v2813_v56 }
0x1d34   :  { %4933 = vtanh.f32 %v5924_v23  ;;  %v3030_v7 = vrot.slane %v5924_v23, 2 }
0x1d3c   :  { %v4932_v59 = vpop.eup %4931 }
0x1d3d   :  { %2720 = vrot.lane.b32.xlu1 %v4932_v59, %s5163_s2 }
0x1d41   :  { %v4934_v60 = vpop.eup %4933 }
0x1d42   :  { %2826 = vrot.lane.b32.xlu0 %v4934_v60, %s5163_s2 }
0x1daf   :  { %v2721_v58 = vpop.permute.xlu1 %2720 }
0x1db0   :  { %v5929_v55 = vmul.f32 %v4928_v41, %v2721_v58 }
0x1db2   :  { %v2840_v51 = vrot.slane %v5929_v55, 4 }
0x1db4   :  { %v2827_v1 = vpop.permute.xlu0 %2826  ;;  %2841 = vrot.lane.b32.xlu1 %v2840_v51, %s5164_s23 }
0x1db5   :  { %v5933_v48 = vmul.f32 %v4930_v44, %v2827_v1 }
0x1db7   :  { %v2946_v42 = vrot.slane %v5933_v48, 2 }
0x1db9   :  { %2947 = vrot.lane.b32.xlu0 %v2946_v42, %s5164_s23 }
0x1e26   :  { %v2842_v30 = vpop.permute.xlu1 %2841 }
0x1e27   :  { %4622 = vmatmul.mubr.msk.f32.vlgmr.msra.gmra.mxu1 %vm148_vm1, %v2842_v30 }
0x1e28   :  { %4636 = vmatpush3.msra.mxu1 %v5764_v31  ;;  %4643 = vmatprep.mubr.msk.f32.mxu1 %vm5162_vm0, %v5161_v0 }
0x1e29   :  { %4637 = vmatprep.subr.mxu1 %v5161_v0 }
0x1e2a   :  { %4638 = vmatpush3.msra.mxu1 %v5767_v17 }
0x1e2b   :  { %v2948_v16 = vpop.permute.xlu0 %2947  ;;  %4639 = vmatprep.subr.mxu1 %v5161_v0 }
0x1e2c   :  { %4633 = vmatmul.mubr.msk.f32.vlgmr.msra.gmra.mxu0 %vm148_vm1, %v2948_v16  ;;  %4640 = vmatpush3.msra.mxu1 %v5772_v29 }
0x1e2d   :  { %4647 = vmatpush3.msra.mxu0 %v5738_v10  ;;  %4641 = vmatprep.subr.mxu1 %v5161_v0 }
0x1e2e   :  { %4648 = vmatprep.subr.mxu0 %v5161_v0  ;;  %4642 = vmatpush3.msra.mxu1 %v5777_v38 }
0x1e2f   :  { %4649 = vmatpush3.msra.mxu0 %v5743_v35  ;;  %4654 = vmatprep.mubr.msk.f32.mxu0 %vm5162_vm0, %v5161_v0 }
0x1e30   :  { %4650 = vmatprep.subr.mxu0 %v5161_v0  ;;  %4657 = vmatprep.subr.mxu1 %v5161_v0 }
0x1e31   :  { %4651 = vmatpush3.msra.mxu0 %v5748_v24 }
0x1e32   :  { %4652 = vmatprep.subr.mxu0 %v5161_v0 }
0x1e33   :  { %4653 = vmatpush3.msra.mxu0 %v5754_v26 }
0x1e34   :  { %4668 = vmatprep.subr.mxu0 %v5161_v0 }
0x1ee7   :  { %v2911_v22 = vpop.f32.mrf.mxu1 }
0x1ee8   :  { %v2916_v61 = vrot.slane %v2911_v22, 2 }
0x1ee9   :  { %v4623_v62 = vpop.f32.mrf.mxu1 }
0x1eea   :  { %v2918_v2 = vadd.f32 %v2916_v61, %v5819_v49 }
0x1eec   :  { %4935 = vtanh.f32 %v2918_v2  ;;  %v3017_v3 = vpop.f32.mrf.mxu0  ;;  %v4175_v13 = vmul.f32 -1.442695, %v2918_v2 }
0x1eed   :  { %v3021_v4 = vadd.f32 %v3017_v3, %v5824_v57 }
0x1eee   :  { %v4634_v8 = vpop.f32.mrf.mxu0 }
0x1eef   :  { %4937 = vtanh.f32 %v3021_v4  ;;  %v4177_v19 = vmul.f32 -1.442695, %v3021_v4 }
0x1ef0   :  { %4939 = vpow2.f32 %v4175_v13 }
0x1ef1   :  { %4941 = vpow2.f32 %v4177_v19 }
0x1ef9   :  { %v4936_v36 = vpop.eup %4935 }
0x1efa   :  { %2931 = vrot.lane.b32.xlu0 %v4936_v36, %s5163_s2 }
0x1efc   :  { %v4938_v11 = vpop.eup %4937 }
0x1efd   :  { %3034 = vrot.lane.b32.xlu1 %v4938_v11, %s5163_s2  ;;  %v4940_v25 = vpop.eup %4939 }
0x1efe   :  { %v4942_v27 = vpop.eup %4941  ;;  %v2922_v28 = vadd.f32 1.0, %v4940_v25 }
0x1eff   :  { %v3025_v49 = vadd.f32 1.0, %v4942_v27 }
0x1f00   :  { %4943 = vrcp.f32 %v2922_v28 }
0x1f01   :  { %4945 = vrcp.f32 %v3025_v49 }
0x1f0d   :  { %v4944_v14 = vpop.eup %4943 }
0x1f0e   :  { %v4946_v34 = vpop.eup %4945  ;;  %v2929_v18 = vmul.f32 %v4944_v14, %v2927_v5 }
0x1f0f   :  { %v3032_v41 = vmul.f32 %v4946_v34, %v3030_v7 }
0x1f6c   :  { %v2932_v57 = vpop.permute.xlu0 %2931 }
0x1f6d   :  { %v2934_v33 = vmul.f32 %v4944_v14, %v2932_v57 }
0x1f6f   :  { %v3035_v37 = vpop.permute.xlu1 %3034  ;;  %2936 = vrot.lane.b32.xlu0 %v2934_v33, %s5164_s23 }
0x1f70   :  { %v3037_v32 = vmul.f32 %v4946_v34, %v3035_v37 }
0x1f72   :  { %3039 = vrot.lane.b32.xlu1 %v3037_v32, %s5164_s23 }
0x1fe1   :  { %v2937_v39 = vpop.permute.xlu0 %2936 }
0x1fe2   :  { %v5967_v40 = vadd.f32 %v2937_v39, %v2929_v18 }
0x1fe4   :  { %4947 = vtanh.f32 %v5967_v40  ;;  %v3040_v43 = vpop.permute.xlu1 %3039  ;;  %v3143_v25 = vrot.slane %v5967_v40, 6 }
0x1fe5   :  { %v5970_v9 = vadd.f32 %v3040_v43, %v3032_v41 }
0x1fe7   :  { %4949 = vtanh.f32 %v5970_v9  ;;  %v3246_v28 = vrot.slane %v5970_v9, 2 }
0x1ff1   :  { %v4948_v44 = vpop.eup %4947 }
0x1ff2   :  { %2942 = vrot.lane.b32.xlu0 %v4948_v44, %s5163_s2 }
0x1ff4   :  { %v4950_v46 = vpop.eup %4949 }
0x1ff5   :  { %3045 = vrot.lane.b32.xlu1 %v4950_v46, %s5163_s2 }
0x2064   :  { %v2943_v12 = vpop.permute.xlu0 %2942 }
0x2065   :  { %v5975_v47 = vmul.f32 %v4944_v14, %v2943_v12 }
0x2067   :  { %v3059_v50 = vrot.slane %v5975_v47, 6  ;;  %v3046_v53 = vpop.permute.xlu1 %3045 }
0x2068   :  { %v3048_v21 = vmul.f32 %v4946_v34, %v3046_v53 }
0x2069   :  { %3060 = vrot.lane.b32.xlu0 %v3059_v50, %s5164_s23 }
0x206a   :  { %3055 = vrot.lane.b32.xlu1 %v3048_v21, %s5164_s23 }
0x20db   :  { %v3061_v54 = vpop.permute.xlu0 %3060 }
0x20dc   :  { %v3056_v56 = vpop.permute.xlu1 %3055  ;;  %4644 = vmatmul.mubr.msk.f32.vlgmr.msra.gmra.mxu1 %vm148_vm1, %v3061_v54 }
0x20dd   :  { %3058 = vst.msk [vmem:[#allocation5 + $0x8] sm:$0x3] %vm440_vm2, %v3056_v56  ;;  %4655 = vmatmul.mubr.msk.f32.vlgmr.msra.gmra.mxu0 %vm148_vm1, %v3056_v56  ;;  %4658 = vmatpush3.msra.mxu1 %v5764_v31 }
0x20de   :  { %4659 = vmatprep.subr.mxu1 %v5161_v0  ;;  %4669 = vmatpush3.msra.mxu0 %v5738_v10 }
0x20df   :  { %4660 = vmatpush3.msra.mxu1 %v5767_v17  ;;  %4670 = vmatprep.subr.mxu0 %v5161_v0 }
0x20e0   :  { %4661 = vmatprep.subr.mxu1 %v5161_v0  ;;  %4665 = vmatprep.mubr.msk.f32.mxu1 %vm5162_vm0, %v5161_v0 }
0x20e1   :  { %4662 = vmatpush3.msra.mxu1 %v5772_v29  ;;  %4671 = vmatpush3.msra.mxu0 %v5743_v35 }
0x20e2   :  { %4663 = vmatprep.subr.mxu1 %v5161_v0  ;;  %4672 = vmatprep.subr.mxu0 %v5161_v0 }
0x20e3   :  { %4664 = vmatpush3.msra.mxu1 %v5777_v38  ;;  %4673 = vmatpush3.msra.mxu0 %v5748_v24 }
0x20e4   :  { %4674 = vmatprep.subr.mxu0 %v5161_v0  ;;  %4676 = vmatprep.mubr.msk.f32.mxu0 %vm5162_vm0, %v5161_v0 }
0x20e5   :  { %4675 = vmatpush3.msra.mxu0 %v5754_v26  ;;  %4679 = vmatprep.subr.mxu1 %v5161_v0 }
0x20e6   :  { %4690 = vmatprep.subr.mxu0 %v5161_v0 }
0x219c   :  { %v3130_v20 = vpop.f32.mrf.mxu1 }
0x219d   :  { %v3134_v23 = vadd.f32 %v3130_v20, %v5821_v52  ;;  %v3230_v59 = vpop.f32.mrf.mxu0 }
0x219e   :  { %v3235_v60 = vrot.slane %v3230_v59, 2  ;;  %v4645_v58 = vpop.f32.mrf.mxu1 }
0x219f   :  { %4951 = vtanh.f32 %v3134_v23  ;;  %v4656_v51 = vpop.f32.mrf.mxu0  ;;  %v4179_v16 = vmul.f32 -1.442695, %v3134_v23 }
0x21a0   :  { %v3237_v1 = vadd.f32 %v3235_v60, %v5817_v45 }
0x21a2   :  { %4953 = vtanh.f32 %v3237_v1  ;;  %v4181_v22 = vmul.f32 -1.442695, %v3237_v1 }
0x21a3   :  { %4955 = vpow2.f32 %v4179_v16 }
0x21a4   :  { %4957 = vpow2.f32 %v4181_v22 }
0x21ac   :  { %v4952_v42 = vpop.eup %4951 }
0x21ad   :  { %3147 = vrot.lane.b32.xlu0 %v4952_v42, %s5163_s2 }
0x21af   :  { %v4954_v30 = vpop.eup %4953 }
0x21b0   :  { %3250 = vrot.lane.b32.xlu1 %v4954_v30, %s5163_s2  ;;  %v4956_v61 = vpop.eup %4955 }
0x21b1   :  { %v4958_v62 = vpop.eup %4957  ;;  %v3138_v2 = vadd.f32 1.0, %v4956_v61 }
0x21b2   :  { %v3241_v3 = vadd.f32 1.0, %v4958_v62 }
0x21b3   :  { %4959 = vrcp.f32 %v3138_v2 }
0x21b4   :  { %4961 = vrcp.f32 %v3241_v3 }
0x21c0   :  { %v4960_v4 = vpop.eup %4959 }
0x21c1   :  { %v4962_v11 = vpop.eup %4961  ;;  %v3145_v27 = vmul.f32 %v4960_v4, %v3143_v25 }
0x21c2   :  { %v3248_v57 = vmul.f32 %v4962_v11, %v3246_v28 }
0x221f   :  { %v3148_v8 = vpop.permute.xlu0 %3147 }
0x2220   :  { %v3150_v36 = vmul.f32 %v4960_v4, %v3148_v8 }
0x2222   :  { %v3251_v13 = vpop.permute.xlu1 %3250  ;;  %3152 = vrot.lane.b32.xlu0 %v3150_v36, %s5164_s23 }
0x2223   :  { %v3253_v19 = vmul.f32 %v4962_v11, %v3251_v13 }
0x2225   :  { %3255 = vrot.lane.b32.xlu1 %v3253_v19, %s5164_s23 }
0x2294   :  { %v3153_v49 = vpop.permute.xlu0 %3152 }
0x2295   :  { %v6011_v14 = vadd.f32 %v3153_v49, %v3145_v27 }
0x2297   :  { %4963 = vtanh.f32 %v6011_v14  ;;  %v3256_v33 = vpop.permute.xlu1 %3255  ;;  %v3359_v16 = vrot.slane %v6011_v14, 6 }
0x2298   :  { %v6014_v34 = vadd.f32 %v3256_v33, %v3248_v57  ;;  %v5019_v33 = vld [vmem:[#allocation13 + $0x18] sm:$0xff] }
0x229a   :  { %4965 = vtanh.f32 %v6014_v34  ;;  %v3465_v2 = vrot.slane %v6014_v34, 2 }
0x22a4   :  { %v4964_v37 = vpop.eup %4963 }
0x22a5   :  { %3158 = vrot.lane.b32.xlu0 %v4964_v37, %s5163_s2 }
0x22a7   :  { %v4966_v32 = vpop.eup %4965 }
0x22a8   :  { %3261 = vrot.lane.b32.xlu1 %v4966_v32, %s5163_s2 }
0x2317   :  { %v3159_v5 = vpop.permute.xlu0 %3158 }
0x2318   :  { %v3161_v18 = vmul.f32 %v4960_v4, %v3159_v5 }
0x231a   :  { %v3262_v7 = vpop.permute.xlu1 %3261  ;;  %3266 = vrot.lane.b32.xlu1 %v3161_v18, %s5164_s23 }
0x231b   :  { %v6020_v39 = vmul.f32 %v4962_v11, %v3262_v7 }
0x231d   :  { %v3378_v40 = vrot.slane %v6020_v39, 6 }
0x231f   :  { %3379 = vrot.lane.b32.xlu0 %v3378_v40, %s5164_s23 }
0x238c   :  { %v3267_v41 = vpop.permute.xlu1 %3266 }
0x238d   :  { %3269 = vst.msk [vmem:[#allocation4 + $0x8] sm:$0x3] %vm440_vm2, %v3267_v41  ;;  %4666 = vmatmul.mubr.msk.f32.vlgmr.msra.gmra.mxu1 %vm148_vm1, %v3267_v41 }
0x238e   :  { %4680 = vmatpush3.msra.mxu1 %v5764_v31  ;;  %4687 = vmatprep.mubr.msk.f32.mxu1 %vm5162_vm0, %v5161_v0 }
0x238f   :  { %4681 = vmatprep.subr.mxu1 %v5161_v0 }
0x2390   :  { %4682 = vmatpush3.msra.mxu1 %v5767_v17 }
0x2391   :  { %v3380_v43 = vpop.permute.xlu0 %3379  ;;  %4683 = vmatprep.subr.mxu1 %v5161_v0 }
0x2392   :  { %4677 = vmatmul.mubr.msk.f32.vlgmr.msra.gmra.mxu0 %vm148_vm1, %v3380_v43  ;;  %4684 = vmatpush3.msra.mxu1 %v5772_v29 }
0x2393   :  { %4691 = vmatpush3.msra.mxu0 %v5738_v10  ;;  %4685 = vmatprep.subr.mxu1 %v5161_v0 }
0x2394   :  { %4692 = vmatprep.subr.mxu0 %v5161_v0  ;;  %4686 = vmatpush3.msra.mxu1 %v5777_v38 }
0x2395   :  { %4693 = vmatpush3.msra.mxu0 %v5743_v35  ;;  %4698 = vmatprep.mubr.msk.f32.mxu0 %vm5162_vm0, %v5161_v0 }
0x2396   :  { %4694 = vmatprep.subr.mxu0 %v5161_v0  ;;  %4701 = vmatprep.subr.mxu1 %v5161_v0 }
0x2397   :  { %4695 = vmatpush3.msra.mxu0 %v5748_v24 }
0x2398   :  { %4696 = vmatprep.subr.mxu0 %v5161_v0 }
0x2399   :  { %4697 = vmatpush3.msra.mxu0 %v5754_v26 }
0x239a   :  { %4712 = vmatprep.subr.mxu0 %v5161_v0 }
0x244d   :  { %v3343_v10 = vpop.f32.mrf.mxu1 }
0x244e   :  { %v3348_v9 = vrot.slane %v3343_v10, 6 }
0x244f   :  { %v4667_v44 = vpop.f32.mrf.mxu1 }
0x2450   :  { %v3350_v35 = vadd.f32 %v3348_v9, %v5821_v52 }
0x2452   :  { %4967 = vtanh.f32 %v3350_v35  ;;  %v3449_v46 = vpop.f32.mrf.mxu0  ;;  %v4183_v26 = vmul.f32 -1.442695, %v3350_v35 }
0x2453   :  { %v3454_v12 = vrot.slane %v3449_v46, 4 }
0x2454   :  { %v4678_v50 = vpop.f32.mrf.mxu0 }
0x2455   :  { %v3456_v53 = vadd.f32 %v3454_v12, %v5817_v45 }
0x2457   :  { %4969 = vtanh.f32 %v3456_v53  ;;  %v4185_v54 = vmul.f32 -1.442695, %v3456_v53 }
0x2458   :  { %4971 = vpow2.f32 %v4183_v26 }
0x2459   :  { %4973 = vpow2.f32 %v4185_v54 }
0x245f   :  { %v4968_v21 = vpop.eup %4967 }
0x2460   :  { %3363 = vrot.lane.b32.xlu1 %v4968_v21, %s5163_s2 }
0x2464   :  { %v4970_v24 = vpop.eup %4969 }
0x2465   :  { %3469 = vrot.lane.b32.xlu0 %v4970_v24, %s5163_s2  ;;  %v4972_v56 = vpop.eup %4971 }
0x2466   :  { %v3354_v20 = vadd.f32 1.0, %v4972_v56  ;;  %v4974_v23 = vpop.eup %4973 }
0x2467   :  { %v3460_v59 = vadd.f32 1.0, %v4974_v23 }
0x2468   :  { %4975 = vrcp.f32 %v3354_v20 }
0x2469   :  { %4977 = vrcp.f32 %v3460_v59 }
0x2475   :  { %v4976_v60 = vpop.eup %4975 }
0x2476   :  { %v4978_v1 = vpop.eup %4977  ;;  %v3361_v22 = vmul.f32 %v4976_v60, %v3359_v16 }
0x2477   :  { %v3467_v3 = vmul.f32 %v4978_v1, %v3465_v2 }
0x24d2   :  { %v3364_v58 = vpop.permute.xlu1 %3363 }
0x24d3   :  { %v3366_v51 = vmul.f32 %v4976_v60, %v3364_v58 }
0x24d5   :  { %3368 = vrot.lane.b32.xlu1 %v3366_v51, %s5164_s23 }
0x24d7   :  { %v3470_v42 = vpop.permute.xlu0 %3469 }
0x24d8   :  { %v3472_v30 = vmul.f32 %v4978_v1, %v3470_v42 }
0x24da   :  { %3474 = vrot.lane.b32.xlu0 %v3472_v30, %s5164_s23 }
0x2547   :  { %v3369_v61 = vpop.permute.xlu1 %3368 }
0x2548   :  { %v6054_v62 = vadd.f32 %v3369_v61, %v3361_v22 }
0x254a   :  { %4979 = vtanh.f32 %v6054_v62  ;;  %v3581_v54 = vrot.slane %v6054_v62, 6 }
0x254c   :  { %v3475_v4 = vpop.permute.xlu0 %3474 }
0x254d   :  { %v6058_v8 = vadd.f32 %v3475_v4, %v3467_v3 }
0x254f   :  { %4981 = vtanh.f32 %v6058_v8  ;;  %v3687_v59 = vrot.slane %v6058_v8, 2 }
0x2557   :  { %v4980_v36 = vpop.eup %4979 }
0x2558   :  { %3374 = vrot.lane.b32.xlu1 %v4980_v36, %s5163_s2 }
0x255c   :  { %v4982_v11 = vpop.eup %4981 }
0x255d   :  { %3480 = vrot.lane.b32.xlu0 %v4982_v11, %s5163_s2 }
0x25ca   :  { %v3375_v13 = vpop.permute.xlu1 %3374 }
0x25cb   :  { %v6063_v19 = vmul.f32 %v4976_v60, %v3375_v13 }
0x25cd   :  { %v3494_v25 = vrot.slane %v6063_v19, 2 }
0x25cf   :  { %v3481_v27 = vpop.permute.xlu0 %3480  ;;  %3495 = vrot.lane.b32.xlu1 %v3494_v25, %s5164_s23 }
0x25d0   :  { %v6067_v28 = vmul.f32 %v4978_v1, %v3481_v27 }
0x25d2   :  { %v3600_v49 = vrot.slane %v6067_v28, 4 }
0x25d4   :  { %3601 = vrot.lane.b32.xlu0 %v3600_v49, %s5164_s23 }
0x2641   :  { %v3496_v14 = vpop.permute.xlu1 %3495 }
0x2642   :  { %4688 = vmatmul.mubr.msk.f32.vlgmr.msra.gmra.mxu1 %vm148_vm1, %v3496_v14 }
0x2643   :  { %4702 = vmatpush3.msra.mxu1 %v5764_v31  ;;  %4709 = vmatprep.mubr.msk.f32.mxu1 %vm5162_vm0, %v5161_v0  ;;  %v5020_v31 = vld [vmem:[#allocation13 + $0x10] sm:$0xff] }
0x2644   :  { %4703 = vmatprep.subr.mxu1 %v5161_v0 }
0x2645   :  { %4704 = vmatpush3.msra.mxu1 %v5767_v17  ;;  %v5021_v17 = vld [vmem:[#allocation13 + $0x8] sm:$0xff] }
0x2646   :  { %v3602_v57 = vpop.permute.xlu0 %3601  ;;  %4705 = vmatprep.subr.mxu1 %v5161_v0 }
0x2647   :  { %4699 = vmatmul.mubr.msk.f32.vlgmr.msra.gmra.mxu0 %vm148_vm1, %v3602_v57  ;;  %4706 = vmatpush3.msra.mxu1 %v5772_v29  ;;  %v5022_v29 = vld [vmem:[#allocation13] sm:$0xff] }
0x2648   :  { %4713 = vmatpush3.msra.mxu0 %v5019_v33  ;;  %4707 = vmatprep.subr.mxu1 %v5161_v0 }
0x2649   :  { %4714 = vmatprep.subr.mxu0 %v5161_v0  ;;  %4708 = vmatpush3.msra.mxu1 %v5777_v38 }
0x264a   :  { %4715 = vmatpush3.msra.mxu0 %v5020_v31  ;;  %4720 = vmatprep.mubr.msk.f32.mxu0 %vm5162_vm0, %v5161_v0 }
0x264b   :  { %4716 = vmatprep.subr.mxu0 %v5161_v0 }
0x264c   :  { %4717 = vmatpush3.msra.mxu0 %v5021_v17 }
0x264d   :  { %4718 = vmatprep.subr.mxu0 %v5161_v0 }
0x264e   :  { %4719 = vmatpush3.msra.mxu0 %v5022_v29 }
0x2702   :  { %v3565_v34 = vpop.f32.mrf.mxu1 }
0x2703   :  { %v3570_v37 = vrot.slane %v3565_v34, 4 }
0x2704   :  { %v4689_v32 = vpop.f32.mrf.mxu1 }
0x2705   :  { %v3572_v5 = vadd.f32 %v3570_v37, %v5821_v52 }
0x2707   :  { %4983 = vtanh.f32 %v3572_v5  ;;  %v3671_v38 = vpop.f32.mrf.mxu0  ;;  %v4187_v0 = vmul.f32 -1.442695, %v3572_v5 }
0x2708   :  { %v3676_v18 = vrot.slane %v3671_v38, 6 }
0x2709   :  { %v4700_v7 = vpop.f32.mrf.mxu0 }
0x270a   :  { %v3678_v40 = vadd.f32 %v3676_v18, %v5817_v45 }
0x270c   :  { %4985 = vtanh.f32 %v3678_v40  ;;  %v4189_v10 = vmul.f32 -1.442695, %v3678_v40 }
0x270d   :  { %4987 = vpow2.f32 %v4187_v0 }
0x270e   :  { %4989 = vpow2.f32 %v4189_v10 }
0x2714   :  { %v4984_v41 = vpop.eup %4983 }
0x2715   :  { %3585 = vrot.lane.b32.xlu1 %v4984_v41, %s5163_s2 }
0x2719   :  { %v4986_v43 = vpop.eup %4985 }
0x271a   :  { %3691 = vrot.lane.b32.xlu0 %v4986_v43, %s5163_s2  ;;  %v4988_v9 = vpop.eup %4987 }
0x271b   :  { %v3576_v44 = vadd.f32 1.0, %v4988_v9  ;;  %v4990_v35 = vpop.eup %4989 }
0x271c   :  { %v3682_v46 = vadd.f32 1.0, %v4990_v35 }
0x271d   :  { %4991 = vrcp.f32 %v3576_v44 }
0x271e   :  { %4993 = vrcp.f32 %v3682_v46 }
0x272a   :  { %v4992_v12 = vpop.eup %4991 }
0x272b   :  { %v4994_v21 = vpop.eup %4993  ;;  %v3583_v56 = vmul.f32 %v4992_v12, %v3581_v54 }
0x272c   :  { %v3689_v60 = vmul.f32 %v4994_v21, %v3687_v59 }
0x2787   :  { %v3586_v50 = vpop.permute.xlu1 %3585 }
0x2788   :  { %v3588_v53 = vmul.f32 %v4992_v12, %v3586_v50 }
0x278a   :  { %3590 = vrot.lane.b32.xlu1 %v3588_v53, %s5164_s23 }
0x278c   :  { %v3692_v24 = vpop.permute.xlu0 %3691 }
0x278d   :  { %v3694_v26 = vmul.f32 %v4994_v21, %v3692_v24 }
0x278f   :  { %3696 = vrot.lane.b32.xlu0 %v3694_v26, %s5164_s23 }
0x27fc   :  { %v3591_v20 = vpop.permute.xlu1 %3590 }
0x27fd   :  { %v3593_v23 = vadd.f32 %v3591_v20, %v3583_v56 }
0x27ff   :  { %4995 = vtanh.f32 %v3593_v23  ;;  %v3803_v7 = vrot.slane %v3593_v23, 6 }
0x2801   :  { %v3697_v58 = vpop.permute.xlu0 %3696 }
0x2802   :  { %v3699_v51 = vadd.f32 %v3697_v58, %v3689_v60 }
0x2804   :  { %4997 = vtanh.f32 %v3699_v51  ;;  %v3906_v41 = vrot.slane %v3699_v51, 2 }
0x280c   :  { %v4996_v1 = vpop.eup %4995 }
0x280d   :  { %3596 = vrot.lane.b32.xlu1 %v4996_v1, %s5163_s2 }
0x2811   :  { %v4998_v42 = vpop.eup %4997 }
0x2812   :  { %3702 = vrot.lane.b32.xlu0 %v4998_v42, %s5163_s2 }
0x287f   :  { %v3597_v30 = vpop.permute.xlu1 %3596 }
0x2880   :  { %v6097_v16 = vmul.f32 %v4992_v12, %v3597_v30 }
0x2882   :  { %v3716_v22 = vrot.slane %v6097_v16, 4 }
0x2884   :  { %v3703_v61 = vpop.permute.xlu0 %3702  ;;  %3717 = vrot.lane.b32.xlu1 %v3716_v22, %s5164_s23 }
0x2885   :  { %v3705_v62 = vmul.f32 %v4994_v21, %v3703_v61 }
0x2887   :  { %v3822_v2 = vrot.slane %v3705_v62, 2 }
0x2889   :  { %3823 = vrot.lane.b32.xlu0 %v3822_v2, %s5164_s23 }
0x28f6   :  { %v3718_v3 = vpop.permute.xlu1 %3717 }
0x28f7   :  { %4710 = vmatmul.mubr.msk.f32.vlgmr.msra.gmra.mxu1 %vm148_vm1, %v3718_v3  ;;  %v4198_v3 = vld [vmem:[%s6190_s12] ss:$0 sm:$0xff] }
0x28fb   :  { %v3824_v4 = vpop.permute.xlu0 %3823 }
0x28fc   :  { %4721 = vmatmul.mubr.msk.f32.vlgmr.msra.gmra.mxu0 %vm148_vm1, %v3824_v4 }
0x29b7   :  { %v3787_v8 = vpop.f32.mrf.mxu1 }
0x29b8   :  { %v3792_v36 = vrot.slane %v3787_v8, 2 }
0x29b9   :  { %v4711_v11 = vpop.f32.mrf.mxu1 }
0x29ba   :  { %v3794_v13 = vadd.f32 %v3792_v36, %v5821_v52 }
0x29bc   :  { %4999 = vtanh.f32 %v3794_v13  ;;  %v3893_v25 = vpop.f32.mrf.mxu0  ;;  %v4191_v33 = vmul.f32 -1.442695, %v3794_v13 }
0x29bd   :  { %v3897_v27 = vadd.f32 %v3893_v25, %v5817_v45 }
0x29be   :  { %v4722_v49 = vpop.f32.mrf.mxu0 }
0x29bf   :  { %5001 = vtanh.f32 %v3897_v27  ;;  %v4193_v31 = vmul.f32 -1.442695, %v3897_v27 }
0x29c0   :  { %5003 = vpow2.f32 %v4191_v33 }
0x29c1   :  { %5005 = vpow2.f32 %v4193_v31 }
0x29c9   :  { %v5000_v14 = vpop.eup %4999 }
0x29ca   :  { %3807 = vrot.lane.b32.xlu0 %v5000_v14, %s5163_s2 }
0x29cc   :  { %v5002_v57 = vpop.eup %5001 }
0x29cd   :  { %3910 = vrot.lane.b32.xlu1 %v5002_v57, %s5163_s2  ;;  %v5004_v17 = vpop.eup %5003 }
0x29ce   :  { %v5006_v29 = vpop.eup %5005  ;;  %v3798_v34 = vadd.f32 1.0, %v5004_v17 }
0x29cf   :  { %v3901_v52 = vadd.f32 1.0, %v5006_v29 }
0x29d0   :  { %5007 = vrcp.f32 %v3798_v34 }
0x29d1   :  { %5009 = vrcp.f32 %v3901_v52 }
0x29dd   :  { %v6108_v37 = vpop.eup %5007 }
0x29de   :  { %v5010_v5 = vpop.eup %5009  ;;  %v3805_v40 = vmul.f32 %v6108_v37, %v3803_v7 }
0x29df   :  { %v3908_v10 = vmul.f32 %v5010_v5, %v3906_v41 }
0x2a3c   :  { %v3808_v45 = vpop.permute.xlu0 %3807 }
0x2a3d   :  { %v3810_v32 = vmul.f32 %v6108_v37, %v3808_v45 }
0x2a3f   :  { %v3911_v38 = vpop.permute.xlu1 %3910  ;;  %3812 = vrot.lane.b32.xlu0 %v3810_v32, %s5164_s23 }
0x2a40   :  { %v3913_v18 = vmul.f32 %v5010_v5, %v3911_v38 }
0x2a42   :  { %3915 = vrot.lane.b32.xlu1 %v3913_v18, %s5164_s23 }
0x2ab1   :  { %v3813_v43 = vpop.permute.xlu0 %3812 }
0x2ab2   :  { %v3815_v0 = vadd.f32 %v3813_v43, %v3805_v40 }
0x2ab4   :  { %5011 = vtanh.f32 %v3815_v0  ;;  %v3916_v9 = vpop.permute.xlu1 %3915 }
0x2ab5   :  { %v3918_v44 = vadd.f32 %v3916_v9, %v3908_v10 }
0x2ab7   :  { %5013 = vtanh.f32 %v3918_v44 }
0x2ac1   :  { %v5012_v35 = vpop.eup %5011 }
0x2ac2   :  { %3818 = vrot.lane.b32.xlu0 %v5012_v35, %s5163_s2 }
0x2ac4   :  { %v5014_v46 = vpop.eup %5013 }
0x2ac5   :  { %3921 = vrot.lane.b32.xlu1 %v5014_v46, %s5163_s2 }
0x2ac6   :  { %2831 = vrot.lane.b32.xlu0 %v5929_v55, %s5164_s23  ;;  %v3944_v55 = vld [vmem:[%s6189_s11 + $0x8] sm:$0xff] }
0x2ac9   :  { %2609 = vrot.lane.b32.xlu1 %v5883_v63, %s5164_s23  ;;  %v3946_v63 = vld [vmem:[%s6189_s11 + $0x18] sm:$0xff] }
0x2aca   :  { %3271 = vrot.lane.b32.xlu0 %v6020_v39, %s5164_s23  ;;  %4723 = vmatprep.subr.mxu1 %v3946_v63 }
0x2acb   :  { %4724 = vmatpush3.msra.mxu1 %v3946_v63 }
0x2acd   :  { %3050 = vrot.lane.b32.xlu1 %v5975_v47, %s5164_s23  ;;  %v3943_v47 = vld [vmem:[%s6189_s11] sm:$0xff] }
0x2ace   :  { %3712 = vrot.lane.b32.xlu0 %v3705_v62, %s5164_s23 }
0x2ad1   :  { %3490 = vrot.lane.b32.xlu1 %v6067_v28, %s5164_s23  ;;  %v3937_v28 = vld [vmem:[#allocation14] sm:$0xff] }
0x2ad2   :  { %2395 = vrot.lane.b32.xlu0 %v5840_v15, %s5164_s23  ;;  %v3945_v15 = vld [vmem:[%s6189_s11 + $0x10] sm:$0xff] }
0x2ad3   :  { %4725 = vmatprep.subr.mxu1 %v3945_v15 }
0x2ad4   :  { %4726 = vmatpush3.msra.mxu1 %v3945_v15 }
0x2ad5   :  { %2614 = vrot.lane.b32.xlu1 %v5887_v6, %s5164_s23  ;;  %v3940_v6 = vld [vmem:[#allocation14 + $0x18] sm:$0xff]  ;;  %4727 = vmatprep.subr.mxu1 %v3944_v55 }
0x2ad6   :  { %2836 = vrot.lane.b32.xlu0 %v5933_v48, %s5164_s23  ;;  %4734 = vmatprep.subr.mxu0 %v3940_v6  ;;  %v3939_v48 = vld [vmem:[#allocation14 + $0x10] sm:$0xff] }
0x2ad7   :  { %4735 = vmatpush3.msra.mxu0 %v3940_v6  ;;  %4728 = vmatpush3.msra.mxu1 %v3944_v55 }
0x2ad8   :  { %4736 = vmatprep.subr.mxu0 %v3939_v48  ;;  %4729 = vmatprep.subr.mxu1 %v3943_v47 }
0x2ad9   :  { %3485 = vrot.lane.b32.xlu1 %v6063_v19, %s5164_s23  ;;  %4737 = vmatpush3.msra.mxu0 %v3939_v48  ;;  %v3938_v19 = vld [vmem:[#allocation14 + $0x8] sm:$0xff] }
0x2ada   :  { %3707 = vrot.lane.b32.xlu0 %v6097_v16, %s5164_s23  ;;  %4730 = vmatpush3.msra.mxu1 %v3943_v47 }
0x2adb   :  { %4738 = vmatprep.subr.mxu0 %v3938_v19 }
0x2adc   :  { %4739 = vmatpush3.msra.mxu0 %v3938_v19 }
0x2add   :  { %4740 = vmatprep.subr.mxu0 %v3937_v28 }
0x2ade   :  { %4741 = vmatpush3.msra.mxu0 %v3937_v28 }
0x2b34   :  { %v3819_v39 = vpop.permute.xlu0 %3818 }
0x2b35   :  { %v3821_v24 = vmul.f32 %v6108_v37, %v3819_v39 }
0x2b37   :  { %v3922_v12 = vpop.permute.xlu1 %3921 }
0x2b38   :  { %v3924_v50 = vmul.f32 %v5010_v5, %v3922_v12  ;;  %v2832_v53 = vpop.permute.xlu0 %2831 }
0x2b39   :  { %2834 = vst.msk [vmem:[#allocation4] sm:$0x30] %vm667_vm5, %v2832_v53 }
0x2b3a   :  { %3931 = vrot.lane.b32.xlu1 %v3924_v50, %s5164_s23 }
0x2b3b   :  { %v2610_v21 = vpop.permute.xlu1 %2609 }
0x2b3c   :  { %2612 = vst.msk [vmem:[#allocation4] sm:$0xc] %vm661_vm3, %v2610_v21  ;;  %v3272_v26 = vpop.permute.xlu0 %3271 }
0x2b3d   :  { %3274 = vst.msk [vmem:[#allocation5] sm:$0xc0] %vm446_vm4, %v3272_v26 }
0x2b3e   :  { %3926 = vrot.lane.b32.xlu1 %v3821_v24, %s5164_s23 }
0x2b3f   :  { %v3051_v54 = vpop.permute.xlu1 %3050 }
0x2b40   :  { %3053 = vst.msk [vmem:[#allocation4] sm:$0xc0] %vm446_vm4, %v3051_v54  ;;  %v3713_v56 = vpop.permute.xlu0 %3712 }
0x2b41   :  { %3715 = vst.msk [vmem:[#allocation5] sm:$0xc] %vm661_vm3, %v3713_v56 }
0x2b43   :  { %v3491_v20 = vpop.permute.xlu1 %3490 }
0x2b44   :  { %3493 = vst.msk [vmem:[#allocation5] sm:$0x30] %vm667_vm5, %v3491_v20  ;;  %v2396_v23 = vpop.permute.xlu0 %2395 }
0x2b45   :  { %2398 = vst.msk [vmem:[#allocation5 + $0x8] sm:$0xc0] %vm446_vm4, %v2396_v23 }
0x2b47   :  { %v2615_v59 = vpop.permute.xlu1 %2614  ;;  %v3935_v60 = vld [vmem:[#allocation4] sm:$0xff] }
0x2b48   :  { %2617 = vst.msk [vmem:[#allocation5 + $0x8] sm:$0x30] %vm667_vm5, %v2615_v59  ;;  %4742 = vmatprep.mubr.msk.f32.mxu0 %vm148_vm1, %v3935_v60  ;;  %v2837_v58 = vpop.permute.xlu0 %2836 }
0x2b49   :  { %2839 = vst.msk [vmem:[#allocation5 + $0x8] sm:$0xc] %vm661_vm3, %v2837_v58 }
0x2b4b   :  { %v3486_v51 = vpop.permute.xlu1 %3485 }
0x2b4c   :  { %3488 = vst.msk [vmem:[#allocation4 + $0x8] sm:$0xc] %vm661_vm3, %v3486_v51  ;;  %v3708_v1 = vpop.permute.xlu0 %3707 }
0x2b4d   :  { %3710 = vst.msk [vmem:[#allocation4 + $0x8] sm:$0x30] %vm667_vm5, %v3708_v1 }
0x2b50   :  { %v3942_v22 = vld [vmem:[#allocation5 + $0x8] sm:$0xff] }
0x2bac   :  { %v3932_v42 = vpop.permute.xlu1 %3931 }
0x2bad   :  { %3934 = vst.msk [vmem:[#allocation5] sm:$0x3] %vm440_vm2, %v3932_v42 }
0x2bb0   :  { %v3927_v30 = vpop.permute.xlu1 %3926 }
0x2bb1   :  { %3929 = vst.msk [vmem:[#allocation4 + $0x8] sm:$0xc0] %vm446_vm4, %v3927_v30 }
0x2bb4   :  { %v3941_v16 = vld [vmem:[#allocation5] sm:$0xff] }
0x2bb5   :  { %4731 = vmatprep.mubr.msk.f32.mxu1 %vm148_vm1, %v3941_v16 }
0x2bb6   :  { %4732 = vmatmul.mubr.msk.f32.vlgmr.msra.gmra.mxu1 %vm148_vm1, %v3942_v22 }
0x2bb8   :  { %v3936_v61 = vld [vmem:[#allocation4 + $0x8] sm:$0xff] }
0x2bb9   :  { %4743 = vmatmul.mubr.msk.f32.vlgmr.msra.gmra.mxu0 %vm148_vm1, %v3936_v61 }
0x2c76   :  { %v4733_v62 = vpop.f32.mrf.mxu1 }
0x2c78   :  { %v4019_v8 = vpop.f32.mrf.mxu1 }
0x2c79   :  { %v4744_v2 = vpop.f32.mrf.mxu0 }
0x2c7a   :  { %v4106_v4 = vadd.f32 %v4744_v2, %v4733_v62 }
0x2c7b   :  { %v4100_v36 = vpop.f32.mrf.mxu0 }
0x2c7c   :  { %v4117_v11 = vadd.f32 %v4198_v3, %v4106_v4  ;;  %v4101_v13 = vadd.f32 %v4100_v36, %v4019_v8 }
0x2c7e   :  { %4119 = vst [vmem:[%s6191_s13 + $0x8] sm:$0xff] %v4117_v11  ;;  %v4116_v25 = vadd.f32 %v4198_v3, %v4101_v13 }
0x2c80   :  { %4118 = vst [vmem:[%s6191_s13] sm:$0xff] %v4116_v25 }
0x2c81   :  { %4124 = vsyncpa [#allocation7], 1 }
0x2c82   :  { %4125 = vsyncpa [#allocation9], 1 }
0x2c83   :  { %4126 = vsyncpa [#allocation12], 1 }
0x2c84   :  { %4127 = vsyncpa [#allocation15], 1 }

</bundles_post_ra>
